<compile_context>
chip_gen: v6e
topology: v6e:2x2x1
jax: 0.10.0
libtpu: 0.0.40
codegen_flags: <defaults>
</compile_context>

<pallas_src>
import functools

import jax
import jax.numpy as jnp
import numpy as np
from jax.experimental import pallas as pl
from jax.experimental.pallas import tpu as pltpu


def _round_up(x, m):
    return (x + m - 1) // m * m


def _vmem_capacity_bytes():
    """Physical per-core VMEM; conservative 64 MiB (v7x) fallback if query fails."""
    try:
        info = pltpu.get_tpu_info()
        cap = getattr(info, "vmem_capacity_bytes", None)
        if cap:
            return int(cap)
    except Exception:
        pass
    return 64 << 20


def _upsampling_kernel(aL_ref, aR_ref, hL_ref, hR_ref, w_ref, o_ref,
                       sum_ref, ssq_ref, *, M, Wp, C, count, eps):
    # aL_ref/aR_ref: (1, M, Cpi)  tile of x[m, n] / x[m, n+1]   (M = TH*Wp flat rows)
    # hL_ref/hR_ref: (1, Wp, Cpi) halo = first image row of the next tile (zero row
    #                              for the last tile -- the input is padded with it)
    # w_ref:         (Cpi, 9*C)   packed taps, columns:
    #                  [0:4C]  x[m,n]     -> (p00, p01, p10, p11) = taps (1,1)(1,2)(2,1)(2,2)
    #                  [4C:6C] x[m+1,n]   -> (p10, p11)           = taps (0,1)(0,2)
    #                  [6C:8C] x[m,n+1]   -> (p01, p11)           = taps (1,0)(2,0)
    #                  [8C:9C] x[m+1,n+1] -> (p11,)               = tap  (0,0)
    # o_ref:         (1, 2, 2, M, C) output parities for this tile
    s = pl.program_id(1)          # sweep: 0 = accumulate stats, 1 = normalize + write
    t = pl.program_id(2)          # spatial tile index
    Mt = M - Wp                   # rows whose "row below" lives inside this tile

    # Reset per-sample InstanceNorm statistics at the start of the stats sweep.
    @pl.when(jnp.logical_and(s == 0, t == 0))
    def _():
        sum_ref[...] = jnp.zeros_like(sum_ref)
        ssq_ref[...] = jnp.zeros_like(ssq_ref)

    # Two large + two tiny MXU calls; no VMEM staging copies, f32 accumulation.
    rL = jnp.dot(aL_ref[0], w_ref[:, 0:6 * C],
                 preferred_element_type=jnp.float32)          # (M, 6C)
    rR = jnp.dot(aR_ref[0], w_ref[:, 6 * C:9 * C],
                 preferred_element_type=jnp.float32)          # (M, 3C)
    rhL = jnp.dot(hL_ref[0], w_ref[:, 4 * C:6 * C],
                  preferred_element_type=jnp.float32)         # (Wp, 2C)
    rhR = jnp.dot(hR_ref[0], w_ref[:, 8 * C:9 * C],
                  preferred_element_type=jnp.float32)         # (Wp, C)

    # Phase values.  p10/p11 are split at the tile's last image row, whose "row
    # below" comes from the halo matmul instead of a row-shifted slice of rL/rR.
    # (All row splits are multiples of Wp, i.e. multiples of 8 -> layout clean.)
    p00 = rL[:, 0:C]                                          # y[2m,   2n  ]
    p01 = rL[:, C:2 * C] + rR[:, 0:C]                         # y[2m,   2n+1]
    pieces = [(0, 0, 0, p00), (0, 1, 0, p01)]
    if Mt > 0:
        p10_top = rL[0:Mt, 2 * C:3 * C] + rL[Wp:M, 4 * C:5 * C]
        p11_top = (rL[0:Mt, 3 * C:4 * C] + rR[0:Mt, C:2 * C]
                   + rL[Wp:M, 5 * C:6 * C] + rR[Wp:M, 2 * C:3 * C])
        pieces += [(1, 0, 0, p10_top), (1, 1, 0, p11_top)]
    p10_bot = rL[Mt:M, 2 * C:3 * C] + rhL[:, 0:C]             # y[2m+1, 2n  ] (last row)
    p11_bot = (rL[Mt:M, 3 * C:4 * C] + rR[Mt:M, C:2 * C]
               + rhL[:, C:2 * C] + rhR[:, 0:C])               # y[2m+1, 2n+1] (last row)
    pieces += [(1, 0, Mt, p10_bot), (1, 1, Mt, p11_bot)]

    @pl.when(s == 0)
    def _():
        acc_s = sum_ref[...]
        acc_q = ssq_ref[...]
        for _, _, _, v in pieces:
            acc_s = acc_s + v.sum(axis=0, keepdims=True)
            acc_q = acc_q + (v * v).sum(axis=0, keepdims=True)
        sum_ref[...] = acc_s
        ssq_ref[...] = acc_q

    @pl.when(s == 1)
    def _():
        inv_cnt = jnp.float32(1.0 / count)
        mean = sum_ref[...] * inv_cnt
        # Clamp: single-pass E[x^2]-E[x]^2 can cancel slightly negative in f32.
        var = jnp.maximum(ssq_ref[...] * inv_cnt - mean * mean, 0.0)
        inv = jax.lax.rsqrt(var + jnp.float32(eps))
        for py, px, r0, v in pieces:
            o_ref[0, py, px, pl.ds(r0, v.shape[0])] = jnp.maximum(
                (v - mean) * inv, 0.0).astype(o_ref.dtype)


def upsampling_block(x, weight, bias=None, eps=1e-5, *,
                     compute_dtype=jnp.bfloat16, out_dtype=jnp.float32,
                     max_tile_positions=4096):
    """x: (N, Cin, H, W); weight: (Cin, Cout, 3, 3) (PyTorch ConvTranspose2d layout);
    bias: (Cout,) -- accepted for API parity but unused: a per-channel constant bias
    is cancelled exactly by the following InstanceNorm (affine=False).
    Returns (N, Cout, 2H, 2W) in out_dtype (default float32)."""
    del bias  # mathematically cancelled by InstanceNorm; also improves var conditioning
    N, C_in, H, W = x.shape
    C_out = weight.shape[1]

    Cpi = _round_up(C_in, 128)                    # lane-dense channel padding
    Cpo = _round_up(C_out, 128)
    Wp = _round_up(W, 8)                          # sublane-friendly width

    itm = jnp.dtype(compute_dtype).itemsize
    oitm = jnp.dtype(out_dtype).itemsize

    # ---- tile sizing from the real VMEM budget (v7x: 64 MiB, v5e/v6e: 128 MiB) ----
    vmem_cap = _vmem_capacity_bytes()
    budget = vmem_cap - (16 << 20)                # pipelining / compiler headroom
    w_blk = Cpi * 9 * Cpo * itm
    per_pos = (2 * 2 * Cpi * itm                  # xL/xR blocks, double-buffered
               + 2 * 4 * Cpo * oitm               # phase output block, double-buffered
               + 14 * Cpo * 4)                    # live f32 matmul results / temps
    fixed = 2 * (2 * Wp * Cpi * itm + w_blk) + (4 << 20)
    fit_pos = max(Wp, (budget - fixed) // per_pos)
    tile_pos = max(Wp, min(int(max_tile_positions), int(fit_pos)))
    TH = max(1, min(H, tile_pos // Wp))           # input image rows per spatial tile
    Hp = _round_up(H, TH)
    T = Hp // TH
    M = TH * Wp                                   # flat spatial positions per tile

    # ---- glue: pad + build the two column-shifted flattened input copies --------
    x_nhwc = jnp.transpose(x, (0, 2, 3, 1)).astype(compute_dtype)          # (N,H,W,Cin)
    xp = jnp.pad(x_nhwc, ((0, 0), (0, Hp + 1 - H), (0, Wp + 1 - W), (0, Cpi - C_in)))
    xL = xp[:, :, 0:Wp, :].reshape(N, (Hp + 1) * Wp, Cpi)      # x[m, n]
    xR = xp[:, :, 1:Wp + 1, :].reshape(N, (Hp + 1) * Wp, Cpi)  # x[m, n+1]

    # ---- glue: per-tap weights, taps concatenated along the Cout axis -----------
    wf = weight.astype(jnp.float32)
    wpad = jnp.zeros((Cpi, Cpo, 3, 3), jnp.float32).at[:C_in, :C_out].set(wf)
    tap = lambda ky, kx: wpad[:, :, ky, kx]
    wpack = jnp.concatenate(
        [tap(1, 1), tap(1, 2), tap(2, 1), tap(2, 2),   # x[m,n]     -> p00,p01,p10,p11
         tap(0, 1), tap(0, 2),                          # x[m+1,n]   -> p10,p11
         tap(1, 0), tap(2, 0),                          # x[m,n+1]   -> p01,p11
         tap(0, 0)],                                    # x[m+1,n+1] -> p11
        axis=1).astype(compute_dtype)                   # (Cpi, 9*Cpo)

    # ---- VMEM limit for the compiler (always below physical capacity) ------------
    need = (2 * (2 * M * Cpi * itm + 2 * Wp * Cpi * itm + w_blk + 4 * M * Cpo * oitm)
            + 14 * M * Cpo * 4 + 4 * Cpo * 4 + (4 << 20))
    vmem_limit = int(min(max(need, 32 << 20), vmem_cap - (4 << 20)))

    kernel = functools.partial(_upsampling_kernel, M=M, Wp=Wp, C=Cpo,
                               count=float(4 * H * W), eps=float(eps))

    out_phases = pl.pallas_call(
        kernel,
        out_shape=jax.ShapeDtypeStruct((N, 2, 2, Hp * Wp, Cpo), out_dtype),
        grid_spec=pltpu.PrefetchScalarGridSpec(
            num_scalar_prefetch=0,
            grid=(N, 2, T),
            in_specs=[
                pl.BlockSpec((1, M, Cpi), lambda n, s, t: (n, t, 0)),              # x[m, n]
                pl.BlockSpec((1, M, Cpi), lambda n, s, t: (n, t, 0)),              # x[m, n+1]
                pl.BlockSpec((1, Wp, Cpi), lambda n, s, t: (n, (t + 1) * TH, 0)),  # halo left
                pl.BlockSpec((1, Wp, Cpi), lambda n, s, t: (n, (t + 1) * TH, 0)),  # halo right
                pl.BlockSpec((Cpi, 9 * Cpo), lambda n, s, t: (0, 0)),              # packed taps
            ],
            # Stats sweep (s==0) pins the output block to tile 0 (never stored);
            # normalize sweep (s==1) writes each tile exactly once.
            out_specs=pl.BlockSpec((1, 2, 2, M, Cpo),
                                   lambda n, s, t: (n, 0, 0, t * s, 0)),
            scratch_shapes=[
                pltpu.VMEM((1, Cpo), jnp.float32),          # per-channel sum
                pltpu.VMEM((1, Cpo), jnp.float32),          # per-channel sum of squares
            ],
        ),
        compiler_params=pltpu.CompilerParams(
            dimension_semantics=("parallel", "arbitrary", "arbitrary"),
            vmem_limit_bytes=vmem_limit,
        ),
    )(xL, xR, xL, xR, wpack)

    # ---- glue: crop padding FIRST, then one fused transpose back to NCHW --------
    y = out_phases.reshape(N, 2, 2, Hp, Wp, Cpo)[:, :, :, :H, :W, :C_out]
    y = jnp.transpose(y, (0, 5, 3, 1, 4, 2)).reshape(N, C_out, 2 * H, 2 * W)
    return y


def upsampling_block_ref(x, weight, bias, eps=1e-5):
    """Pure-JAX reference of the PyTorch module (NCHW)."""
    w_conv = jnp.transpose(weight, (1, 0, 2, 3))[:, :, ::-1, ::-1]  # (Cout, Cin, 3, 3)
    y = jax.lax.conv_general_dilated(
        x.astype(jnp.float32), w_conv.astype(jnp.float32),
        window_strides=(1, 1), padding=[(1, 2), (1, 2)], lhs_dilation=(2, 2),
        dimension_numbers=("NCHW", "OIHW", "NCHW"))
    y = y + bias[None, :, None, None]
    mean = y.mean(axis=(2, 3), keepdims=True)
    var = y.var(axis=(2, 3), keepdims=True)
    y = (y - mean) / jnp.sqrt(var + eps)
    return jnp.maximum(y, 0.0)


if __name__ == "__main__":
    key = jax.random.PRNGKey(0)

    def make_inputs(k, N, Cin, Cout, H, W):
        kx, kw, kb = jax.random.split(k, 3)
        x = jax.random.normal(kx, (N, Cin, H, W), dtype=jnp.float32)
        # ConvTranspose2d weight layout: (in_channels, out_channels, kH, kW)
        w = jax.random.normal(kw, (Cin, Cout, 3, 3), dtype=jnp.float32) * 0.1
        b = jax.random.normal(kb, (Cout,), dtype=jnp.float32) * 0.1
        return x, w, b

    # Case 1: f32 compute path, single spatial tile -> tight numerical check.
    x, w, b = make_inputs(jax.random.fold_in(key, 0), 2, 4, 8, 16, 16)
    out = jax.block_until_ready(upsampling_block(x, w, b, compute_dtype=jnp.float32))
    ref = jax.block_until_ready(upsampling_block_ref(x, w, b))
    assert out.shape == (2, 8, 32, 32), out.shape
    np.testing.assert_allclose(np.asarray(out), np.asarray(ref), rtol=2e-4, atol=2e-4)

    # Case 2: default bf16 MXU path, multi-tile two-sweep InstanceNorm (T=4).
    x, w, b = make_inputs(jax.random.fold_in(key, 1), 2, 8, 16, 32, 32)
    out = jax.block_until_ready(upsampling_block(x, w, b, max_tile_positions=256))
    ref = jax.block_until_ready(upsampling_block_ref(x, w, b))
    assert out.shape == (2, 16, 64, 64), out.shape
    np.testing.assert_allclose(np.asarray(out), np.asarray(ref), rtol=5e-2, atol=5e-2)

    # Case 3: bf16 output stream (halves kernel write-back + transpose traffic).
    out = jax.block_until_ready(
        upsampling_block(x, w, b, out_dtype=jnp.bfloat16, max_tile_positions=256))
    out_f32 = np.asarray(jnp.asarray(out, jnp.float32))
    np.testing.assert_allclose(out_f32, np.asarray(ref), rtol=1.5e-1, atol=1.5e-1)

    print("KERNEL_OK")
</pallas_src>

<mosaic_0001>
module attributes {stable_mosaic.version = 11 : i64} {
  func.func @_upsampling_kernel(%arg0: i32, %arg1: i32, %arg2: i32, %arg3: memref<1x256x128xf32, #tpu.memory_space<vmem>>, %arg4: memref<1x256x128xf32, #tpu.memory_space<vmem>>, %arg5: memref<1x16x128xf32, #tpu.memory_space<vmem>>, %arg6: memref<1x16x128xf32, #tpu.memory_space<vmem>>, %arg7: memref<128x1152xf32, #tpu.memory_space<vmem>>, %arg8: memref<1x2x2x256x128xf32, #tpu.memory_space<vmem>>, %arg9: memref<1x128xf32, #tpu.memory_space<vmem>>, %arg10: memref<1x128xf32, #tpu.memory_space<vmem>>) attributes {dimension_semantics = [#tpu.dimension_semantics<parallel>, #tpu.dimension_semantics<arbitrary>, #tpu.dimension_semantics<arbitrary>], iteration_bounds = array<i64: 2, 2, 1>, scalar_prefetch = 0 : i64, scratch_operands = 2 : i64, tpu.core_type = #tpu.core_type<tc>, window_params = [{transform_indices = @transform_0, window_bounds = array<i64: 1, 256, 128>}, {transform_indices = @transform_1, window_bounds = array<i64: 1, 256, 128>}, {transform_indices = @transform_2, window_bounds = array<i64: 1, 16, 128>}, {transform_indices = @transform_3, window_bounds = array<i64: 1, 16, 128>}, {pipeline_mode = #tpu.pipeline_mode<synchronous>, transform_indices = @transform_4, window_bounds = array<i64: 128, 1152>}, {transform_indices = @transform_5, window_bounds = array<i64: 1, 2, 2, 256, 128>}]} {
    %c0_i32 = arith.constant 0 : i32
    %0 = arith.cmpi eq, %arg1, %c0_i32 : i32
    %c0_i32_0 = arith.constant 0 : i32
    %1 = arith.cmpi eq, %arg2, %c0_i32_0 : i32
    %2 = arith.andi %0, %1 : i1
    %3 = arith.extui %2 : i1 to i32
    %c0_i32_1 = arith.constant 0 : i32
    %4 = arith.cmpi ne, %3, %c0_i32_1 : i32
    scf.if %4 {
      %cst_24 = arith.constant 0.000000e+00 : f32
      %50 = vector.broadcast %cst_24 : f32 to vector<1x128xf32>
      %c0_25 = arith.constant 0 : index
      %c0_26 = arith.constant 0 : index
      %51 = vector.load %arg9[%c0_25, %c0_26] : memref<1x128xf32, #tpu.memory_space<vmem>>, vector<1x128xf32>
      tpu.vector_store %arg9[%c0_25, %c0_26], %50 {strides = array<i32>} : memref<1x128xf32, #tpu.memory_space<vmem>>, vector<1x128xf32>,
      %cst_27 = arith.constant 0.000000e+00 : f32
      %52 = vector.broadcast %cst_27 : f32 to vector<1x128xf32>
      %c0_28 = arith.constant 0 : index
      %c0_29 = arith.constant 0 : index
      %53 = vector.load %arg10[%c0_28, %c0_29] : memref<1x128xf32, #tpu.memory_space<vmem>>, vector<1x128xf32>
      tpu.vector_store %arg10[%c0_28, %c0_29], %52 {strides = array<i32>} : memref<1x128xf32, #tpu.memory_space<vmem>>, vector<1x128xf32>,
    } else {
    }
    %c0 = arith.constant 0 : index
    %c0_2 = arith.constant 0 : index
    %c0_3 = arith.constant 0 : index
    %5 = vector.load %arg3[%c0, %c0_2, %c0_3] : memref<1x256x128xf32, #tpu.memory_space<vmem>>, vector<1x256x128xf32>
    %6 = vector.shape_cast %5 : vector<1x256x128xf32> to vector<256x128xf32>
    %c0_4 = arith.constant 0 : index
    %c0_5 = arith.constant 0 : index
    %7 = vector.load %arg7[%c0_4, %c0_5] : memref<128x1152xf32, #tpu.memory_space<vmem>>, vector<128x768xf32>
    %cst = arith.constant dense<0.000000e+00> : vector<256x768xf32>
    %8 = tpu.matmul %6, %7, %cst {dimension_numbers = #tpu.dot_dimension_numbers<[1], [0], [0], [1], [0, 0, 1, 1], [], []>} : vector<256x128xf32>, vector<128x768xf32>, vector<256x768xf32> -> vector<256x768xf32>
    %c0_6 = arith.constant 0 : index
    %c0_7 = arith.constant 0 : index
    %c0_8 = arith.constant 0 : index
    %9 = vector.load %arg4[%c0_6, %c0_7, %c0_8] : memref<1x256x128xf32, #tpu.memory_space<vmem>>, vector<1x256x128xf32>
    %10 = vector.shape_cast %9 : vector<1x256x128xf32> to vector<256x128xf32>
    %c0_9 = arith.constant 0 : index
    %c768 = arith.constant 768 : index
    %11 = vector.load %arg7[%c0_9, %c768] : memref<128x1152xf32, #tpu.memory_space<vmem>>, vector<128x384xf32>
    %cst_10 = arith.constant dense<0.000000e+00> : vector<256x384xf32>
    %12 = tpu.matmul %10, %11, %cst_10 {dimension_numbers = #tpu.dot_dimension_numbers<[1], [0], [0], [1], [0, 0, 1, 1], [], []>} : vector<256x128xf32>, vector<128x384xf32>, vector<256x384xf32> -> vector<256x384xf32>
    %c0_11 = arith.constant 0 : index
    %c0_12 = arith.constant 0 : index
    %c0_13 = arith.constant 0 : index
    %13 = vector.load %arg5[%c0_11, %c0_12, %c0_13] : memref<1x16x128xf32, #tpu.memory_space<vmem>>, vector<1x16x128xf32>
    %14 = vector.shape_cast %13 : vector<1x16x128xf32> to vector<16x128xf32>
    %c0_14 = arith.constant 0 : index
    %c512 = arith.constant 512 : index
    %15 = vector.load %arg7[%c0_14, %c512] : memref<128x1152xf32, #tpu.memory_space<vmem>>, vector<128x256xf32>
    %cst_15 = arith.constant dense<0.000000e+00> : vector<16x256xf32>
    %16 = tpu.matmul %14, %15, %cst_15 {dimension_numbers = #tpu.dot_dimension_numbers<[1], [0], [0], [1], [0, 0, 1, 1], [], []>} : vector<16x128xf32>, vector<128x256xf32>, vector<16x256xf32> -> vector<16x256xf32>
    %c0_16 = arith.constant 0 : index
    %c0_17 = arith.constant 0 : index
    %c0_18 = arith.constant 0 : index
    %17 = vector.load %arg6[%c0_16, %c0_17, %c0_18] : memref<1x16x128xf32, #tpu.memory_space<vmem>>, vector<1x16x128xf32>
    %18 = vector.shape_cast %17 : vector<1x16x128xf32> to vector<16x128xf32>
    %c0_19 = arith.constant 0 : index
    %c1024 = arith.constant 1024 : index
    %19 = vector.load %arg7[%c0_19, %c1024] : memref<128x1152xf32, #tpu.memory_space<vmem>>, vector<128x128xf32>
    %cst_20 = arith.constant dense<0.000000e+00> : vector<16x128xf32>
    %20 = tpu.matmul %18, %19, %cst_20 {dimension_numbers = #tpu.dot_dimension_numbers<[1], [0], [0], [1], [0, 0, 1, 1], [], []>} : vector<16x128xf32>, vector<128x128xf32>, vector<16x128xf32> -> vector<16x128xf32>
    %21 = vector.extract_strided_slice %8 {offsets = [0, 0], sizes = [256, 128], strides = [1, 1]} : vector<256x768xf32> to vector<256x128xf32>
    %22 = vector.extract_strided_slice %8 {offsets = [0, 128], sizes = [256, 128], strides = [1, 1]} : vector<256x768xf32> to vector<256x128xf32>
    %23 = vector.extract_strided_slice %12 {offsets = [0, 0], sizes = [256, 128], strides = [1, 1]} : vector<256x384xf32> to vector<256x128xf32>
    %24 = arith.addf %22, %23 : vector<256x128xf32>
    %25 = vector.extract_strided_slice %8 {offsets = [0, 256], sizes = [240, 128], strides = [1, 1]} : vector<256x768xf32> to vector<240x128xf32>
    %26 = vector.extract_strided_slice %8 {offsets = [16, 512], sizes = [240, 128], strides = [1, 1]} : vector<256x768xf32> to vector<240x128xf32>
    %27 = arith.addf %25, %26 : vector<240x128xf32>
    %28 = vector.extract_strided_slice %8 {offsets = [0, 384], sizes = [240, 128], strides = [1, 1]} : vector<256x768xf32> to vector<240x128xf32>
    %29 = vector.extract_strided_slice %12 {offsets = [0, 128], sizes = [240, 128], strides = [1, 1]} : vector<256x384xf32> to vector<240x128xf32>
    %30 = arith.addf %28, %29 : vector<240x128xf32>
    %31 = vector.extract_strided_slice %8 {offsets = [16, 640], sizes = [240, 128], strides = [1, 1]} : vector<256x768xf32> to vector<240x128xf32>
    %32 = arith.addf %30, %31 : vector<240x128xf32>
    %33 = vector.extract_strided_slice %12 {offsets = [16, 256], sizes = [240, 128], strides = [1, 1]} : vector<256x384xf32> to vector<240x128xf32>
    %34 = arith.addf %32, %33 : vector<240x128xf32>
    %35 = vector.extract_strided_slice %8 {offsets = [240, 256], sizes = [16, 128], strides = [1, 1]} : vector<256x768xf32> to vector<16x128xf32>
    %36 = vector.extract_strided_slice %16 {offsets = [0, 0], sizes = [16, 128], strides = [1, 1]} : vector<16x256xf32> to vector<16x128xf32>
    %37 = arith.addf %35, %36 : vector<16x128xf32>
    %38 = vector.extract_strided_slice %8 {offsets = [240, 384], sizes = [16, 128], strides = [1, 1]} : vector<256x768xf32> to vector<16x128xf32>
    %39 = vector.extract_strided_slice %12 {offsets = [240, 128], sizes = [16, 128], strides = [1, 1]} : vector<256x384xf32> to vector<16x128xf32>
    %40 = arith.addf %38, %39 : vector<16x128xf32>
    %41 = vector.extract_strided_slice %16 {offsets = [0, 128], sizes = [16, 128], strides = [1, 1]} : vector<16x256xf32> to vector<16x128xf32>
    %42 = arith.addf %40, %41 : vector<16x128xf32>
    %43 = arith.addf %42, %20 : vector<16x128xf32>
    %c0_i32_21 = arith.constant 0 : i32
    %44 = arith.cmpi eq, %arg1, %c0_i32_21 : i32
    %45 = arith.extui %44 : i1 to i32
    %c0_i32_22 = arith.constant 0 : i32
    %46 = arith.cmpi ne, %45, %c0_i32_22 : i32
    scf.if %46 {
      %c0_24 = arith.constant 0 : index
      %c0_25 = arith.constant 0 : index
      %50 = vector.load %arg9[%c0_24, %c0_25] : memref<1x128xf32, #tpu.memory_space<vmem>>, vector<1x128xf32>
      %c0_26 = arith.constant 0 : index
      %c0_27 = arith.constant 0 : index
      %51 = vector.load %arg10[%c0_26, %c0_27] : memref<1x128xf32, #tpu.memory_space<vmem>>, vector<1x128xf32>
      %cst_28 = arith.constant dense<0.000000e+00> : vector<128xf32>
      %52 = vector.multi_reduction <add>, %21, %cst_28 [0] : vector<256x128xf32> to vector<128xf32>
      %53 = vector.shape_cast %52 : vector<128xf32> to vector<1x128xf32>
      %54 = arith.addf %50, %53 : vector<1x128xf32>
      %55 = arith.mulf %21, %21 : vector<256x128xf32>
      %cst_29 = arith.constant dense<0.000000e+00> : vector<128xf32>
      %56 = vector.multi_reduction <add>, %55, %cst_29 [0] : vector<256x128xf32> to vector<128xf32>
      %57 = vector.shape_cast %56 : vector<128xf32> to vector<1x128xf32>
      %58 = arith.addf %51, %57 : vector<1x128xf32>
      %cst_30 = arith.constant dense<0.000000e+00> : vector<128xf32>
      %59 = vector.multi_reduction <add>, %24, %cst_30 [0] : vector<256x128xf32> to vector<128xf32>
      %60 = vector.shape_cast %59 : vector<128xf32> to vector<1x128xf32>
      %61 = arith.addf %54, %60 : vector<1x128xf32>
      %62 = arith.mulf %24, %24 : vector<256x128xf32>
      %cst_31 = arith.constant dense<0.000000e+00> : vector<128xf32>
      %63 = vector.multi_reduction <add>, %62, %cst_31 [0] : vector<256x128xf32> to vector<128xf32>
      %64 = vector.shape_cast %63 : vector<128xf32> to vector<1x128xf32>
      %65 = arith.addf %58, %64 : vector<1x128xf32>
      %cst_32 = arith.constant dense<0.000000e+00> : vector<128xf32>
      %66 = vector.multi_reduction <add>, %27, %cst_32 [0] : vector<240x128xf32> to vector<128xf32>
      %67 = vector.shape_cast %66 : vector<128xf32> to vector<1x128xf32>
      %68 = arith.addf %61, %67 : vector<1x128xf32>
      %69 = arith.mulf %27, %27 : vector<240x128xf32>
      %cst_33 = arith.constant dense<0.000000e+00> : vector<128xf32>
      %70 = vector.multi_reduction <add>, %69, %cst_33 [0] : vector<240x128xf32> to vector<128xf32>
      %71 = vector.shape_cast %70 : vector<128xf32> to vector<1x128xf32>
      %72 = arith.addf %65, %71 : vector<1x128xf32>
      %cst_34 = arith.constant dense<0.000000e+00> : vector<128xf32>
      %73 = vector.multi_reduction <add>, %34, %cst_34 [0] : vector<240x128xf32> to vector<128xf32>
      %74 = vector.shape_cast %73 : vector<128xf32> to vector<1x128xf32>
      %75 = arith.addf %68, %74 : vector<1x128xf32>
      %76 = arith.mulf %34, %34 : vector<240x128xf32>
      %cst_35 = arith.constant dense<0.000000e+00> : vector<128xf32>
      %77 = vector.multi_reduction <add>, %76, %cst_35 [0] : vector<240x128xf32> to vector<128xf32>
      %78 = vector.shape_cast %77 : vector<128xf32> to vector<1x128xf32>
      %79 = arith.addf %72, %78 : vector<1x128xf32>
      %cst_36 = arith.constant dense<0.000000e+00> : vector<128xf32>
      %80 = vector.multi_reduction <add>, %37, %cst_36 [0] : vector<16x128xf32> to vector<128xf32>
      %81 = vector.shape_cast %80 : vector<128xf32> to vector<1x128xf32>
      %82 = arith.addf %75, %81 : vector<1x128xf32>
      %83 = arith.mulf %37, %37 : vector<16x128xf32>
      %cst_37 = arith.constant dense<0.000000e+00> : vector<128xf32>
      %84 = vector.multi_reduction <add>, %83, %cst_37 [0] : vector<16x128xf32> to vector<128xf32>
      %85 = vector.shape_cast %84 : vector<128xf32> to vector<1x128xf32>
      %86 = arith.addf %79, %85 : vector<1x128xf32>
      %cst_38 = arith.constant dense<0.000000e+00> : vector<128xf32>
      %87 = vector.multi_reduction <add>, %43, %cst_38 [0] : vector<16x128xf32> to vector<128xf32>
      %88 = vector.shape_cast %87 : vector<128xf32> to vector<1x128xf32>
      %89 = arith.addf %82, %88 : vector<1x128xf32>
      %90 = arith.mulf %43, %43 : vector<16x128xf32>
      %cst_39 = arith.constant dense<0.000000e+00> : vector<128xf32>
      %91 = vector.multi_reduction <add>, %90, %cst_39 [0] : vector<16x128xf32> to vector<128xf32>
      %92 = vector.shape_cast %91 : vector<128xf32> to vector<1x128xf32>
      %93 = arith.addf %86, %92 : vector<1x128xf32>
      %c0_40 = arith.constant 0 : index
      %c0_41 = arith.constant 0 : index
      %94 = vector.load %arg9[%c0_40, %c0_41] : memref<1x128xf32, #tpu.memory_space<vmem>>, vector<1x128xf32>
      tpu.vector_store %arg9[%c0_40, %c0_41], %89 {strides = array<i32>} : memref<1x128xf32, #tpu.memory_space<vmem>>, vector<1x128xf32>,
      %c0_42 = arith.constant 0 : index
      %c0_43 = arith.constant 0 : index
      %95 = vector.load %arg10[%c0_42, %c0_43] : memref<1x128xf32, #tpu.memory_space<vmem>>, vector<1x128xf32>
      tpu.vector_store %arg10[%c0_42, %c0_43], %93 {strides = array<i32>} : memref<1x128xf32, #tpu.memory_space<vmem>>, vector<1x128xf32>,
    } else {
    }
    %c1_i32 = arith.constant 1 : i32
    %47 = arith.cmpi eq, %arg1, %c1_i32 : i32
    %48 = arith.extui %47 : i1 to i32
    %c0_i32_23 = arith.constant 0 : i32
    %49 = arith.cmpi ne, %48, %c0_i32_23 : i32
    scf.if %49 {
      %c0_24 = arith.constant 0 : index
      %c0_25 = arith.constant 0 : index
      %50 = vector.load %arg9[%c0_24, %c0_25] : memref<1x128xf32, #tpu.memory_space<vmem>>, vector<1x128xf32>
      %cst_26 = arith.constant 9.765625E-4 : f32
      %51 = vector.broadcast %cst_26 : f32 to vector<1x128xf32>
      %52 = arith.mulf %50, %51 : vector<1x128xf32>
      %c0_27 = arith.constant 0 : index
      %c0_28 = arith.constant 0 : index
      %53 = vector.load %arg10[%c0_27, %c0_28] : memref<1x128xf32, #tpu.memory_space<vmem>>, vector<1x128xf32>
      %cst_29 = arith.constant 9.765625E-4 : f32
      %54 = vector.broadcast %cst_29 : f32 to vector<1x128xf32>
      %55 = arith.mulf %53, %54 : vector<1x128xf32>
      %56 = arith.mulf %52, %52 : vector<1x128xf32>
      %57 = arith.subf %55, %56 : vector<1x128xf32>
      %cst_30 = arith.constant 0.000000e+00 : f32
      %58 = vector.broadcast %cst_30 : f32 to vector<1x128xf32>
      %59 = arith.maximumf %57, %58 : vector<1x128xf32>
      %cst_31 = arith.constant 9.99999974E-6 : f32
      %60 = vector.broadcast %cst_31 : f32 to vector<1x128xf32>
      %61 = arith.addf %59, %60 : vector<1x128xf32>
      %62 = math.rsqrt %61 : vector<1x128xf32>
      %63 = vector.broadcast %52 : vector<1x128xf32> to vector<256x128xf32>
      %64 = arith.subf %21, %63 : vector<256x128xf32>
      %65 = vector.broadcast %62 : vector<1x128xf32> to vector<256x128xf32>
      %66 = arith.mulf %64, %65 : vector<256x128xf32>
      %cst_32 = arith.constant 0.000000e+00 : f32
      %67 = vector.broadcast %cst_32 : f32 to vector<256x128xf32>
      %68 = arith.maximumf %66, %67 : vector<256x128xf32>
      %c0_33 = arith.constant 0 : index
      %c0_34 = arith.constant 0 : index
      %c0_35 = arith.constant 0 : index
      %c0_36 = arith.constant 0 : index
      %c0_37 = arith.constant 0 : index
      %69 = vector.load %arg8[%c0_33, %c0_34, %c0_35, %c0_36, %c0_37] : memref<1x2x2x256x128xf32, #tpu.memory_space<vmem>>, vector<1x1x1x256x128xf32>
      %70 = vector.shape_cast %69 : vector<1x1x1x256x128xf32> to vector<256x128xf32>
      %71 = vector.shape_cast %68 : vector<256x128xf32> to vector<1x1x1x256x128xf32>
      tpu.vector_store %arg8[%c0_33, %c0_34, %c0_35, %c0_36, %c0_37], %71 {strides = array<i32>} : memref<1x2x2x256x128xf32, #tpu.memory_space<vmem>>, vector<1x1x1x256x128xf32>,
      %72 = vector.broadcast %52 : vector<1x128xf32> to vector<256x128xf32>
      %73 = arith.subf %24, %72 : vector<256x128xf32>
      %74 = vector.broadcast %62 : vector<1x128xf32> to vector<256x128xf32>
      %75 = arith.mulf %73, %74 : vector<256x128xf32>
      %cst_38 = arith.constant 0.000000e+00 : f32
      %76 = vector.broadcast %cst_38 : f32 to vector<256x128xf32>
      %77 = arith.maximumf %75, %76 : vector<256x128xf32>
      %c0_39 = arith.constant 0 : index
      %c0_40 = arith.constant 0 : index
      %c1 = arith.constant 1 : index
      %c0_41 = arith.constant 0 : index
      %c0_42 = arith.constant 0 : index
      %78 = vector.load %arg8[%c0_39, %c0_40, %c1, %c0_41, %c0_42] : memref<1x2x2x256x128xf32, #tpu.memory_space<vmem>>, vector<1x1x1x256x128xf32>
      %79 = vector.shape_cast %78 : vector<1x1x1x256x128xf32> to vector<256x128xf32>
      %80 = vector.shape_cast %77 : vector<256x128xf32> to vector<1x1x1x256x128xf32>
      tpu.vector_store %arg8[%c0_39, %c0_40, %c1, %c0_41, %c0_42], %80 {strides = array<i32>} : memref<1x2x2x256x128xf32, #tpu.memory_space<vmem>>, vector<1x1x1x256x128xf32>,
      %81 = vector.broadcast %52 : vector<1x128xf32> to vector<240x128xf32>
      %82 = arith.subf %27, %81 : vector<240x128xf32>
      %83 = vector.broadcast %62 : vector<1x128xf32> to vector<240x128xf32>
      %84 = arith.mulf %82, %83 : vector<240x128xf32>
      %cst_43 = arith.constant 0.000000e+00 : f32
      %85 = vector.broadcast %cst_43 : f32 to vector<240x128xf32>
      %86 = arith.maximumf %84, %85 : vector<240x128xf32>
      %c0_44 = arith.constant 0 : index
      %c1_45 = arith.constant 1 : index
      %c0_46 = arith.constant 0 : index
      %c0_47 = arith.constant 0 : index
      %c0_48 = arith.constant 0 : index
      %87 = vector.load %arg8[%c0_44, %c1_45, %c0_46, %c0_47, %c0_48] : memref<1x2x2x256x128xf32, #tpu.memory_space<vmem>>, vector<1x1x1x240x128xf32>
      %88 = vector.shape_cast %87 : vector<1x1x1x240x128xf32> to vector<240x128xf32>
      %89 = vector.shape_cast %86 : vector<240x128xf32> to vector<1x1x1x240x128xf32>
      tpu.vector_store %arg8[%c0_44, %c1_45, %c0_46, %c0_47, %c0_48], %89 {strides = array<i32>} : memref<1x2x2x256x128xf32, #tpu.memory_space<vmem>>, vector<1x1x1x240x128xf32>,
      %90 = vector.broadcast %52 : vector<1x128xf32> to vector<240x128xf32>
      %91 = arith.subf %34, %90 : vector<240x128xf32>
      %92 = vector.broadcast %62 : vector<1x128xf32> to vector<240x128xf32>
      %93 = arith.mulf %91, %92 : vector<240x128xf32>
      %cst_49 = arith.constant 0.000000e+00 : f32
      %94 = vector.broadcast %cst_49 : f32 to vector<240x128xf32>
      %95 = arith.maximumf %93, %94 : vector<240x128xf32>
      %c0_50 = arith.constant 0 : index
      %c1_51 = arith.constant 1 : index
      %c1_52 = arith.constant 1 : index
      %c0_53 = arith.constant 0 : index
      %c0_54 = arith.constant 0 : index
      %96 = vector.load %arg8[%c0_50, %c1_51, %c1_52, %c0_53, %c0_54] : memref<1x2x2x256x128xf32, #tpu.memory_space<vmem>>, vector<1x1x1x240x128xf32>
      %97 = vector.shape_cast %96 : vector<1x1x1x240x128xf32> to vector<240x128xf32>
      %98 = vector.shape_cast %95 : vector<240x128xf32> to vector<1x1x1x240x128xf32>
      tpu.vector_store %arg8[%c0_50, %c1_51, %c1_52, %c0_53, %c0_54], %98 {strides = array<i32>} : memref<1x2x2x256x128xf32, #tpu.memory_space<vmem>>, vector<1x1x1x240x128xf32>,
      %99 = vector.broadcast %52 : vector<1x128xf32> to vector<16x128xf32>
      %100 = arith.subf %37, %99 : vector<16x128xf32>
      %101 = vector.broadcast %62 : vector<1x128xf32> to vector<16x128xf32>
      %102 = arith.mulf %100, %101 : vector<16x128xf32>
      %cst_55 = arith.constant 0.000000e+00 : f32
      %103 = vector.broadcast %cst_55 : f32 to vector<16x128xf32>
      %104 = arith.maximumf %102, %103 : vector<16x128xf32>
      %c0_56 = arith.constant 0 : index
      %c1_57 = arith.constant 1 : index
      %c0_58 = arith.constant 0 : index
      %c240 = arith.constant 240 : index
      %c0_59 = arith.constant 0 : index
      %105 = vector.load %arg8[%c0_56, %c1_57, %c0_58, %c240, %c0_59] : memref<1x2x2x256x128xf32, #tpu.memory_space<vmem>>, vector<1x1x1x16x128xf32>
      %106 = vector.shape_cast %105 : vector<1x1x1x16x128xf32> to vector<16x128xf32>
      %107 = vector.shape_cast %104 : vector<16x128xf32> to vector<1x1x1x16x128xf32>
      tpu.vector_store %arg8[%c0_56, %c1_57, %c0_58, %c240, %c0_59], %107 {strides = array<i32>} : memref<1x2x2x256x128xf32, #tpu.memory_space<vmem>>, vector<1x1x1x16x128xf32>,
      %108 = vector.broadcast %52 : vector<1x128xf32> to vector<16x128xf32>
      %109 = arith.subf %43, %108 : vector<16x128xf32>
      %110 = vector.broadcast %62 : vector<1x128xf32> to vector<16x128xf32>
      %111 = arith.mulf %109, %110 : vector<16x128xf32>
      %cst_60 = arith.constant 0.000000e+00 : f32
      %112 = vector.broadcast %cst_60 : f32 to vector<16x128xf32>
      %113 = arith.maximumf %111, %112 : vector<16x128xf32>
      %c0_61 = arith.constant 0 : index
      %c1_62 = arith.constant 1 : index
      %c1_63 = arith.constant 1 : index
      %c240_64 = arith.constant 240 : index
      %c0_65 = arith.constant 0 : index
      %114 = vector.load %arg8[%c0_61, %c1_62, %c1_63, %c240_64, %c0_65] : memref<1x2x2x256x128xf32, #tpu.memory_space<vmem>>, vector<1x1x1x16x128xf32>
      %115 = vector.shape_cast %114 : vector<1x1x1x16x128xf32> to vector<16x128xf32>
      %116 = vector.shape_cast %113 : vector<16x128xf32> to vector<1x1x1x16x128xf32>
      tpu.vector_store %arg8[%c0_61, %c1_62, %c1_63, %c240_64, %c0_65], %116 {strides = array<i32>} : memref<1x2x2x256x128xf32, #tpu.memory_space<vmem>>, vector<1x1x1x16x128xf32>,
    } else {
    }
    return
  }
  func.func @transform_0(%arg0: i32, %arg1: i32, %arg2: i32) -> (i32, i32, i32) {
    %c0_i32 = arith.constant 0 : i32
    %c0_i32_0 = arith.constant 0 : i32
    return %arg0, %arg2, %c0_i32 : i32, i32, i32
  }
  func.func @transform_1(%arg0: i32, %arg1: i32, %arg2: i32) -> (i32, i32, i32) {
    %c0_i32 = arith.constant 0 : i32
    %c0_i32_0 = arith.constant 0 : i32
    return %arg0, %arg2, %c0_i32 : i32, i32, i32
  }
  func.func @transform_2(%arg0: i32, %arg1: i32, %arg2: i32) -> (i32, i32, i32) {
    %c1_i32 = arith.constant 1 : i32
    %0 = arith.addi %arg2, %c1_i32 : i32
    %c16_i32 = arith.constant 16 : i32
    %1 = arith.muli %0, %c16_i32 : i32
    %c0_i32 = arith.constant 0 : i32
    %c0_i32_0 = arith.constant 0 : i32
    return %arg0, %1, %c0_i32 : i32, i32, i32
  }
  func.func @transform_3(%arg0: i32, %arg1: i32, %arg2: i32) -> (i32, i32, i32) {
    %c1_i32 = arith.constant 1 : i32
    %0 = arith.addi %arg2, %c1_i32 : i32
    %c16_i32 = arith.constant 16 : i32
    %1 = arith.muli %0, %c16_i32 : i32
    %c0_i32 = arith.constant 0 : i32
    %c0_i32_0 = arith.constant 0 : i32
    return %arg0, %1, %c0_i32 : i32, i32, i32
  }
  func.func @transform_4(%arg0: i32, %arg1: i32, %arg2: i32) -> (i32, i32) {
    %c0_i32 = arith.constant 0 : i32
    %c0_i32_0 = arith.constant 0 : i32
    %c0_i32_1 = arith.constant 0 : i32
    return %c0_i32, %c0_i32_0 : i32, i32
  }
  func.func @transform_5(%arg0: i32, %arg1: i32, %arg2: i32) -> (i32, i32, i32, i32, i32) {
    %0 = arith.muli %arg2, %arg1 : i32
    %c0_i32 = arith.constant 0 : i32
    %c0_i32_0 = arith.constant 0 : i32
    %c0_i32_1 = arith.constant 0 : i32
    %c0_i32_2 = arith.constant 0 : i32
    return %arg0, %c0_i32, %c0_i32_0, %0, %c0_i32_1 : i32, i32, i32, i32, i32
  }
}

</mosaic_0001>

<bundles_post_ra>
// kernel: tpu_custom_call.1
= control target key start
LH: loop header
LB: loop body
LE: loop exit
PB: predicated region body
PF: predicated region fallthrough
CT: control target
= control target key end

     0   :  { %s6949_s0 = inlined_call_operand.hbm [shape: f32[2,272,128], index: 0, kind: input, shape index: {}]   ;;  %s6950_s1 = inlined_call_operand.hbm [shape: f32[2,272,128], index: 1, kind: input, shape index: {}]   ;;  %s6951_s2 = inlined_call_operand.hbm [shape: f32[2,272,128], index: 2, kind: input, shape index: {}]   ;;  %s6952_s3 = inlined_call_operand.hbm [shape: f32[2,272,128], index: 3, kind: input, shape index: {}]   ;;  %s6953_s4 = inlined_call_operand.hbm [shape: f32[128,1152], index: 4, kind: input, shape index: {}]   ;;  %s6954_s5 = inlined_call_operand.hbm [shape: f32[2,2,2,256,128], index: 5, kind: output, shape index: {}]  }
   0x1   :  { %7173 = sst [smem:[#allocation155_spill]] %s6949_s0 }
   0x2   :  { %7174 = sst [smem:[#allocation156_spill]] %s6950_s1 }
   0x3   :  { %7175 = sst [smem:[#allocation157_spill]] %s6953_s4 }
   0x4   :  { %10 = vsyncpa [#allocation5], 0 }
   0x5   :  { %12 = vsyncpa [#allocation5 + $0x1], 0 }
   0x6   :  { %13 = vsyncpa [#allocation8], 0 }
   0x7   :  { %15 = vsyncpa [#allocation8 + $0x1], 0 }
   0x8   :  { %16 = vsyncpa [#allocation11], 0 }
   0x9   :  { %18 = vsyncpa [#allocation11 + $0x1], 0 }
   0xa   :  { %19 = vsyncpa [#allocation6], 0 }
   0xb   :  { %21 = vsyncpa [#allocation6 + $0x1], 0  ;;  %s4150_s18 = smov 0   ;;  %s4152_s19 = smov 0  }
   0xc   :  { %s4154_s20 = smov 0   ;;  %s4156_s21 = smov 0  }
   0xd   :  { %s4158_s22 = smov 0   ;;  %s4160_s23 = smov 0  }
   0xe   :  { %s4162_s24 = smov 0   ;;  %s4164_s25 = smov 0  }
   0xf LB: > { %7176 = sst [smem:[#allocation19_spill]] %s4076_s18  ;;  %s4191_s26 = sadd.s32 4294967295, %s4104_s25   ;;  %s4104_s25 = sphi %s4164_s25, %s27_s25   ;;  %s4100_s24 = sphi %s4162_s24, %s7807_s24   ;;  %s4096_s23 = sphi %s4160_s23, %s7806_s23   ;;  %s4092_s22 = sphi %s4158_s22, %s7805_s22   ;;  %s4088_s21 = sphi %s4156_s21, %s7804_s21   ;;  %s4084_s20 = sphi %s4154_s20, %s7803_s20   ;;  %s4080_s19 = sphi %s4152_s19, %s7809_s19   ;;  %s4076_s18 = sphi %s4150_s18, %s7808_s18  }
  0x10   : > { %7177 = sst [smem:[#allocation20_spill]] %s4084_s20  ;;  %s3434_s27 = sadd.s32 4294967294, %s4104_s25  }
  0x11   : > { %7178 = sst [smem:[#allocation21_spill]] %s4096_s23  ;;  %p62_p0 = scmp.ne.s32.totalorder %s4084_s20, %s4080_s19 }
  0x12   : > { %7179 = sst [smem:[#allocation22_spill]] %s4100_s24  ;;  %p63_p1 = scmp.eq.s32.totalorder %s4104_s25, 0 }
  0x13   : > { %p68_p2 = scmp.ne.s32.totalorder %s4080_s19, %s4076_s18  ;;  %p69_p3 = scmp.eq.s32.totalorder %s4191_s26, 0 }
  0x14   : > { %p209_p4 = scmp.eq.s32.totalorder %s4191_s26, 3  ;;  %p4202_p5 = por %p63_p1, %p62_p0 }
  0x15   : > { %p215_p6 = scmp.eq.s32.totalorder %s3434_s27, 3  ;;  %p4208_p7 = por %p69_p3, %p68_p2 }
  0x16   : > { %p4212_p8 = por %p209_p4, %p62_p0  ;;  %p3435_p10 = scmp.ge.s32.totalorder %s4104_s25, 1 }
  0x17   : > { %p4216_p9 = por %p215_p6, %p68_p2  ;;  %p222_p11 = scmp.lt.s32.totalorder %s4104_s25, 5 }
  0x18   : > { %s7182_s6 = scalar_select %p4212_p8, 1, 0 }
  0x19   : > { %s7183_s7 = scalar_select %p4216_p9, 1, 0 }
  0x1a   : > { %p4222_p12 = pnand %p3435_p10, %p222_p11  ;;  %s4106_s9 = smov [#allocation12]  }
  0x1b   : > { %7184 = sst [smem:[#allocation23_spill]] %s7183_s7  ;;  %s234_s10 = sshll.u32 %s4106_s9, 4  ;;  %s235_s10 = int_to_ptr.vmem [resolvable:$true] %s234_s10 }
  0x1c   : > { %p3756_p13 = pneg %p4222_p12  ;;  %s46_s12 = sadd.s32 1, %s4100_s24 }
  0x1d   : > { %s42_s13 = sadd.s32 1, %s4096_s23  ;;  %s3867_s14 = scalar_lea.vmem %s235_s10, 18432 }
  0x1e   : > { %p4230_p0 = pnand %p3756_p13, %p69_p3  ;;  %p3868_p2 = scmp.ne.s32.totalorder %s235_s10, %s3867_s14 }
  0x1f   : > { %p3875_p10 = scmp.lt.s32.totalorder %s235_s10, %s235_s10  ;;  %p3876_p11 = scmp.lt.s32.totalorder %s3867_s14, %s3867_s14 }
  0x20   : > { %p3858_p1 = pneg %p4230_p0 }
  0x21   : > { %p3877_p9 = por %p3876_p11, %p3875_p10 }
  0x22   : > { %p3870_p4 = pnand %p3868_p2, %p3858_p1 }
  0x24   : > { %p3871_p6 = pneg %p3870_p4 }
  0x26   : > { %p3878_p8 = pnand %p3877_p9, %p3871_p6 }
  0x28   : > { %3881 = shalt.err (!%p3878_p8)
}
  0x29   : > { %s4107_s15 = smov 1152   ;;  %s4108_s16 = smov 72  }
  0x2a   : > { %s7187_s4 = sld [smem:[#allocation157_spill]]  ;;  %p44_p13 = scmp.ge.s32.totalorder %s42_s13, 2 }
  0x2b   : > { %p3778_p9 = scmp.lt.s32.totalorder %s4104_s25, 4  ;;  %s4245_s9 = sand.u32 1, %s4084_s20  }
  0x2c   : > { %s4248_s14 = smul.u32 4352, %s4100_s24  ;;  %s7811_s13 = smov (%p44_p13, %s42_s13), 0 }
  0x2d   : > { %7188 = sst [smem:[#allocation24_spill]] %s7811_s13  ;;  %s7813_s12 = smov (!%p44_p13, %s46_s12), %s4100_s24 }
  0x2e   : > { %s3438_s11 = sshll.u32 %s4245_s9, 8  ;;  %p4256_p8 = pnand %p3778_p9, %p4202_p5 }
  0x2f   : > { %s7191_s1 = sld [smem:[#allocation156_spill]]  ;;  %s7192_s13 = sadd.s32 1, %s4084_s20 }
  0x30   : > { %3759 = dma.hbm_to_vmem [thread:$0]  (!%p4230_p0), %s7187_s4, 18432, %s235_s10, [#allocation11], %s4107_s15, %s4107_s15, %s4108_s16  }
  0x31   : > { %p48_p0 = scmp.ge.s32.totalorder %s7813_s12, 2  ;;  %s6959_s10 = sand.u32 1, %s4104_s25  }
  0x32   : > { %s281_s4 = scalar_lea.vmem [#allocation7], %s3438_s11  ;;  %s4278_s7 = scalar_lea.sflag [#allocation8], %s6959_s10 }
  0x33   : > { %s7815_s12 = smov (%p48_p0, %s7813_s12), 0  ;;  %s296_s29 = sshll.u32 %s281_s4, 4  ;;  %s297_s29 = int_to_ptr.vmem [resolvable:$true] %s296_s29 }
  0x34   : > { %7190 = sst [smem:[#allocation25_spill]] %s7815_s12  ;;  %s50_s15 = ssub.s32 %s4100_s24, %s7815_s12 }
  0x35   : > { %p53_p1 = scmp.eq.s32.totalorder %s50_s15, 0  ;;  %s294_s28 = scalar_lea.hbm %s7191_s1, %s4248_s14 }
  0x36   : > { %p3884_p5 = pneg %p4256_p8  ;;  %s3895_s18 = scalar_lea.vmem %s297_s29, 4096 }
  0x37   : > { %s4274_s23 = scalar_select %p53_p1, %s4084_s20, %s7192_s13  }
  0x38   : > { %p3896_p2 = scmp.ne.s32.totalorder %s297_s29, %s3895_s18  ;;  %s4109_s15 = smov [#allocation7]  }
  0x39   : > { %7193 = sst [smem:[#allocation26_spill]] %s4274_s23  ;;  %s3900_s16 = sshll.u32 %s4109_s15, 4  ;;  %s3901_s16 = int_to_ptr.vmem [resolvable:$false] %s3900_s16 }
  0x3a   : > { %p3898_p4 = pnand %p3896_p2, %p3884_p5  ;;  %s3902_s27 = scalar_lea.vmem %s3901_s16, 8192 }
  0x3b   : > { %p3903_p10 = scmp.lt.s32.totalorder %s297_s29, %s3901_s16  ;;  %p3904_p11 = scmp.lt.s32.totalorder %s3902_s27, %s3895_s18 }
  0x3c   : > { %p3899_p6 = pneg %p3898_p4 }
  0x3d   : > { %p3905_p13 = por %p3904_p11, %p3903_p10 }
  0x3f   : > { %p3906_p9 = pnand %p3905_p13, %p3899_p6 }
  0x41   : > { %3909 = shalt.err (!%p3906_p9)
}
  0x42   : > { %s4110_s4 = smov 128   ;;  %s4111_s13 = smov 8  }
  0x43   : > { %3766 = dma.hbm_to_vmem [thread:$0]  (!%p4256_p8), %s294_s28, 4096, %s297_s29, %s4278_s7, %s4110_s4, %s4110_s4, %s4111_s13  }
  0x44   : > { %s7194_s0 = sld [smem:[#allocation155_spill]]  ;;  %s252_s27 = scalar_lea.vmem [#allocation4], %s3438_s11 }
  0x45   : > { %s267_s10 = sshll.u32 %s252_s27, 4  ;;  %s3442_s1 = sshll.u32 %s4245_s9, 4  ;;  %s268_s10 = int_to_ptr.vmem [resolvable:$true] %s267_s10 }
  0x46   : > { %s249_s12 = scalar_lea.sflag [#allocation5], %s4245_s9  ;;  %s3923_s24 = scalar_lea.vmem %s268_s10, 4096 }
  0x47   : > { %p3924_p0 = scmp.ne.s32.totalorder %s268_s10, %s3923_s24  ;;  %s4112_s23 = smov [#allocation4]  }
  0x48   : > { %s3928_s20 = sshll.u32 %s4112_s23, 4  ;;  %s3929_s20 = int_to_ptr.vmem [resolvable:$false] %s3928_s20 }
  0x49   : > { %p3926_p1 = pnand %p3924_p0, %p3884_p5  ;;  %s3930_s28 = scalar_lea.vmem %s3929_s20, 8192 }
  0x4a   : > { %s265_s18 = scalar_lea.hbm %s7194_s0, %s4248_s14  ;;  %p3931_p4 = scmp.lt.s32.totalorder %s268_s10, %s3929_s20 }
  0x4b   : > { %p3927_p2 = pneg %p3926_p1  ;;  %p3932_p6 = scmp.lt.s32.totalorder %s3930_s28, %s3923_s24 }
  0x4d   : > { %p3933_p10 = por %p3932_p6, %p3931_p4 }
  0x4f   : > { %p3934_p11 = pnand %p3933_p10, %p3927_p2 }
  0x51   : > { %3937 = shalt.err (!%p3934_p11)
}
  0x52   : > { %3763 = dma.hbm_to_vmem [thread:$0]  (!%p4256_p8), %s265_s18, 4096, %s268_s10, %s249_s12, %s4110_s4, %s4110_s4, %s4111_s13  }
  0x53   : > { %s3310_s23 = scalar_lea.hbm %s6951_s2, %s4248_s14  ;;  %s310_s15 = scalar_lea.vmem [#allocation9], %s3442_s1 }
  0x54   : > { %s321_s20 = sshll.u32 %s310_s15, 4  ;;  %s3311_s24 = scalar_lea.hbm %s3310_s23, 4096  ;;  %s322_s20 = int_to_ptr.vmem [resolvable:$true] %s321_s20 }
  0x55   : > { %s3951_s16 = scalar_lea.vmem %s322_s20, 256  ;;  %s4113_s27 = smov [#allocation9]  }
  0x56   : > { %p3952_p13 = scmp.ne.s32.totalorder %s322_s20, %s3951_s16  ;;  %s3956_s28 = sshll.u32 %s4113_s27, 4  ;;  %s3957_s28 = int_to_ptr.vmem [resolvable:$false] %s3956_s28 }
  0x57   : > { %s3958_s0 = scalar_lea.vmem %s3957_s28, 512  ;;  %p3959_p1 = scmp.lt.s32.totalorder %s322_s20, %s3957_s28 }
  0x58   : > { %p3954_p9 = pnand %p3952_p13, %p3884_p5  ;;  %p3960_p2 = scmp.lt.s32.totalorder %s3958_s0, %s3951_s16 }
  0x5a   : > { %p3955_p0 = pneg %p3954_p9  ;;  %p3961_p4 = por %p3960_p2, %p3959_p1 }
  0x5c   : > { %p3962_p6 = pnand %p3961_p4, %p3955_p0 }
  0x5e   : > { %3965 = shalt.err (!%p3962_p6)
}
  0x5f   : > { %3769 = dma.hbm_to_vmem [thread:$0]  (!%p4256_p8), %s3311_s24, 256, %s322_s20, %s4278_s7, %s4110_s4, %s4110_s4, %s4111_s13  }
  0x60   : > { %s3319_s18 = scalar_lea.hbm %s6952_s3, %s4248_s14  ;;  %s335_s0 = scalar_lea.vmem [#allocation10], %s3442_s1 }
  0x61   : > { %s3320_s11 = scalar_lea.hbm %s3319_s18, 4096  ;;  %s346_s29 = sshll.u32 %s335_s0, 4  ;;  %s347_s29 = int_to_ptr.vmem [resolvable:$true] %s346_s29 }
  0x62   : > { %s7195_s23 = sand.u32 1, %s4104_s25   ;;  %s3980_s16 = scalar_lea.vmem %s347_s29, 256 }
  0x63   : > { %s332_s15 = scalar_lea.sflag [#allocation11], %s7195_s23  ;;  %p3981_p10 = scmp.ne.s32.totalorder %s347_s29, %s3980_s16 }
  0x64   : > { %s4114_s27 = smov [#allocation10]  }
  0x65   : > { %p3983_p11 = pnand %p3981_p10, %p3884_p5  ;;  %s3985_s28 = sshll.u32 %s4114_s27, 4  ;;  %s3986_s28 = int_to_ptr.vmem [resolvable:$false] %s3985_s28 }
  0x66   : > { %s3987_s7 = scalar_lea.vmem %s3986_s28, 512  ;;  %p3988_p9 = scmp.lt.s32.totalorder %s347_s29, %s3986_s28 }
  0x67   : > { %p3984_p13 = pneg %p3983_p11  ;;  %p3989_p0 = scmp.lt.s32.totalorder %s3987_s7, %s3980_s16 }
  0x69   : > { %p3990_p1 = por %p3989_p0, %p3988_p9 }
  0x6b   : > { %p3991_p2 = pnand %p3990_p1, %p3984_p13 }
  0x6d   : > { %3994 = shalt.err (!%p3991_p2)
}
  0x6e   : > { %3772 = dma.hbm_to_vmem [thread:$0]  (!%p4256_p8), %s3320_s11, 256, %s347_s29, %s332_s15, %s4110_s4, %s4110_s4, %s4111_s13  }
  0x6f   : > { %358 = sbr.rel (%p4222_p12) target bundleno = 1003 (0x3eb), region = 40 }
  0x74   : > { %s4341_s1 = sand.u32 1, %s4080_s19  }
  0x75   : > { %s3447_s9 = sshll.u32 %s4341_s1, 8  ;;  %s361_s14 = scalar_lea.sflag [#allocation5], %s4341_s1 }
  0x76   : > { %s4345_s20 = scalar_lea.vmem [#allocation4], %s3447_s9 }
  0x77   : > { %4055 = dma.done.wait (%p4208_p7), %s361_s14, 4096  }
  0x78   : > { %4057 = vsyncadd (%p4208_p7), %s361_s14, 4294963200  ;;  %s369_s17 = sand.u32 1, %s4191_s26   ;;  %s4352_s4 = scalar_lea.vmem [#allocation7], %s3447_s9 }
  0x79   : > { %s370_s8 = scalar_lea.sflag [#allocation8], %s369_s17 }
  0x7a   : > { %4059 = dma.done.wait (%p4208_p7), %s370_s8, 4352  }
  0x7b   : > { %4061 = vsyncadd (%p4208_p7), %s370_s8, 4294962944  ;;  %s3449_s13 = sshll.u32 %s4341_s1, 4  ;;  %s388_s12 = scalar_lea.sflag [#allocation11], %s369_s17 }
  0x7c   : > { %s4359_s24 = scalar_lea.vmem [#allocation9], %s3449_s13  ;;  %s4361_s10 = scalar_lea.vmem [#allocation10], %s3449_s13 }
  0x7d   : > { %4063 = dma.done.wait (%p4208_p7), %s388_s12, 256  }
  0x7e   : > { %4065 = vsyncadd (%p4208_p7), %s388_s12, 4294967040 }
  0x7f   : > { %4067 = dma.done.wait (%p69_p3), [#allocation11], 18432  }
  0x80   : > { %4069 = vsyncadd (%p69_p3), [#allocation11], 4294948864  ;;  %s3452_s18 = sshll.u32 %s4341_s1, 10  ;;  %p455_p12 = scmp.eq.s32.totalorder %s4088_s21, 0 }
  0x81   : > { %s4373_s11 = scalar_lea.vmem [#allocation13], %s3452_s18  ;;  %v4115_v0 = vmov (%p455_p12), 0.0  }
  0x82   : > { %460 = sbr.rel (!%p455_p12) target bundleno = 135 (0x87), region = 64  ;;  %461 = vst [vmem:[#allocation2] sm:$0x1] (%p455_p12), %v4115_v0  ;;  %462 = vst [vmem:[#allocation3] sm:$0x1] (%p455_p12), %v4115_v0 }
  0x87 PF: > { %v586_v1 = vld [vmem:[#allocation12 + $0x440] sm:$0xff]  ;;  %v588_v2 = vld [vmem:[#allocation12 + $0x450] sm:$0xff]  ;;  %v585_v3 = vld [vmem:[#allocation12 + $0x438] sm:$0xff]  ;;  %p3454_p3 = scmp.ne.s32.totalorder %s4088_s21, 0 }
  0x88   : > { %591 = vmatprep.subr.mxu0 %v586_v1  ;;  %848 = vmatprep.subr.mxu1 %v588_v2  ;;  %v587_v4 = vld [vmem:[#allocation12 + $0x448] sm:$0xff]  ;;  %v580_v5 = vld [vmem:[#allocation12 + $0x3f8] sm:$0xff]  ;;  %v579_v7 = vld [vmem:[#allocation12 + $0x3f0] sm:$0xff]  ;;  %v7002_v2 = vmov 0.0  }
  0x89   : > { %v582_v6 = vld [vmem:[#allocation12 + $0x408] sm:$0xff]  ;;  %592 = vmatpush1.msra.mxu0 %v585_v3  ;;  %849 = vmatpush1.msra.mxu1 %v587_v4  ;;  %v581_v8 = vld [vmem:[#allocation12 + $0x400] sm:$0xff]  ;;  %v574_v9 = vld [vmem:[#allocation12 + $0x3b0] sm:$0xff] }
  0x8a   : > { %593 = vmatprep.subr.mxu0 %v580_v5  ;;  %850 = vmatprep.subr.mxu1 %v582_v6  ;;  %v576_v10 = vld [vmem:[#allocation12 + $0x3c0] sm:$0xff]  ;;  %v573_v11 = vld [vmem:[#allocation12 + $0x3a8] sm:$0xff]  ;;  %v575_v12 = vld [vmem:[#allocation12 + $0x3b8] sm:$0xff] }
  0x8b   : > { %594 = vmatpush1.msra.mxu0 %v579_v7  ;;  %851 = vmatpush1.msra.mxu1 %v581_v8  ;;  %v568_v13 = vld [vmem:[#allocation12 + $0x368] sm:$0xff]  ;;  %v570_v14 = vld [vmem:[#allocation12 + $0x378] sm:$0xff]  ;;  %v567_v15 = vld [vmem:[#allocation12 + $0x360] sm:$0xff] }
  0x8c   : > { %595 = vmatprep.subr.mxu0 %v574_v9  ;;  %852 = vmatprep.subr.mxu1 %v576_v10  ;;  %v569_v16 = vld [vmem:[#allocation12 + $0x370] sm:$0xff]  ;;  %v562_v17 = vld [vmem:[#allocation12 + $0x320] sm:$0xff]  ;;  %v561_v19 = vld [vmem:[#allocation12 + $0x318] sm:$0xff] }
  0x8d   : > { %596 = vmatpush1.msra.mxu0 %v573_v11  ;;  %853 = vmatpush1.msra.mxu1 %v575_v12  ;;  %v564_v18 = vld [vmem:[#allocation12 + $0x330] sm:$0xff]  ;;  %v563_v20 = vld [vmem:[#allocation12 + $0x328] sm:$0xff]  ;;  %v556_v21 = vld [vmem:[#allocation12 + $0x2d8] sm:$0xff] }
  0x8e   : > { %597 = vmatprep.subr.mxu0 %v568_v13  ;;  %854 = vmatprep.subr.mxu1 %v570_v14  ;;  %v558_v22 = vld [vmem:[#allocation12 + $0x2e8] sm:$0xff]  ;;  %v555_v23 = vld [vmem:[#allocation12 + $0x2d0] sm:$0xff]  ;;  %v557_v24 = vld [vmem:[#allocation12 + $0x2e0] sm:$0xff] }
  0x8f   : > { %598 = vmatpush1.msra.mxu0 %v567_v15  ;;  %855 = vmatpush1.msra.mxu1 %v569_v16  ;;  %v550_v25 = vld [vmem:[#allocation12 + $0x290] sm:$0xff]  ;;  %v552_v26 = vld [vmem:[#allocation12 + $0x2a0] sm:$0xff]  ;;  %v549_v27 = vld [vmem:[#allocation12 + $0x288] sm:$0xff] }
  0x90   : > { %599 = vmatprep.subr.mxu0 %v562_v17  ;;  %856 = vmatprep.subr.mxu1 %v564_v18  ;;  %v551_v28 = vld [vmem:[#allocation12 + $0x298] sm:$0xff]  ;;  %v544_v29 = vld [vmem:[#allocation12 + $0x248] sm:$0xff]  ;;  %v543_v31 = vld [vmem:[#allocation12 + $0x240] sm:$0xff] }
  0x91   : > { %600 = vmatpush1.msra.mxu0 %v561_v19  ;;  %857 = vmatpush1.msra.mxu1 %v563_v20  ;;  %v546_v30 = vld [vmem:[#allocation12 + $0x258] sm:$0xff]  ;;  %v545_v32 = vld [vmem:[#allocation12 + $0x250] sm:$0xff]  ;;  %v538_v33 = vld [vmem:[#allocation12 + $0x200] sm:$0xff] }
  0x92   : > { %601 = vmatprep.subr.mxu0 %v556_v21  ;;  %858 = vmatprep.subr.mxu1 %v558_v22  ;;  %v540_v34 = vld [vmem:[#allocation12 + $0x210] sm:$0xff]  ;;  %v537_v35 = vld [vmem:[#allocation12 + $0x1f8] sm:$0xff]  ;;  %v539_v36 = vld [vmem:[#allocation12 + $0x208] sm:$0xff] }
  0x93   : > { %602 = vmatpush1.msra.mxu0 %v555_v23  ;;  %859 = vmatpush1.msra.mxu1 %v557_v24  ;;  %v532_v37 = vld [vmem:[#allocation12 + $0x1b8] sm:$0xff]  ;;  %v534_v38 = vld [vmem:[#allocation12 + $0x1c8] sm:$0xff]  ;;  %v531_v39 = vld [vmem:[#allocation12 + $0x1b0] sm:$0xff] }
  0x94   : > { %603 = vmatprep.subr.mxu0 %v550_v25  ;;  %860 = vmatprep.subr.mxu1 %v552_v26  ;;  %v533_v40 = vld [vmem:[#allocation12 + $0x1c0] sm:$0xff]  ;;  %v526_v41 = vld [vmem:[#allocation12 + $0x170] sm:$0xff]  ;;  %v525_v43 = vld [vmem:[#allocation12 + $0x168] sm:$0xff] }
  0x95   : > { %604 = vmatpush1.msra.mxu0 %v549_v27  ;;  %861 = vmatpush1.msra.mxu1 %v551_v28  ;;  %v528_v42 = vld [vmem:[#allocation12 + $0x180] sm:$0xff]  ;;  %v527_v44 = vld [vmem:[#allocation12 + $0x178] sm:$0xff]  ;;  %v520_v45 = vld [vmem:[#allocation12 + $0x128] sm:$0xff] }
  0x96   : > { %605 = vmatprep.subr.mxu0 %v544_v29  ;;  %862 = vmatprep.subr.mxu1 %v546_v30  ;;  %v522_v46 = vld [vmem:[#allocation12 + $0x138] sm:$0xff]  ;;  %v519_v47 = vld [vmem:[#allocation12 + $0x120] sm:$0xff]  ;;  %v521_v48 = vld [vmem:[#allocation12 + $0x130] sm:$0xff] }
  0x97   : > { %606 = vmatpush1.msra.mxu0 %v543_v31  ;;  %863 = vmatpush1.msra.mxu1 %v545_v32  ;;  %v514_v49 = vld [vmem:[#allocation12 + $0xe0] sm:$0xff]  ;;  %v516_v50 = vld [vmem:[#allocation12 + $0xf0] sm:$0xff]  ;;  %v513_v51 = vld [vmem:[#allocation12 + $0xd8] sm:$0xff] }
  0x98   : > { %607 = vmatprep.subr.mxu0 %v538_v33  ;;  %864 = vmatprep.subr.mxu1 %v540_v34  ;;  %v515_v52 = vld [vmem:[#allocation12 + $0xe8] sm:$0xff]  ;;  %v508_v53 = vld [vmem:[#allocation12 + $0x98] sm:$0xff]  ;;  %v507_v55 = vld [vmem:[#allocation12 + $0x90] sm:$0xff] }
  0x99   : > { %608 = vmatpush1.msra.mxu0 %v537_v35  ;;  %865 = vmatpush1.msra.mxu1 %v539_v36  ;;  %v510_v54 = vld [vmem:[#allocation12 + $0xa8] sm:$0xff]  ;;  %v509_v56 = vld [vmem:[#allocation12 + $0xa0] sm:$0xff]  ;;  %v502_v57 = vld [vmem:[#allocation12 + $0x50] sm:$0xff] }
  0x9a   : > { %609 = vmatprep.subr.mxu0 %v532_v37  ;;  %866 = vmatprep.subr.mxu1 %v534_v38  ;;  %v504_v58 = vld [vmem:[#allocation12 + $0x60] sm:$0xff]  ;;  %v501_v59 = vld [vmem:[#allocation12 + $0x48] sm:$0xff]  ;;  %v503_v60 = vld [vmem:[#allocation12 + $0x58] sm:$0xff] }
  0x9b   : > { %610 = vmatpush1.msra.mxu0 %v531_v39  ;;  %867 = vmatpush1.msra.mxu1 %v533_v40  ;;  %v496_v61 = vld [vmem:[#allocation12 + $0x8] sm:$0xff]  ;;  %v498_v62 = vld [vmem:[#allocation12 + $0x18] sm:$0xff]  ;;  %v495_v63 = vld [vmem:[#allocation12] sm:$0xff] }
  0x9c   : > { %611 = vmatprep.subr.mxu0 %v526_v41  ;;  %868 = vmatprep.subr.mxu1 %v528_v42  ;;  %v497_v0 = vld [vmem:[#allocation12 + $0x10] sm:$0xff]  ;;  %v4376_v1 = vld [vmem:[%s4345_s20] sm:$0xff]  ;;  %v4382_v4 = vld [vmem:[#allocation12 + $0x458] sm:$0xff] }
  0x9d   : > { %612 = vmatpush1.msra.mxu0 %v525_v43  ;;  %869 = vmatpush1.msra.mxu1 %v527_v44  ;;  %v4379_v3 = vld [vmem:[#allocation12 + $0x460] sm:$0xff]  ;;  %v4386_v5 = vld [vmem:[#allocation12 + $0x418] sm:$0xff]  ;;  %v1436_v6 = vld [vmem:[#allocation12 + $0x470] sm:$0xff] }
  0x9e   : > { %613 = vmatprep.subr.mxu0 %v520_v45  ;;  %870 = vmatprep.subr.mxu1 %v522_v46  ;;  %v4391_v7 = vld [vmem:[%s4345_s20 + $0x8] sm:$0xff]  ;;  %v4396_v8 = vld [vmem:[#allocation12 + $0x410] sm:$0xff]  ;;  %v1432_v14 = vld [vmem:[#allocation12 + $0x420] sm:$0xff] }
  0x9f   : > { %614 = vmatpush1.msra.mxu0 %v519_v47  ;;  %871 = vmatpush1.msra.mxu1 %v521_v48  ;;  %v1435_v9 = vld [vmem:[#allocation12 + $0x468] sm:$0xff]  ;;  %v4400_v10 = vld [vmem:[#allocation12 + $0x3d0] sm:$0xff]  ;;  %v1430_v16 = vld [vmem:[#allocation12 + $0x3e0] sm:$0xff] }
  0xa0   : > { %615 = vmatprep.subr.mxu0 %v514_v49  ;;  %872 = vmatprep.subr.mxu1 %v516_v50  ;;  %v1433_v11 = vld [vmem:[#allocation12 + $0x428] sm:$0xff]  ;;  %v4405_v12 = vld [vmem:[%s4345_s20 + $0x10] sm:$0xff]  ;;  %v4418_v17 = vld [vmem:[%s4345_s20 + $0x18] sm:$0xff] }
  0xa1   : > { %616 = vmatpush1.msra.mxu0 %v513_v51  ;;  %873 = vmatpush1.msra.mxu1 %v515_v52  ;;  %v4409_v13 = vld [vmem:[#allocation12 + $0x3c8] sm:$0xff]  ;;  %v4422_v18 = vld [vmem:[#allocation12 + $0x380] sm:$0xff]  ;;  %v1429_v19 = vld [vmem:[#allocation12 + $0x3d8] sm:$0xff] }
  0xa2   : > { %617 = vmatprep.subr.mxu0 %v508_v53  ;;  %874 = vmatprep.subr.mxu1 %v510_v54  ;;  %v4413_v15 = vld [vmem:[#allocation12 + $0x388] sm:$0xff]  ;;  %v4426_v20 = vld [vmem:[#allocation12 + $0x340] sm:$0xff]  ;;  %v1427_v21 = vld [vmem:[#allocation12 + $0x398] sm:$0xff] }
  0xa3   : > { %618 = vmatpush1.msra.mxu0 %v507_v55  ;;  %875 = vmatpush1.msra.mxu1 %v509_v56  ;;  %v4431_v22 = vld [vmem:[%s4345_s20 + $0x20] sm:$0xff]  ;;  %v4435_v23 = vld [vmem:[#allocation12 + $0x338] sm:$0xff]  ;;  %v1426_v24 = vld [vmem:[#allocation12 + $0x390] sm:$0xff] }
  0xa4   : > { %619 = vmatprep.subr.mxu0 %v502_v57  ;;  %876 = vmatprep.subr.mxu1 %v504_v58  ;;  %v4439_v25 = vld [vmem:[#allocation12 + $0x2f8] sm:$0xff]  ;;  %v1424_v26 = vld [vmem:[#allocation12 + $0x350] sm:$0xff]  ;;  %v4444_v27 = vld [vmem:[%s4345_s20 + $0x28] sm:$0xff] }
  0xa5   : > { %620 = vmatpush1.msra.mxu0 %v501_v59  ;;  %877 = vmatpush1.msra.mxu1 %v503_v60  ;;  %v4448_v28 = vld [vmem:[#allocation12 + $0x2f0] sm:$0xff]  ;;  %v1423_v29 = vld [vmem:[#allocation12 + $0x348] sm:$0xff]  ;;  %v1420_v34 = vld [vmem:[#allocation12 + $0x300] sm:$0xff] }
  0xa6   : > { %621 = vmatprep.subr.mxu0 %v496_v61  ;;  %878 = vmatprep.subr.mxu1 %v498_v62  ;;  %v4452_v30 = vld [vmem:[#allocation12 + $0x2b0] sm:$0xff]  ;;  %v1421_v31 = vld [vmem:[#allocation12 + $0x308] sm:$0xff]  ;;  %v1418_v36 = vld [vmem:[#allocation12 + $0x2c0] sm:$0xff] }
  0xa7   : > { %622 = vmatpush1.msra.mxu0 %v495_v63  ;;  %655 = vmatprep.mubr.f32.mxu0 %v7002_v2  ;;  %v4457_v32 = vld [vmem:[%s4345_s20 + $0x30] sm:$0xff]  ;;  %v4461_v33 = vld [vmem:[#allocation12 + $0x2a8] sm:$0xff]  ;;  %v4470_v37 = vld [vmem:[%s4345_s20 + $0x38] sm:$0xff] }
  0xa8   : > { %879 = vmatpush1.msra.mxu1 %v497_v0  ;;  %912 = vmatprep.mubr.f32.mxu1 %v7002_v2  ;;  %v4465_v35 = vld [vmem:[#allocation12 + $0x268] sm:$0xff]  ;;  %v4474_v38 = vld [vmem:[#allocation12 + $0x260] sm:$0xff]  ;;  %v1417_v39 = vld [vmem:[#allocation12 + $0x2b8] sm:$0xff] }
  0xa9   : > { %656 = vmatmul.mubr.f32.vlgmr.msra.gmra.mxu0 %v4376_v1  ;;  %913 = vmatmul.mubr.f32.vlgmr.msra.gmra.mxu1 %v4376_v1  ;;  %v4478_v40 = vld [vmem:[#allocation12 + $0x220] sm:$0xff]  ;;  %v1415_v41 = vld [vmem:[#allocation12 + $0x278] sm:$0xff]  ;;  %v1414_v44 = vld [vmem:[#allocation12 + $0x270] sm:$0xff] }
  0xaa   : > { %1105 = vmatprep.subr.mxu0 %v4379_v3  ;;  %661 = vmatprep.mubr.f32.mxu0 %v7002_v2  ;;  %v4483_v42 = vld [vmem:[%s4345_s20 + $0x40] sm:$0xff]  ;;  %v4487_v43 = vld [vmem:[#allocation12 + $0x218] sm:$0xff]  ;;  %v1412_v46 = vld [vmem:[#allocation12 + $0x230] sm:$0xff] }
  0xab   : > { %1106 = vmatpush1.msra.mxu0 %v4382_v4  ;;  %918 = vmatprep.mubr.f32.mxu1 %v7002_v2  ;;  %v4491_v45 = vld [vmem:[#allocation12 + $0x1d8] sm:$0xff]  ;;  %v4496_v47 = vld [vmem:[%s4345_s20 + $0x48] sm:$0xff]  ;;  %v4500_v48 = vld [vmem:[#allocation12 + $0x1d0] sm:$0xff] }
  0xac   : > { %1107 = vmatprep.subr.mxu0 %v4386_v5  ;;  %1438 = vmatprep.subr.mxu1 %v1436_v6  ;;  %v1411_v49 = vld [vmem:[#allocation12 + $0x228] sm:$0xff]  ;;  %v4504_v50 = vld [vmem:[#allocation12 + $0x190] sm:$0xff]  ;;  %v1408_v54 = vld [vmem:[#allocation12 + $0x1e0] sm:$0xff] }
  0xad   : > { %662 = vmatmul.mubr.f32.gmra.mxu0 %v4391_v7  ;;  %919 = vmatmul.mubr.f32.gmra.mxu1 %v4391_v7  ;;  %v1409_v51 = vld [vmem:[#allocation12 + $0x1e8] sm:$0xff]  ;;  %v4509_v52 = vld [vmem:[%s4345_s20 + $0x50] sm:$0xff]  ;;  %v1406_v56 = vld [vmem:[#allocation12 + $0x1a0] sm:$0xff] }
  0xae   : > { %667 = vmatprep.mubr.f32.mxu0 %v7002_v2  ;;  %924 = vmatprep.mubr.f32.mxu1 %v7002_v2  ;;  %v4513_v53 = vld [vmem:[#allocation12 + $0x188] sm:$0xff]  ;;  %v4522_v57 = vld [vmem:[%s4345_s20 + $0x58] sm:$0xff]  ;;  %v4526_v58 = vld [vmem:[#allocation12 + $0x140] sm:$0xff] }
  0xaf   : > { %1108 = vmatpush1.msra.mxu0 %v4396_v8  ;;  %1439 = vmatpush1.msra.mxu1 %v1435_v9  ;;  %v4517_v55 = vld [vmem:[#allocation12 + $0x148] sm:$0xff]  ;;  %v1405_v59 = vld [vmem:[#allocation12 + $0x198] sm:$0xff]  ;;  %v4530_v60 = vld [vmem:[#allocation12 + $0x100] sm:$0xff] }
  0xb0   : > { %1109 = vmatprep.subr.mxu0 %v4400_v10  ;;  %1440 = vmatprep.subr.mxu1 %v1433_v11  ;;  %v1403_v61 = vld [vmem:[#allocation12 + $0x158] sm:$0xff]  ;;  %v4535_v62 = vld [vmem:[%s4345_s20 + $0x60] sm:$0xff]  ;;  %v1402_v0 = vld [vmem:[#allocation12 + $0x150] sm:$0xff] }
  0xb1   : > { %668 = vmatmul.mubr.f32.gmra.mxu0 %v4405_v12  ;;  %925 = vmatmul.mubr.f32.gmra.mxu1 %v4405_v12  ;;  %v4539_v63 = vld [vmem:[#allocation12 + $0xf8] sm:$0xff]  ;;  %v1400_v9 = vld [vmem:[#allocation12 + $0x110] sm:$0xff]  ;;  %v4548_v11 = vld [vmem:[%s4345_s20 + $0x68] sm:$0xff] }
  0xb2   : > { %673 = vmatprep.mubr.f32.mxu0 %v7002_v2  ;;  %930 = vmatprep.mubr.f32.mxu1 %v7002_v2  ;;  %v4543_v6 = vld [vmem:[#allocation12 + $0xb8] sm:$0xff] }
  0xb3   : > { %1110 = vmatpush1.msra.mxu0 %v4409_v13  ;;  %1441 = vmatpush1.msra.mxu1 %v1432_v14  ;;  %v4552_v14 = vld [vmem:[#allocation12 + $0xb0] sm:$0xff] }
  0xb4   : > { %1111 = vmatprep.subr.mxu0 %v4413_v15  ;;  %1442 = vmatprep.subr.mxu1 %v1430_v16  ;;  %v1399_v16 = vld [vmem:[#allocation12 + $0x108] sm:$0xff] }
  0xb5   : > { %674 = vmatmul.mubr.f32.gmra.mxu0 %v4418_v17  ;;  %931 = vmatmul.mubr.f32.gmra.mxu1 %v4418_v17 }
  0xb6   : > { %679 = vmatprep.mubr.f32.mxu0 %v7002_v2  ;;  %936 = vmatprep.mubr.f32.mxu1 %v7002_v2 }
  0xb7   : > { %1112 = vmatpush1.msra.mxu0 %v4422_v18  ;;  %1443 = vmatpush1.msra.mxu1 %v1429_v19  ;;  %v4556_v19 = vld [vmem:[#allocation12 + $0x70] sm:$0xff] }
  0xb8   : > { %1113 = vmatprep.subr.mxu0 %v4426_v20  ;;  %1444 = vmatprep.subr.mxu1 %v1427_v21  ;;  %v1397_v21 = vld [vmem:[#allocation12 + $0xc8] sm:$0xff] }
  0xb9   : > { %680 = vmatmul.mubr.f32.gmra.mxu0 %v4431_v22  ;;  %937 = vmatmul.mubr.f32.gmra.mxu1 %v4431_v22 }
  0xba   : > { %685 = vmatprep.mubr.f32.mxu0 %v7002_v2  ;;  %942 = vmatprep.mubr.f32.mxu1 %v7002_v2 }
  0xbb   : > { %1114 = vmatpush1.msra.mxu0 %v4435_v23  ;;  %1445 = vmatpush1.msra.mxu1 %v1426_v24  ;;  %v4561_v24 = vld [vmem:[%s4345_s20 + $0x70] sm:$0xff] }
  0xbc   : > { %1115 = vmatprep.subr.mxu0 %v4439_v25  ;;  %1446 = vmatprep.subr.mxu1 %v1424_v26  ;;  %v4565_v26 = vld [vmem:[#allocation12 + $0x68] sm:$0xff] }
  0xbd   : > { %686 = vmatmul.mubr.f32.gmra.mxu0 %v4444_v27  ;;  %943 = vmatmul.mubr.f32.gmra.mxu1 %v4444_v27 }
  0xbe   : > { %691 = vmatprep.mubr.f32.mxu0 %v7002_v2  ;;  %948 = vmatprep.mubr.f32.mxu1 %v7002_v2 }
  0xbf   : > { %1116 = vmatpush1.msra.mxu0 %v4448_v28  ;;  %1447 = vmatpush1.msra.mxu1 %v1423_v29  ;;  %v1396_v29 = vld [vmem:[#allocation12 + $0xc0] sm:$0xff] }
  0xc0   : > { %1117 = vmatprep.subr.mxu0 %v4452_v30  ;;  %1448 = vmatprep.subr.mxu1 %v1421_v31  ;;  %v4569_v31 = vld [vmem:[#allocation12 + $0x28] sm:$0xff] }
  0xc1   : > { %692 = vmatmul.mubr.f32.gmra.mxu0 %v4457_v32  ;;  %949 = vmatmul.mubr.f32.gmra.mxu1 %v4457_v32 }
  0xc2   : > { %697 = vmatprep.mubr.f32.mxu0 %v7002_v2  ;;  %954 = vmatprep.mubr.f32.mxu1 %v7002_v2 }
  0xc3   : > { %1118 = vmatpush1.msra.mxu0 %v4461_v33  ;;  %1449 = vmatpush1.msra.mxu1 %v1420_v34  ;;  %v1394_v34 = vld [vmem:[#allocation12 + $0x80] sm:$0xff] }
  0xc4   : > { %1119 = vmatprep.subr.mxu0 %v4465_v35  ;;  %1450 = vmatprep.subr.mxu1 %v1418_v36  ;;  %v4574_v36 = vld [vmem:[%s4345_s20 + $0x78] sm:$0xff] }
  0xc5   : > { %698 = vmatmul.mubr.f32.gmra.mxu0 %v4470_v37  ;;  %955 = vmatmul.mubr.f32.gmra.mxu1 %v4470_v37 }
  0xc6   : > { %703 = vmatprep.mubr.f32.mxu0 %v7002_v2  ;;  %960 = vmatprep.mubr.f32.mxu1 %v7002_v2 }
  0xc7   : > { %1120 = vmatpush1.msra.mxu0 %v4474_v38  ;;  %1451 = vmatpush1.msra.mxu1 %v1417_v39  ;;  %v4578_v39 = vld [vmem:[#allocation12 + $0x20] sm:$0xff] }
  0xc8   : > { %1121 = vmatprep.subr.mxu0 %v4478_v40  ;;  %1452 = vmatprep.subr.mxu1 %v1415_v41  ;;  %v1393_v41 = vld [vmem:[#allocation12 + $0x78] sm:$0xff] }
  0xc9   : > { %704 = vmatmul.mubr.f32.gmra.mxu0 %v4483_v42  ;;  %961 = vmatmul.mubr.f32.gmra.mxu1 %v4483_v42 }
  0xca   : > { %709 = vmatprep.mubr.f32.mxu0 %v7002_v2  ;;  %966 = vmatprep.mubr.f32.mxu1 %v7002_v2 }
  0xcb   : > { %1122 = vmatpush1.msra.mxu0 %v4487_v43  ;;  %1453 = vmatpush1.msra.mxu1 %v1414_v44  ;;  %v1391_v44 = vld [vmem:[#allocation12 + $0x38] sm:$0xff] }
  0xcc   : > { %1123 = vmatprep.subr.mxu0 %v4491_v45  ;;  %1454 = vmatprep.subr.mxu1 %v1412_v46  ;;  %v4582_v46 = vld [vmem:[#allocation12 + $0x478] sm:$0xff] }
  0xcd   : > { %710 = vmatmul.mubr.f32.gmra.mxu0 %v4496_v47  ;;  %967 = vmatmul.mubr.f32.gmra.mxu1 %v4496_v47 }
  0xce   : > { %715 = vmatprep.mubr.f32.mxu0 %v7002_v2  ;;  %972 = vmatprep.mubr.f32.mxu1 %v7002_v2 }
  0xcf   : > { %1124 = vmatpush1.msra.mxu0 %v4500_v48  ;;  %1455 = vmatpush1.msra.mxu1 %v1411_v49  ;;  %v4587_v49 = vld [vmem:[%s4345_s20 + $0x80] sm:$0xff] }
  0xd0   : > { %1125 = vmatprep.subr.mxu0 %v4504_v50  ;;  %1456 = vmatprep.subr.mxu1 %v1409_v51  ;;  %v1390_v51 = vld [vmem:[#allocation12 + $0x30] sm:$0xff] }
  0xd1   : > { %716 = vmatmul.mubr.f32.gmra.mxu0 %v4509_v52  ;;  %973 = vmatmul.mubr.f32.gmra.mxu1 %v4509_v52 }
  0xd2   : > { %721 = vmatprep.mubr.f32.mxu0 %v7002_v2  ;;  %978 = vmatprep.mubr.f32.mxu1 %v7002_v2 }
  0xd3   : > { %1126 = vmatpush1.msra.mxu0 %v4513_v53  ;;  %1457 = vmatpush1.msra.mxu1 %v1408_v54  ;;  %v4596_v54 = vld [vmem:[%s4345_s20 + $0x88] sm:$0xff] }
  0xd4   : > { %1127 = vmatprep.subr.mxu0 %v4517_v55  ;;  %1458 = vmatprep.subr.mxu1 %v1406_v56  ;;  %v4604_v56 = vld [vmem:[%s4345_s20 + $0x90] sm:$0xff] }
  0xd5   : > { %722 = vmatmul.mubr.f32.gmra.mxu0 %v4522_v57  ;;  %979 = vmatmul.mubr.f32.gmra.mxu1 %v4522_v57 }
  0xd6   : > { %727 = vmatprep.mubr.f32.mxu0 %v7002_v2  ;;  %984 = vmatprep.mubr.f32.mxu1 %v7002_v2 }
  0xd7   : > { %1128 = vmatpush1.msra.mxu0 %v4526_v58  ;;  %1459 = vmatpush1.msra.mxu1 %v1405_v59  ;;  %v4618_v59 = vld [vmem:[%s4345_s20 + $0xa0] sm:$0xff] }
  0xd8   : > { %1129 = vmatprep.subr.mxu0 %v4530_v60  ;;  %1460 = vmatprep.subr.mxu1 %v1403_v61  ;;  %v4625_v61 = vld [vmem:[%s4345_s20 + $0xa8] sm:$0xff] }
  0xd9   : > { %728 = vmatmul.mubr.f32.gmra.mxu0 %v4535_v62  ;;  %985 = vmatmul.mubr.f32.gmra.mxu1 %v4535_v62 }
  0xda   : > { %733 = vmatprep.mubr.f32.mxu0 %v7002_v2  ;;  %990 = vmatprep.mubr.f32.mxu1 %v7002_v2 }
  0xdb   : > { %1130 = vmatpush1.msra.mxu0 %v4539_v63  ;;  %1461 = vmatpush1.msra.mxu1 %v1402_v0  ;;  %v4632_v0 = vld [vmem:[%s4345_s20 + $0xb0] sm:$0xff] }
  0xdc   : > { %1131 = vmatprep.subr.mxu0 %v4543_v6  ;;  %1462 = vmatprep.subr.mxu1 %v1400_v9  ;;  %v4639_v9 = vld [vmem:[%s4345_s20 + $0xb8] sm:$0xff] }
  0xdd   : > { %734 = vmatmul.mubr.f32.gmra.mxu0 %v4548_v11  ;;  %991 = vmatmul.mubr.f32.gmra.mxu1 %v4548_v11 }
  0xde   : > { %739 = vmatprep.mubr.f32.mxu0 %v7002_v2  ;;  %996 = vmatprep.mubr.f32.mxu1 %v7002_v2 }
  0xdf   : > { %1132 = vmatpush1.msra.mxu0 %v4552_v14  ;;  %1463 = vmatpush1.msra.mxu1 %v1399_v16  ;;  %v4646_v16 = vld [vmem:[%s4345_s20 + $0xc0] sm:$0xff] }
  0xe0   : > { %1133 = vmatprep.subr.mxu0 %v4556_v19  ;;  %1464 = vmatprep.subr.mxu1 %v1397_v21  ;;  %v4653_v21 = vld [vmem:[%s4345_s20 + $0xc8] sm:$0xff] }
  0xe1   : > { %740 = vmatmul.mubr.f32.gmra.mxu0 %v4561_v24  ;;  %997 = vmatmul.mubr.f32.gmra.mxu1 %v4561_v24 }
  0xe2   : > { %745 = vmatprep.mubr.f32.mxu0 %v7002_v2  ;;  %1002 = vmatprep.mubr.f32.mxu1 %v7002_v2 }
  0xe3   : > { %1134 = vmatpush1.msra.mxu0 %v4565_v26  ;;  %1465 = vmatpush1.msra.mxu1 %v1396_v29  ;;  %v4660_v29 = vld [vmem:[%s4345_s20 + $0xd0] sm:$0xff] }
  0xe4   : > { %1135 = vmatprep.subr.mxu0 %v4569_v31  ;;  %1466 = vmatprep.subr.mxu1 %v1394_v34  ;;  %v4667_v34 = vld [vmem:[%s4345_s20 + $0xd8] sm:$0xff] }
  0xe5   : > { %746 = vmatmul.mubr.f32.gmra.mxu0 %v4574_v36  ;;  %1003 = vmatmul.mubr.f32.gmra.mxu1 %v4574_v36  ;;  %7196 = vst [vmem:[#allocation27_spill] sm:$0xff] %v4667_v34 }
  0xe6   : > { %751 = vmatprep.mubr.f32.mxu0 %v7002_v2  ;;  %1008 = vmatprep.mubr.f32.mxu1 %v7002_v2 }
  0xe7   : > { %1136 = vmatpush1.msra.mxu0 %v4578_v39  ;;  %1467 = vmatpush1.msra.mxu1 %v1393_v41  ;;  %v4674_v41 = vld [vmem:[%s4345_s20 + $0xe0] sm:$0xff] }
  0xe8   : > { %1468 = vmatprep.subr.mxu1 %v1391_v44  ;;  %3625 = vmatprep.subr.mxu0 %v4582_v46  ;;  %7197 = vst [vmem:[#allocation28_spill] sm:$0xff] %v4674_v41  ;;  %v4681_v44 = vld [vmem:[%s4345_s20 + $0xe8] sm:$0xff] }
  0xe9   : > { %752 = vmatmul.mubr.f32.gmra.mxu0 %v4587_v49  ;;  %1009 = vmatmul.mubr.f32.gmra.mxu1 %v4587_v49  ;;  %7198 = vst [vmem:[#allocation29_spill] sm:$0xff] %v4681_v44 }
  0xea   : > { %757 = vmatprep.mubr.f32.mxu0 %v7002_v2  ;;  %1014 = vmatprep.mubr.f32.mxu1 %v7002_v2 }
  0xeb   : > { %1469 = vmatpush1.msra.mxu1 %v1390_v51  ;;  %v4688_v51 = vld [vmem:[%s4345_s20 + $0xf0] sm:$0xff] }
  0xec   : > { %1920 = vmatprep.subr.mxu1 %v4379_v3  ;;  %v4611_v3 = vld [vmem:[%s4345_s20 + $0x98] sm:$0xff]  ;;  %7199 = vst [vmem:[#allocation30_spill] sm:$0xff] %v4688_v51 }
  0xed   : > { %758 = vmatmul.mubr.f32.gmra.mxu0 %v4596_v54  ;;  %1015 = vmatmul.mubr.f32.gmra.mxu1 %v4596_v54 }
  0xee   : > { %763 = vmatprep.mubr.f32.mxu0 %v7002_v2  ;;  %1020 = vmatprep.mubr.f32.mxu1 %v7002_v2 }
  0xf1   : > { %764 = vmatmul.mubr.f32.gmra.mxu0 %v4604_v56  ;;  %1021 = vmatmul.mubr.f32.gmra.mxu1 %v4604_v56 }
  0xf2   : > { %769 = vmatprep.mubr.f32.mxu0 %v7002_v2  ;;  %1026 = vmatprep.mubr.f32.mxu1 %v7002_v2 }
  0xf5   : > { %770 = vmatmul.mubr.f32.gmra.mxu0 %v4611_v3  ;;  %1027 = vmatmul.mubr.f32.gmra.mxu1 %v4611_v3 }
  0xf6   : > { %775 = vmatprep.mubr.f32.mxu0 %v7002_v2  ;;  %1032 = vmatprep.mubr.f32.mxu1 %v7002_v2 }
  0xf9   : > { %776 = vmatmul.mubr.f32.gmra.mxu0 %v4618_v59  ;;  %1033 = vmatmul.mubr.f32.gmra.mxu1 %v4618_v59 }
  0xfa   : > { %781 = vmatprep.mubr.f32.mxu0 %v7002_v2  ;;  %1038 = vmatprep.mubr.f32.mxu1 %v7002_v2 }
  0xfd   : > { %782 = vmatmul.mubr.f32.gmra.mxu0 %v4625_v61  ;;  %1039 = vmatmul.mubr.f32.gmra.mxu1 %v4625_v61 }
  0xfe   : > { %787 = vmatprep.mubr.f32.mxu0 %v7002_v2  ;;  %1044 = vmatprep.mubr.f32.mxu1 %v7002_v2 }
 0x101   : > { %788 = vmatmul.mubr.f32.gmra.mxu0 %v4632_v0  ;;  %1045 = vmatmul.mubr.f32.gmra.mxu1 %v4632_v0 }
 0x102   : > { %793 = vmatprep.mubr.f32.mxu0 %v7002_v2  ;;  %1050 = vmatprep.mubr.f32.mxu1 %v7002_v2 }
 0x105   : > { %794 = vmatmul.mubr.f32.gmra.mxu0 %v4639_v9  ;;  %1051 = vmatmul.mubr.f32.gmra.mxu1 %v4639_v9 }
 0x106   : > { %799 = vmatprep.mubr.f32.mxu0 %v7002_v2  ;;  %1056 = vmatprep.mubr.f32.mxu1 %v7002_v2 }
 0x109   : > { %800 = vmatmul.mubr.f32.gmra.mxu0 %v4646_v16  ;;  %1057 = vmatmul.mubr.f32.gmra.mxu1 %v4646_v16 }
 0x10a   : > { %805 = vmatprep.mubr.f32.mxu0 %v7002_v2  ;;  %1062 = vmatprep.mubr.f32.mxu1 %v7002_v2 }
 0x10d   : > { %806 = vmatmul.mubr.f32.gmra.mxu0 %v4653_v21  ;;  %1063 = vmatmul.mubr.f32.gmra.mxu1 %v4653_v21 }
 0x10e   : > { %811 = vmatprep.mubr.f32.mxu0 %v7002_v2  ;;  %1068 = vmatprep.mubr.f32.mxu1 %v7002_v2 }
 0x111   : > { %812 = vmatmul.mubr.f32.gmra.mxu0 %v4660_v29  ;;  %1069 = vmatmul.mubr.f32.gmra.mxu1 %v4660_v29 }
 0x112   : > { %817 = vmatprep.mubr.f32.mxu0 %v7002_v2  ;;  %1074 = vmatprep.mubr.f32.mxu1 %v7002_v2 }
 0x115   : > { %818 = vmatmul.mubr.f32.gmra.mxu0 %v4667_v34  ;;  %1075 = vmatmul.mubr.f32.gmra.mxu1 %v4667_v34  ;;  %v4704_v34 = vld [vmem:[#allocation12 + $0x430] sm:$0xff] }
 0x116   : > { %823 = vmatprep.mubr.f32.mxu0 %v7002_v2  ;;  %1080 = vmatprep.mubr.f32.mxu1 %v7002_v2  ;;  %7201 = vst [vmem:[#allocation32_spill] sm:$0xff] %v4704_v34 }
 0x119   : > { %824 = vmatmul.mubr.f32.gmra.mxu0 %v4674_v41  ;;  %1081 = vmatmul.mubr.f32.gmra.mxu1 %v4674_v41  ;;  %v4695_v41 = vld [vmem:[%s4345_s20 + $0xf8] sm:$0xff] }
 0x11a   : > { %829 = vmatprep.mubr.f32.mxu0 %v7002_v2  ;;  %1086 = vmatprep.mubr.f32.mxu1 %v7002_v2  ;;  %7200 = vst [vmem:[#allocation31_spill] sm:$0xff] %v4695_v41 }
 0x11d   : > { %830 = vmatmul.mubr.f32.gmra.mxu0 %v4681_v44  ;;  %1087 = vmatmul.mubr.f32.gmra.mxu1 %v4681_v44  ;;  %v4702_v44 = vld [vmem:[%s4352_s4] sm:$0xff] }
 0x11e   : > { %835 = vmatprep.mubr.f32.mxu0 %v7002_v2  ;;  %1092 = vmatprep.mubr.f32.mxu1 %v7002_v2 }
 0x121   : > { %836 = vmatmul.mubr.f32.gmra.mxu0 %v4688_v51  ;;  %1093 = vmatmul.mubr.f32.gmra.mxu1 %v4688_v51  ;;  %v4711_v51 = vld [vmem:[%s4352_s4 + $0x8] sm:$0xff] }
 0x122   : > { %841 = vmatprep.mubr.f32.mxu0 %v7002_v2  ;;  %1098 = vmatprep.mubr.f32.mxu1 %v7002_v2 }
 0x125   : > { %842 = vmatmul.mubr.f32.gmra.mxu0 %v4695_v41  ;;  %1099 = vmatmul.mubr.f32.gmra.mxu1 %v4695_v41  ;;  %v4716_v41 = vld [vmem:[#allocation12 + $0x3e8] sm:$0xff] }
 0x126   : > { %1169 = vmatprep.mubr.f32.mxu0 %v7002_v2  ;;  %1502 = vmatprep.mubr.f32.mxu1 %v7002_v2 }
 0x129   : > { %1170 = vmatmul.mubr.f32.vlgmr.msra.gmra.mxu0 %v4376_v1  ;;  %1503 = vmatmul.mubr.f32.vlgmr.msra.gmra.mxu1 %v4702_v44  ;;  %v4724_v1 = vld [vmem:[%s4352_s4 + $0x10] sm:$0xff] }
 0x12a   : > { %3626 = vmatpush3.msra.mxu0 %v4582_v46  ;;  %1173 = vmatprep.mubr.f32.mxu0 %v7002_v2 }
 0x12b   : > { %1508 = vmatprep.mubr.f32.mxu1 %v7002_v2  ;;  %3627 = vmatprep.subr.mxu0 %v4704_v34 }
 0x12c   : > { %3628 = vmatpush3.msra.mxu0 %v4704_v34  ;;  %1921 = vmatpush1.msra.mxu1 %v4382_v4  ;;  %v4729_v34 = vld [vmem:[#allocation12 + $0x3a0] sm:$0xff]  ;;  %v4737_v4 = vld [vmem:[%s4352_s4 + $0x18] sm:$0xff] }
 0x12d   : > { %1174 = vmatmul.mubr.f32.gmra.mxu0 %v4391_v7  ;;  %1509 = vmatmul.mubr.f32.gmra.mxu1 %v4711_v51  ;;  %v4750_v7 = vld [vmem:[%s4352_s4 + $0x20] sm:$0xff] }
 0x12e   : > { %1177 = vmatprep.mubr.f32.mxu0 %v7002_v2  ;;  %1514 = vmatprep.mubr.f32.mxu1 %v7002_v2 }
 0x12f   : > { %3629 = vmatprep.subr.mxu0 %v4716_v41  ;;  %1922 = vmatprep.subr.mxu1 %v4386_v5  ;;  %v4742_v5 = vld [vmem:[#allocation12 + $0x358] sm:$0xff] }
 0x130   : > { %3630 = vmatpush3.msra.mxu0 %v4716_v41  ;;  %1923 = vmatpush1.msra.mxu1 %v4396_v8  ;;  %v4755_v8 = vld [vmem:[#allocation12 + $0x310] sm:$0xff] }
 0x131   : > { %1178 = vmatmul.mubr.f32.gmra.mxu0 %v4405_v12  ;;  %1515 = vmatmul.mubr.f32.gmra.mxu1 %v4724_v1  ;;  %v4768_v12 = vld [vmem:[#allocation12 + $0x2c8] sm:$0xff] }
 0x132   : > { %1183 = vmatprep.mubr.f32.mxu0 %v7002_v2  ;;  %1520 = vmatprep.mubr.f32.mxu1 %v7002_v2 }
 0x133   : > { %3631 = vmatprep.subr.mxu0 %v4729_v34  ;;  %1924 = vmatprep.subr.mxu1 %v4400_v10  ;;  %v4763_v10 = vld [vmem:[%s4352_s4 + $0x28] sm:$0xff] }
 0x134   : > { %3632 = vmatpush3.msra.mxu0 %v4729_v34  ;;  %1925 = vmatpush1.msra.mxu1 %v4409_v13  ;;  %v4776_v13 = vld [vmem:[%s4352_s4 + $0x30] sm:$0xff] }
 0x135   : > { %1184 = vmatmul.mubr.f32.gmra.mxu0 %v4418_v17  ;;  %1521 = vmatmul.mubr.f32.gmra.mxu1 %v4737_v4  ;;  %v4789_v17 = vld [vmem:[%s4352_s4 + $0x38] sm:$0xff] }
 0x136   : > { %1189 = vmatprep.mubr.f32.mxu0 %v7002_v2  ;;  %1526 = vmatprep.mubr.f32.mxu1 %v7002_v2 }
 0x137   : > { %3633 = vmatprep.subr.mxu0 %v4742_v5  ;;  %1926 = vmatprep.subr.mxu1 %v4413_v15  ;;  %v4781_v15 = vld [vmem:[#allocation12 + $0x280] sm:$0xff] }
 0x138   : > { %3634 = vmatpush3.msra.mxu0 %v4742_v5  ;;  %1927 = vmatpush1.msra.mxu1 %v4422_v18  ;;  %v4794_v18 = vld [vmem:[#allocation12 + $0x238] sm:$0xff] }
 0x139   : > { %1190 = vmatmul.mubr.f32.gmra.mxu0 %v4431_v22  ;;  %1527 = vmatmul.mubr.f32.gmra.mxu1 %v4750_v7  ;;  %v4807_v22 = vld [vmem:[#allocation12 + $0x1f0] sm:$0xff] }
 0x13a   : > { %1195 = vmatprep.mubr.f32.mxu0 %v7002_v2  ;;  %1532 = vmatprep.mubr.f32.mxu1 %v7002_v2 }
 0x13b   : > { %3635 = vmatprep.subr.mxu0 %v4755_v8  ;;  %1928 = vmatprep.subr.mxu1 %v4426_v20  ;;  %v4802_v20 = vld [vmem:[%s4352_s4 + $0x40] sm:$0xff] }
 0x13c   : > { %3636 = vmatpush3.msra.mxu0 %v4755_v8  ;;  %1929 = vmatpush1.msra.mxu1 %v4435_v23  ;;  %v4815_v23 = vld [vmem:[%s4352_s4 + $0x48] sm:$0xff] }
 0x13d   : > { %1196 = vmatmul.mubr.f32.gmra.mxu0 %v4444_v27  ;;  %1533 = vmatmul.mubr.f32.gmra.mxu1 %v4763_v10  ;;  %v4828_v27 = vld [vmem:[%s4352_s4 + $0x50] sm:$0xff] }
 0x13e   : > { %1201 = vmatprep.mubr.f32.mxu0 %v7002_v2  ;;  %1538 = vmatprep.mubr.f32.mxu1 %v7002_v2 }
 0x13f   : > { %3637 = vmatprep.subr.mxu0 %v4768_v12  ;;  %1930 = vmatprep.subr.mxu1 %v4439_v25  ;;  %v4820_v25 = vld [vmem:[#allocation12 + $0x1a8] sm:$0xff] }
 0x140   : > { %3638 = vmatpush3.msra.mxu0 %v4768_v12  ;;  %1931 = vmatpush1.msra.mxu1 %v4448_v28  ;;  %v4833_v28 = vld [vmem:[#allocation12 + $0x160] sm:$0xff] }
 0x141   : > { %1202 = vmatmul.mubr.f32.gmra.mxu0 %v4457_v32  ;;  %1539 = vmatmul.mubr.f32.gmra.mxu1 %v4776_v13  ;;  %v4846_v32 = vld [vmem:[#allocation12 + $0x118] sm:$0xff] }
 0x142   : > { %1207 = vmatprep.mubr.f32.mxu0 %v7002_v2  ;;  %1544 = vmatprep.mubr.f32.mxu1 %v7002_v2 }
 0x143   : > { %3639 = vmatprep.subr.mxu0 %v4781_v15  ;;  %1932 = vmatprep.subr.mxu1 %v4452_v30  ;;  %v4841_v30 = vld [vmem:[%s4352_s4 + $0x58] sm:$0xff] }
 0x144   : > { %3640 = vmatpush3.msra.mxu0 %v4781_v15  ;;  %1933 = vmatpush1.msra.mxu1 %v4461_v33  ;;  %v4854_v33 = vld [vmem:[%s4352_s4 + $0x60] sm:$0xff] }
 0x145   : > { %1208 = vmatmul.mubr.f32.gmra.mxu0 %v4470_v37  ;;  %1545 = vmatmul.mubr.f32.gmra.mxu1 %v4789_v17  ;;  %v4867_v37 = vld [vmem:[%s4352_s4 + $0x68] sm:$0xff] }
 0x146   : > { %1213 = vmatprep.mubr.f32.mxu0 %v7002_v2  ;;  %1550 = vmatprep.mubr.f32.mxu1 %v7002_v2 }
 0x147   : > { %3641 = vmatprep.subr.mxu0 %v4794_v18  ;;  %1934 = vmatprep.subr.mxu1 %v4465_v35  ;;  %v4859_v35 = vld [vmem:[#allocation12 + $0xd0] sm:$0xff] }
 0x148   : > { %3642 = vmatpush3.msra.mxu0 %v4794_v18  ;;  %1935 = vmatpush1.msra.mxu1 %v4474_v38  ;;  %v4872_v38 = vld [vmem:[#allocation12 + $0x88] sm:$0xff] }
 0x149   : > { %1214 = vmatmul.mubr.f32.gmra.mxu0 %v4483_v42  ;;  %1551 = vmatmul.mubr.f32.gmra.mxu1 %v4802_v20  ;;  %v4885_v42 = vld [vmem:[#allocation12 + $0x40] sm:$0xff] }
 0x14a   : > { %1219 = vmatprep.mubr.f32.mxu0 %v7002_v2  ;;  %1556 = vmatprep.mubr.f32.mxu1 %v7002_v2 }
 0x14b   : > { %3643 = vmatprep.subr.mxu0 %v4807_v22  ;;  %1936 = vmatprep.subr.mxu1 %v4478_v40  ;;  %v4880_v40 = vld [vmem:[%s4352_s4 + $0x70] sm:$0xff] }
 0x14c   : > { %3644 = vmatpush3.msra.mxu0 %v4807_v22  ;;  %1937 = vmatpush1.msra.mxu1 %v4487_v43  ;;  %v4893_v43 = vld [vmem:[%s4352_s4 + $0x78] sm:$0xff] }
 0x14d   : > { %1220 = vmatmul.mubr.f32.gmra.mxu0 %v4496_v47  ;;  %1557 = vmatmul.mubr.f32.gmra.mxu1 %v4815_v23 }
 0x14e   : > { %1225 = vmatprep.mubr.f32.mxu0 %v7002_v2  ;;  %1562 = vmatprep.mubr.f32.mxu1 %v7002_v2 }
 0x14f   : > { %3645 = vmatprep.subr.mxu0 %v4820_v25  ;;  %1938 = vmatprep.subr.mxu1 %v4491_v45  ;;  %v4904_v45 = vld [vmem:[%s4352_s4 + $0x80] sm:$0xff] }
 0x150   : > { %3646 = vmatpush3.msra.mxu0 %v4820_v25  ;;  %1939 = vmatpush1.msra.mxu1 %v4500_v48 }
 0x151   : > { %1226 = vmatmul.mubr.f32.gmra.mxu0 %v4509_v52  ;;  %1563 = vmatmul.mubr.f32.gmra.mxu1 %v4828_v27 }
 0x152   : > { %1231 = vmatprep.mubr.f32.mxu0 %v7002_v2  ;;  %1568 = vmatprep.mubr.f32.mxu1 %v7002_v2 }
 0x153   : > { %3647 = vmatprep.subr.mxu0 %v4833_v28  ;;  %1940 = vmatprep.subr.mxu1 %v4504_v50  ;;  %v4917_v50 = vld [vmem:[%s4352_s4 + $0x88] sm:$0xff] }
 0x154   : > { %3648 = vmatpush3.msra.mxu0 %v4833_v28  ;;  %1941 = vmatpush1.msra.mxu1 %v4513_v53 }
 0x155   : > { %1232 = vmatmul.mubr.f32.gmra.mxu0 %v4522_v57  ;;  %1569 = vmatmul.mubr.f32.gmra.mxu1 %v4841_v30 }
 0x156   : > { %1237 = vmatprep.mubr.f32.mxu0 %v7002_v2  ;;  %1574 = vmatprep.mubr.f32.mxu1 %v7002_v2 }
 0x157   : > { %3649 = vmatprep.subr.mxu0 %v4846_v32  ;;  %1942 = vmatprep.subr.mxu1 %v4517_v55 }
 0x158   : > { %3650 = vmatpush3.msra.mxu0 %v4846_v32  ;;  %1943 = vmatpush1.msra.mxu1 %v4526_v58  ;;  %v4933_v58 = vld [vmem:[%s4352_s4 + $0x90] sm:$0xff] }
 0x159   : > { %1238 = vmatmul.mubr.f32.gmra.mxu0 %v4535_v62  ;;  %1575 = vmatmul.mubr.f32.gmra.mxu1 %v4854_v33 }
 0x15a   : > { %1243 = vmatprep.mubr.f32.mxu0 %v7002_v2  ;;  %1580 = vmatprep.mubr.f32.mxu1 %v7002_v2 }
 0x15b   : > { %3651 = vmatprep.subr.mxu0 %v4859_v35  ;;  %1944 = vmatprep.subr.mxu1 %v4530_v60 }
 0x15c   : > { %3652 = vmatpush3.msra.mxu0 %v4859_v35  ;;  %1945 = vmatpush1.msra.mxu1 %v4539_v63 }
 0x15d   : > { %1244 = vmatmul.mubr.f32.gmra.mxu0 %v4548_v11  ;;  %1581 = vmatmul.mubr.f32.gmra.mxu1 %v4867_v37  ;;  %v4948_v11 = vld [vmem:[%s4352_s4 + $0x98] sm:$0xff] }
 0x15e   : > { %1249 = vmatprep.mubr.f32.mxu0 %v7002_v2  ;;  %1586 = vmatprep.mubr.f32.mxu1 %v7002_v2 }
 0x15f   : > { %3653 = vmatprep.subr.mxu0 %v4872_v38  ;;  %1946 = vmatprep.subr.mxu1 %v4543_v6 }
 0x160   : > { %3654 = vmatpush3.msra.mxu0 %v4872_v38  ;;  %1947 = vmatpush1.msra.mxu1 %v4552_v14 }
 0x161   : > { %1250 = vmatmul.mubr.f32.gmra.mxu0 %v4561_v24  ;;  %1587 = vmatmul.mubr.f32.gmra.mxu1 %v4880_v40 }
 0x162   : > { %1255 = vmatprep.mubr.f32.mxu0 %v7002_v2  ;;  %1592 = vmatprep.mubr.f32.mxu1 %v7002_v2 }
 0x163   : > { %3655 = vmatprep.subr.mxu0 %v4885_v42  ;;  %1948 = vmatprep.subr.mxu1 %v4556_v19 }
 0x164   : > { %3656 = vmatpush3.msra.mxu0 %v4885_v42  ;;  %1949 = vmatpush1.msra.mxu1 %v4565_v26 }
 0x165   : > { %1256 = vmatmul.mubr.f32.gmra.mxu0 %v4574_v36  ;;  %1593 = vmatmul.mubr.f32.gmra.mxu1 %v4893_v43 }
 0x166   : > { %1261 = vmatprep.mubr.f32.mxu0 %v7002_v2  ;;  %1598 = vmatprep.mubr.f32.mxu1 %v7002_v2 }
 0x167   : > { %1950 = vmatprep.subr.mxu1 %v4569_v31  ;;  %v4963_v31 = vld [vmem:[%s4352_s4 + $0xa0] sm:$0xff] }
 0x168   : > { %1951 = vmatpush1.msra.mxu1 %v4578_v39 }
 0x169   : > { %v4908_v47 = vpop.f32.mrf.mxu0  ;;  %v4910_v48 = vpop.f32.mrf.mxu1  ;;  %1262 = vmatmul.mubr.f32.gmra.mxu0 %v4587_v49  ;;  %1599 = vmatmul.mubr.f32.gmra.mxu1 %v4904_v45 }
 0x16a   : > { %7202 = vst [vmem:[#allocation33_spill] sm:$0xff] %v4908_v47  ;;  %1267 = vmatprep.mubr.f32.mxu0 %v7002_v2  ;;  %1604 = vmatprep.mubr.f32.mxu1 %v7002_v2 }
 0x16b   : > { %v4919_v52 = vpop.f32.mrf.mxu0  ;;  %v4921_v53 = vpop.f32.mrf.mxu1  ;;  %3705 = vmatprep.subr.mxu1 %v4582_v46 }
 0x16d   : > { %v4924_v55 = vpop.f32.mrf.mxu0  ;;  %v4926_v57 = vpop.f32.mrf.mxu1  ;;  %1268 = vmatmul.mubr.f32.gmra.mxu0 %v4596_v54  ;;  %1605 = vmatmul.mubr.f32.gmra.mxu1 %v4917_v50 }
 0x16e   : > { %7203 = vst [vmem:[#allocation34_spill] sm:$0xff] %v4924_v55  ;;  %1273 = vmatprep.mubr.f32.mxu0 %v7002_v2  ;;  %1610 = vmatprep.mubr.f32.mxu1 %v7002_v2 }
 0x16f   : > { %v4935_v60 = vpop.f32.mrf.mxu0  ;;  %v4937_v62 = vpop.f32.mrf.mxu1 }
 0x171   : > { %v4939_v63 = vpop.f32.mrf.mxu0  ;;  %v4941_v6 = vpop.f32.mrf.mxu1  ;;  %1274 = vmatmul.mubr.f32.gmra.mxu0 %v4604_v56  ;;  %1611 = vmatmul.mubr.f32.gmra.mxu1 %v4933_v58  ;;  %v4978_v56 = vld [vmem:[%s4352_s4 + $0xa8] sm:$0xff] }
 0x172   : > { %7204 = vst [vmem:[#allocation35_spill] sm:$0xff] %v4939_v63  ;;  %7205 = vst [vmem:[#allocation36_spill] sm:$0xff] %v4941_v6  ;;  %1279 = vmatprep.mubr.f32.mxu0 %v7002_v2  ;;  %1616 = vmatprep.mubr.f32.mxu1 %v7002_v2 }
 0x173   : > { %v4950_v14 = vpop.f32.mrf.mxu0  ;;  %v4952_v19 = vpop.f32.mrf.mxu1 }
 0x175   : > { %v4954_v24 = vpop.f32.mrf.mxu0  ;;  %v4956_v26 = vpop.f32.mrf.mxu1  ;;  %1280 = vmatmul.mubr.f32.gmra.mxu0 %v4611_v3  ;;  %1617 = vmatmul.mubr.f32.gmra.mxu1 %v4948_v11 }
 0x176   : > { %7206 = vst [vmem:[#allocation37_spill] sm:$0xff] %v4954_v24  ;;  %7207 = vst [vmem:[#allocation38_spill] sm:$0xff] %v4956_v26  ;;  %1285 = vmatprep.mubr.f32.mxu0 %v7002_v2  ;;  %1622 = vmatprep.mubr.f32.mxu1 %v7002_v2 }
 0x177   : > { %v4965_v36 = vpop.f32.mrf.mxu0  ;;  %v4967_v39 = vpop.f32.mrf.mxu1 }
 0x178   : > { %7208 = vst [vmem:[#allocation39_spill] sm:$0xff] %v4967_v39 }
 0x179   : > { %v4969_v49 = vpop.f32.mrf.mxu0  ;;  %v4971_v54 = vpop.f32.mrf.mxu1  ;;  %1286 = vmatmul.mubr.f32.gmra.mxu0 %v4618_v59  ;;  %1623 = vmatmul.mubr.f32.gmra.mxu1 %v4963_v31  ;;  %v4993_v59 = vld [vmem:[%s4352_s4 + $0xb0] sm:$0xff] }
 0x17a   : > { %7209 = vst [vmem:[#allocation40_spill] sm:$0xff] %v4969_v49  ;;  %7210 = vst [vmem:[#allocation41_spill] sm:$0xff] %v4971_v54  ;;  %1291 = vmatprep.mubr.f32.mxu0 %v7002_v2  ;;  %1628 = vmatprep.mubr.f32.mxu1 %v7002_v2 }
 0x17b   : > { %v4980_v3 = vpop.f32.mrf.mxu0  ;;  %v4982_v24 = vpop.f32.mrf.mxu1 }
 0x17c   : > { %7211 = vst [vmem:[#allocation42_spill] sm:$0xff] %v4980_v3  ;;  %7212 = vst [vmem:[#allocation43_spill] sm:$0xff] %v4982_v24 }
 0x17d   : > { %v4984_v63 = vpop.f32.mrf.mxu0  ;;  %v4986_v49 = vpop.f32.mrf.mxu1  ;;  %1292 = vmatmul.mubr.f32.gmra.mxu0 %v4625_v61  ;;  %1629 = vmatmul.mubr.f32.gmra.mxu1 %v4978_v56  ;;  %v5008_v61 = vld [vmem:[%s4352_s4 + $0xb8] sm:$0xff] }
 0x17e   : > { %7213 = vst [vmem:[#allocation44_spill] sm:$0xff] %v4984_v63  ;;  %7214 = vst [vmem:[#allocation45_spill] sm:$0xff] %v4986_v49  ;;  %1297 = vmatprep.mubr.f32.mxu0 %v7002_v2  ;;  %1634 = vmatprep.mubr.f32.mxu1 %v7002_v2 }
 0x17f   : > { %v4995_v55 = vpop.f32.mrf.mxu0  ;;  %v4997_v47 = vpop.f32.mrf.mxu1 }
 0x180   : > { %7215 = vst [vmem:[#allocation46_spill] sm:$0xff] %v4995_v55  ;;  %7216 = vst [vmem:[#allocation47_spill] sm:$0xff] %v4997_v47 }
 0x181   : > { %v4999_v54 = vpop.f32.mrf.mxu0  ;;  %v5001_v63 = vpop.f32.mrf.mxu1  ;;  %1298 = vmatmul.mubr.f32.gmra.mxu0 %v4632_v0  ;;  %1635 = vmatmul.mubr.f32.gmra.mxu1 %v4993_v59  ;;  %v5023_v0 = vld [vmem:[%s4352_s4 + $0xc0] sm:$0xff] }
 0x182   : > { %7217 = vst [vmem:[#allocation48_spill] sm:$0xff] %v4999_v54  ;;  %7218 = vst [vmem:[#allocation49_spill] sm:$0xff] %v5001_v63  ;;  %1303 = vmatprep.mubr.f32.mxu0 %v7002_v2  ;;  %1640 = vmatprep.mubr.f32.mxu1 %v7002_v2 }
 0x183   : > { %v5010_v49 = vpop.f32.mrf.mxu0  ;;  %v5012_v24 = vpop.f32.mrf.mxu1 }
 0x184   : > { %7219 = vst [vmem:[#allocation50_spill] sm:$0xff] %v5010_v49  ;;  %7220 = vst [vmem:[#allocation51_spill] sm:$0xff] %v5012_v24 }
 0x185   : > { %v5014_v47 = vpop.f32.mrf.mxu0  ;;  %v5016_v54 = vpop.f32.mrf.mxu1  ;;  %1304 = vmatmul.mubr.f32.gmra.mxu0 %v4639_v9  ;;  %1641 = vmatmul.mubr.f32.gmra.mxu1 %v5008_v61  ;;  %v5038_v9 = vld [vmem:[%s4352_s4 + $0xc8] sm:$0xff] }
 0x186   : > { %7221 = vst [vmem:[#allocation52_spill] sm:$0xff] %v5014_v47  ;;  %7222 = vst [vmem:[#allocation53_spill] sm:$0xff] %v5016_v54  ;;  %1309 = vmatprep.mubr.f32.mxu0 %v7002_v2  ;;  %1646 = vmatprep.mubr.f32.mxu1 %v7002_v2 }
 0x187   : > { %v5025_v63 = vpop.f32.mrf.mxu0  ;;  %v5027_v49 = vpop.f32.mrf.mxu1 }
 0x188   : > { %7223 = vst [vmem:[#allocation54_spill] sm:$0xff] %v5025_v63  ;;  %7224 = vst [vmem:[#allocation55_spill] sm:$0xff] %v5027_v49 }
 0x189   : > { %v5029_v24 = vpop.f32.mrf.mxu0  ;;  %v5031_v47 = vpop.f32.mrf.mxu1  ;;  %1310 = vmatmul.mubr.f32.gmra.mxu0 %v4646_v16  ;;  %1647 = vmatmul.mubr.f32.gmra.mxu1 %v5023_v0  ;;  %v5053_v16 = vld [vmem:[%s4352_s4 + $0xd0] sm:$0xff] }
 0x18a   : > { %7225 = vst [vmem:[#allocation56_spill] sm:$0xff] %v5029_v24  ;;  %7226 = vst [vmem:[#allocation57_spill] sm:$0xff] %v5031_v47  ;;  %1315 = vmatprep.mubr.f32.mxu0 %v7002_v2  ;;  %1652 = vmatprep.mubr.f32.mxu1 %v7002_v2 }
 0x18b   : > { %v5040_v54 = vpop.f32.mrf.mxu0  ;;  %v5042_v63 = vpop.f32.mrf.mxu1 }
 0x18c   : > { %7227 = vst [vmem:[#allocation58_spill] sm:$0xff] %v5040_v54  ;;  %7228 = vst [vmem:[#allocation59_spill] sm:$0xff] %v5042_v63 }
 0x18d   : > { %v5044_v49 = vpop.f32.mrf.mxu0  ;;  %v5046_v24 = vpop.f32.mrf.mxu1  ;;  %1316 = vmatmul.mubr.f32.gmra.mxu0 %v4653_v21  ;;  %1653 = vmatmul.mubr.f32.gmra.mxu1 %v5038_v9  ;;  %v5068_v21 = vld [vmem:[%s4352_s4 + $0xd8] sm:$0xff] }
 0x18e   : > { %7229 = vst [vmem:[#allocation60_spill] sm:$0xff] %v5044_v49  ;;  %7230 = vst [vmem:[#allocation61_spill] sm:$0xff] %v5046_v24  ;;  %1321 = vmatprep.mubr.f32.mxu0 %v7002_v2  ;;  %1658 = vmatprep.mubr.f32.mxu1 %v7002_v2 }
 0x18f   : > { %v5055_v47 = vpop.f32.mrf.mxu0  ;;  %v5057_v54 = vpop.f32.mrf.mxu1 }
 0x190   : > { %7231 = vst [vmem:[#allocation62_spill] sm:$0xff] %v5055_v47  ;;  %7232 = vst [vmem:[#allocation63_spill] sm:$0xff] %v5057_v54 }
 0x191   : > { %v5059_v63 = vpop.f32.mrf.mxu0  ;;  %v5061_v49 = vpop.f32.mrf.mxu1  ;;  %1322 = vmatmul.mubr.f32.gmra.mxu0 %v4660_v29  ;;  %1659 = vmatmul.mubr.f32.gmra.mxu1 %v5053_v16  ;;  %v5083_v29 = vld [vmem:[%s4352_s4 + $0xe0] sm:$0xff] }
 0x192   : > { %7233 = vst [vmem:[#allocation64_spill] sm:$0xff] %v5059_v63  ;;  %7234 = vst [vmem:[#allocation65_spill] sm:$0xff] %v5061_v49  ;;  %1327 = vmatprep.mubr.f32.mxu0 %v7002_v2  ;;  %1664 = vmatprep.mubr.f32.mxu1 %v7002_v2  ;;  %v7239_v49 = vld [vmem:[#allocation27_spill] sm:$0xff] }
 0x193   : > { %v5070_v24 = vpop.f32.mrf.mxu0  ;;  %v5072_v47 = vpop.f32.mrf.mxu1 }
 0x194   : > { %7235 = vst [vmem:[#allocation66_spill] sm:$0xff] %v5070_v24  ;;  %7236 = vst [vmem:[#allocation67_spill] sm:$0xff] %v5072_v47 }
 0x195   : > { %v5074_v54 = vpop.f32.mrf.mxu0  ;;  %v5076_v63 = vpop.f32.mrf.mxu1  ;;  %1328 = vmatmul.mubr.f32.gmra.mxu0 %v7239_v49  ;;  %1665 = vmatmul.mubr.f32.gmra.mxu1 %v5068_v21  ;;  %v5098_v49 = vld [vmem:[%s4352_s4 + $0xe8] sm:$0xff] }
 0x196   : > { %7237 = vst [vmem:[#allocation68_spill] sm:$0xff] %v5074_v54  ;;  %7238 = vst [vmem:[#allocation69_spill] sm:$0xff] %v5076_v63  ;;  %1333 = vmatprep.mubr.f32.mxu0 %v7002_v2  ;;  %1670 = vmatprep.mubr.f32.mxu1 %v7002_v2  ;;  %v7244_v63 = vld [vmem:[#allocation28_spill] sm:$0xff] }
 0x197   : > { %v5085_v55 = vpop.f32.mrf.mxu0  ;;  %v5087_v24 = vpop.f32.mrf.mxu1 }
 0x198   : > { %7240 = vst [vmem:[#allocation27_spill] sm:$0xff] %v5085_v55  ;;  %7241 = vst [vmem:[#allocation70_spill] sm:$0xff] %v5087_v24 }
 0x199   : > { %v5089_v47 = vpop.f32.mrf.mxu0  ;;  %v5091_v54 = vpop.f32.mrf.mxu1  ;;  %1334 = vmatmul.mubr.f32.gmra.mxu0 %v7244_v63  ;;  %1671 = vmatmul.mubr.f32.gmra.mxu1 %v5083_v29  ;;  %v5113_v63 = vld [vmem:[%s4352_s4 + $0xf0] sm:$0xff] }
 0x19a   : > { %7242 = vst [vmem:[#allocation71_spill] sm:$0xff] %v5089_v47  ;;  %7243 = vst [vmem:[#allocation72_spill] sm:$0xff] %v5091_v54  ;;  %1339 = vmatprep.mubr.f32.mxu0 %v7002_v2  ;;  %1676 = vmatprep.mubr.f32.mxu1 %v7002_v2  ;;  %v7249_v54 = vld [vmem:[#allocation29_spill] sm:$0xff] }
 0x19b   : > { %v5100_v26 = vpop.f32.mrf.mxu0  ;;  %v5102_v55 = vpop.f32.mrf.mxu1 }
 0x19c   : > { %7245 = vst [vmem:[#allocation28_spill] sm:$0xff] %v5100_v26  ;;  %7246 = vst [vmem:[#allocation73_spill] sm:$0xff] %v5102_v55 }
 0x19d   : > { %v5104_v24 = vpop.f32.mrf.mxu0  ;;  %v5106_v47 = vpop.f32.mrf.mxu1  ;;  %1340 = vmatmul.mubr.f32.gmra.mxu0 %v7249_v54  ;;  %1677 = vmatmul.mubr.f32.gmra.mxu1 %v5098_v49  ;;  %v5128_v54 = vld [vmem:[%s4352_s4 + $0xf8] sm:$0xff] }
 0x19e   : > { %7247 = vst [vmem:[#allocation74_spill] sm:$0xff] %v5104_v24  ;;  %7248 = vst [vmem:[#allocation75_spill] sm:$0xff] %v5106_v47  ;;  %1345 = vmatprep.mubr.f32.mxu0 %v7002_v2  ;;  %1682 = vmatprep.mubr.f32.mxu1 %v7002_v2  ;;  %v7254_v47 = vld [vmem:[#allocation30_spill] sm:$0xff] }
 0x19f   : > { %v5115_v39 = vpop.f32.mrf.mxu0  ;;  %v5117_v26 = vpop.f32.mrf.mxu1 }
 0x1a0   : > { %7250 = vst [vmem:[#allocation29_spill] sm:$0xff] %v5115_v39  ;;  %7251 = vst [vmem:[#allocation76_spill] sm:$0xff] %v5117_v26 }
 0x1a1   : > { %v5119_v55 = vpop.f32.mrf.mxu0  ;;  %v5121_v24 = vpop.f32.mrf.mxu1  ;;  %1346 = vmatmul.mubr.f32.gmra.mxu0 %v7254_v47  ;;  %1683 = vmatmul.mubr.f32.gmra.mxu1 %v5113_v63  ;;  %v1918_v47 = vld [vmem:[%s4359_s24] sm:$0xff] }
 0x1a2   : > { %7252 = vst [vmem:[#allocation77_spill] sm:$0xff] %v5119_v55  ;;  %7253 = vst [vmem:[#allocation78_spill] sm:$0xff] %v5121_v24  ;;  %1351 = vmatprep.mubr.f32.mxu0 %v7002_v2  ;;  %1688 = vmatprep.mubr.f32.mxu1 %v7002_v2  ;;  %v7259_v55 = vld [vmem:[#allocation31_spill] sm:$0xff] }
 0x1a3   : > { %v5130_v3 = vpop.f32.mrf.mxu0  ;;  %v5132_v39 = vpop.f32.mrf.mxu1 }
 0x1a4   : > { %7255 = vst [vmem:[#allocation30_spill] sm:$0xff] %v5130_v3  ;;  %7256 = vst [vmem:[#allocation79_spill] sm:$0xff] %v5132_v39 }
 0x1a5   : > { %v5134_v26 = vpop.f32.mrf.mxu0  ;;  %v5136_v6 = vpop.f32.mrf.mxu1  ;;  %1352 = vmatmul.mubr.f32.gmra.mxu0 %v7259_v55  ;;  %1689 = vmatmul.mubr.f32.gmra.mxu1 %v5128_v54 }
 0x1a6   : > { %7257 = vst [vmem:[#allocation80_spill] sm:$0xff] %v5134_v26  ;;  %7258 = vst [vmem:[#allocation81_spill] sm:$0xff] %v5136_v6  ;;  %3657 = vmatprep.mubr.f32.mxu0 %v4702_v44  ;;  %1984 = vmatprep.mubr.f32.mxu1 %v7002_v2  ;;  %v7262_v44 = vld [vmem:[#allocation32_spill] sm:$0xff]  ;;  %v7263_v6 = vmov 0.0  }
 0x1a7   : > { %v5143_v24 = vpop.f32.mrf.mxu0  ;;  %v5145_v3 = vpop.f32.mrf.mxu1 }
 0x1a8   : > { %7260 = vst [vmem:[#allocation31_spill] sm:$0xff] %v5145_v3  ;;  %v1919_v3 = vld [vmem:[%s4359_s24 + $0x8] sm:$0xff] }
 0x1a9   : > { %v5147_v39 = vpop.f32.mrf.mxu0  ;;  %v5149_v26 = vpop.f32.mrf.mxu1  ;;  %3658 = vmatmul.mubr.f32.vlgmr.msra.gmra.mxu0 %v4711_v51  ;;  %1985 = vmatmul.mubr.f32.vlgmr.msra.gmra.mxu1 %v1918_v47 }
 0x1aa   : > { %7261 = vst [vmem:[#allocation82_spill] sm:$0xff] %v5147_v39  ;;  %3706 = vmatpush3.msra.mxu1 %v4582_v46  ;;  %3660 = vmatprep.mubr.f32.mxu0 %v4724_v1  ;;  %v1997_v39 = vld [vmem:[%s4361_s10] sm:$0xff] }
 0x1ab   : > { %3707 = vmatprep.subr.mxu1 %v7262_v44  ;;  %v5155_v55 = vpop.f32.mrf.mxu0  ;;  %v5157_v2 = vpop.f32.mrf.mxu1  ;;  %1990 = vmatprep.mubr.f32.mxu1 %v7263_v6 }
 0x1ac   : > { %3708 = vmatpush3.msra.mxu1 %v7262_v44 }
 0x1ad   : > { %3709 = vmatprep.subr.mxu1 %v4716_v41  ;;  %v5164_v51 = vpop.f32.mrf.mxu0  ;;  %v5166_v47 = vpop.f32.mrf.mxu1  ;;  %3661 = vmatmul.mubr.f32.gmra.mxu0 %v4737_v4 }
 0x1ae   : > { %7264 = vst [vmem:[#allocation32_spill] sm:$0xff] %v5164_v51  ;;  %1991 = vmatmul.mubr.f32.gmra.mxu1 %v1919_v3  ;;  %3663 = vmatprep.mubr.f32.mxu0 %v4750_v7 }
 0x1af   : > { %3710 = vmatpush3.msra.mxu1 %v4716_v41  ;;  %v5171_v46 = vpop.f32.mrf.mxu0  ;;  %v5173_v1 = vpop.f32.mrf.mxu1  ;;  %3737 = vmatprep.mubr.f32.mxu1 %v1997_v39 }
 0x1b0   : > { %3711 = vmatprep.subr.mxu1 %v4729_v34 }
 0x1b1   : > { %3712 = vmatpush3.msra.mxu1 %v4729_v34  ;;  %v5177_v6 = vpop.f32.mrf.mxu0  ;;  %v5179_v44 = vpop.f32.mrf.mxu1  ;;  %3664 = vmatmul.mubr.f32.gmra.mxu0 %v4763_v10 }
 0x1b2   : > { %7265 = vst [vmem:[#allocation83_spill] sm:$0xff] %v5177_v6  ;;  %3713 = vmatprep.subr.mxu1 %v4742_v5  ;;  %3666 = vmatprep.mubr.f32.mxu0 %v4776_v13 }
 0x1b3   : > { %3714 = vmatpush3.msra.mxu1 %v4742_v5  ;;  %v5185_v41 = vpop.f32.mrf.mxu0  ;;  %v5187_v4 = vpop.f32.mrf.mxu1 }
 0x1b4   : > { %7266 = vst [vmem:[#allocation84_spill] sm:$0xff] %v5187_v4  ;;  %3715 = vmatprep.subr.mxu1 %v4755_v8 }
 0x1b5   : > { %3716 = vmatpush3.msra.mxu1 %v4755_v8  ;;  %v5191_v34 = vpop.f32.mrf.mxu0  ;;  %v5193_v7 = vpop.f32.mrf.mxu1  ;;  %3667 = vmatmul.mubr.f32.gmra.mxu0 %v4789_v17 }
 0x1b6   : > { %7267 = vst [vmem:[#allocation85_spill] sm:$0xff] %v5191_v34  ;;  %3717 = vmatprep.subr.mxu1 %v4768_v12  ;;  %3669 = vmatprep.mubr.f32.mxu0 %v4802_v20 }
 0x1b7   : > { %3718 = vmatpush3.msra.mxu1 %v4768_v12  ;;  %v5199_v5 = vpop.f32.mrf.mxu0  ;;  %v5201_v10 = vpop.f32.mrf.mxu1 }
 0x1b8   : > { %7268 = vst [vmem:[#allocation86_spill] sm:$0xff] %v5201_v10  ;;  %3719 = vmatprep.subr.mxu1 %v4781_v15 }
 0x1b9   : > { %3720 = vmatpush3.msra.mxu1 %v4781_v15  ;;  %v5205_v8 = vpop.f32.mrf.mxu0  ;;  %v5207_v13 = vpop.f32.mrf.mxu1  ;;  %3670 = vmatmul.mubr.f32.gmra.mxu0 %v4815_v23 }
 0x1ba   : > { %7269 = vst [vmem:[#allocation87_spill] sm:$0xff] %v5205_v8  ;;  %3721 = vmatprep.subr.mxu1 %v4794_v18  ;;  %3672 = vmatprep.mubr.f32.mxu0 %v4828_v27 }
 0x1bb   : > { %3722 = vmatpush3.msra.mxu1 %v4794_v18  ;;  %v5213_v12 = vpop.f32.mrf.mxu0  ;;  %v5215_v17 = vpop.f32.mrf.mxu1 }
 0x1bc   : > { %7270 = vst [vmem:[#allocation88_spill] sm:$0xff] %v5215_v17  ;;  %3723 = vmatprep.subr.mxu1 %v4807_v22 }
 0x1bd   : > { %3724 = vmatpush3.msra.mxu1 %v4807_v22  ;;  %v5219_v15 = vpop.f32.mrf.mxu0  ;;  %v5221_v20 = vpop.f32.mrf.mxu1  ;;  %3673 = vmatmul.mubr.f32.gmra.mxu0 %v4841_v30 }
 0x1be   : > { %7271 = vst [vmem:[#allocation89_spill] sm:$0xff] %v5219_v15  ;;  %3725 = vmatprep.subr.mxu1 %v4820_v25  ;;  %3675 = vmatprep.mubr.f32.mxu0 %v4854_v33 }
 0x1bf   : > { %3726 = vmatpush3.msra.mxu1 %v4820_v25  ;;  %v5227_v18 = vpop.f32.mrf.mxu0  ;;  %v5229_v23 = vpop.f32.mrf.mxu1 }
 0x1c0   : > { %7272 = vst [vmem:[#allocation90_spill] sm:$0xff] %v5229_v23  ;;  %3727 = vmatprep.subr.mxu1 %v4833_v28 }
 0x1c1   : > { %3728 = vmatpush3.msra.mxu1 %v4833_v28  ;;  %v5233_v22 = vpop.f32.mrf.mxu0  ;;  %v5235_v27 = vpop.f32.mrf.mxu1  ;;  %3676 = vmatmul.mubr.f32.gmra.mxu0 %v4867_v37 }
 0x1c2   : > { %7273 = vst [vmem:[#allocation91_spill] sm:$0xff] %v5233_v22  ;;  %3729 = vmatprep.subr.mxu1 %v4846_v32  ;;  %3678 = vmatprep.mubr.f32.mxu0 %v4880_v40  ;;  %v1998_v40 = vld [vmem:[%s4361_s10 + $0x8] sm:$0xff] }
 0x1c3   : > { %3730 = vmatpush3.msra.mxu1 %v4846_v32  ;;  %v5241_v25 = vpop.f32.mrf.mxu0  ;;  %v5243_v30 = vpop.f32.mrf.mxu1 }
 0x1c4   : > { %7274 = vst [vmem:[#allocation92_spill] sm:$0xff] %v5243_v30  ;;  %3731 = vmatprep.subr.mxu1 %v4859_v35 }
 0x1c5   : > { %3732 = vmatpush3.msra.mxu1 %v4859_v35  ;;  %v5247_v28 = vpop.f32.mrf.mxu0  ;;  %v5249_v33 = vpop.f32.mrf.mxu1  ;;  %3679 = vmatmul.mubr.f32.gmra.mxu0 %v4893_v43 }
 0x1c6   : > { %7275 = vst [vmem:[#allocation93_spill] sm:$0xff] %v5247_v28  ;;  %3733 = vmatprep.subr.mxu1 %v4872_v38  ;;  %3681 = vmatprep.mubr.f32.mxu0 %v4904_v45 }
 0x1c7   : > { %3734 = vmatpush3.msra.mxu1 %v4872_v38  ;;  %v5255_v32 = vpop.f32.mrf.mxu0  ;;  %v5257_v37 = vpop.f32.mrf.mxu1 }
 0x1c8   : > { %7276 = vst [vmem:[#allocation94_spill] sm:$0xff] %v5257_v37  ;;  %3735 = vmatprep.subr.mxu1 %v4885_v42 }
 0x1c9   : > { %3736 = vmatpush3.msra.mxu1 %v4885_v42  ;;  %v5262_v35 = vpop.f32.mrf.mxu0  ;;  %v5264_v39 = vpop.f32.mrf.mxu1  ;;  %3682 = vmatmul.mubr.f32.gmra.mxu0 %v4917_v50 }
 0x1ca   : > { %7277 = vst [vmem:[#allocation95_spill] sm:$0xff] %v5262_v35  ;;  %3738 = vmatmul.mubr.f32.vlgmr.msra.gmra.mxu1 %v1998_v40  ;;  %3684 = vmatprep.mubr.f32.mxu0 %v4933_v58 }
 0x1cb   : > { %v5268_v43 = vpop.f32.mrf.mxu0  ;;  %v5270_v38 = vpop.f32.mrf.mxu1 }
 0x1cc   : > { %7278 = vst [vmem:[#allocation96_spill] sm:$0xff] %v5270_v38 }
 0x1cd   : > { %v5272_v45 = vpop.f32.mrf.mxu0  ;;  %v5274_v3 = vpop.f32.mrf.mxu1  ;;  %3685 = vmatmul.mubr.f32.gmra.mxu0 %v4948_v11 }
 0x1ce   : > { %7279 = vst [vmem:[#allocation97_spill] sm:$0xff] %v5272_v45  ;;  %3687 = vmatprep.mubr.f32.mxu0 %v4963_v31 }
 0x1cf   : > { %v5278_v42 = vpop.f32.mrf.mxu0  ;;  %v5280_v35 = vpop.f32.mrf.mxu1 }
 0x1d0   : > { %7280 = vst [vmem:[#allocation98_spill] sm:$0xff] %v5280_v35 }
 0x1d1   : > { %v5282_v50 = vpop.f32.mrf.mxu0  ;;  %v5284_v40 = vpop.f32.mrf.mxu1  ;;  %3688 = vmatmul.mubr.f32.gmra.mxu0 %v4978_v56 }
 0x1d2   : > { %7281 = vst [vmem:[#allocation99_spill] sm:$0xff] %v5282_v50  ;;  %3690 = vmatprep.mubr.f32.mxu0 %v4993_v59 }
 0x1d3   : > { %v5288_v58 = vpop.f32.mrf.mxu0  ;;  %v5290_v45 = vpop.f32.mrf.mxu1 }
 0x1d4   : > { %7282 = vst [vmem:[#allocation100_spill] sm:$0xff] %v5290_v45 }
 0x1d5   : > { %v5292_v28 = vpop.f32.mrf.mxu0  ;;  %v5294_v11 = vpop.f32.mrf.mxu1  ;;  %3691 = vmatmul.mubr.f32.gmra.mxu0 %v5008_v61 }
 0x1d6   : > { %7283 = vst [vmem:[#allocation101_spill] sm:$0xff] %v5292_v28  ;;  %3693 = vmatprep.mubr.f32.mxu0 %v5023_v0 }
 0x1d7   : > { %v5298_v31 = vpop.f32.mrf.mxu0  ;;  %v5300_v50 = vpop.f32.mrf.mxu1 }
 0x1d8   : > { %7284 = vst [vmem:[#allocation102_spill] sm:$0xff] %v5300_v50 }
 0x1d9   : > { %v5302_v22 = vpop.f32.mrf.mxu0  ;;  %v5304_v56 = vpop.f32.mrf.mxu1  ;;  %3694 = vmatmul.mubr.f32.gmra.mxu0 %v5038_v9 }
 0x1da   : > { %7285 = vst [vmem:[#allocation103_spill] sm:$0xff] %v5302_v22  ;;  %3696 = vmatprep.mubr.f32.mxu0 %v5053_v16 }
 0x1db   : > { %v5308_v59 = vpop.f32.mrf.mxu0  ;;  %v5310_v28 = vpop.f32.mrf.mxu1 }
 0x1dc   : > { %7286 = vst [vmem:[#allocation104_spill] sm:$0xff] %v5310_v28 }
 0x1dd   : > { %v5312_v15 = vpop.f32.mrf.mxu0  ;;  %v5314_v61 = vpop.f32.mrf.mxu1  ;;  %3697 = vmatmul.mubr.f32.gmra.mxu0 %v5068_v21 }
 0x1de   : > { %7287 = vst [vmem:[#allocation105_spill] sm:$0xff] %v5312_v15  ;;  %3699 = vmatprep.mubr.f32.mxu0 %v5083_v29 }
 0x1df   : > { %v5318_v0 = vpop.f32.mrf.mxu0  ;;  %v5320_v22 = vpop.f32.mrf.mxu1 }
 0x1e0   : > { %7288 = vst [vmem:[#allocation106_spill] sm:$0xff] %v5320_v22 }
 0x1e1   : > { %v5322_v8 = vpop.f32.mrf.mxu0  ;;  %v5324_v9 = vpop.f32.mrf.mxu1  ;;  %3700 = vmatmul.mubr.f32.gmra.mxu0 %v5098_v49 }
 0x1e2   : > { %7289 = vst [vmem:[#allocation107_spill] sm:$0xff] %v5322_v8  ;;  %3702 = vmatprep.mubr.f32.mxu0 %v5113_v63 }
 0x1e3   : > { %v5328_v16 = vpop.f32.mrf.mxu0  ;;  %v5330_v15 = vpop.f32.mrf.mxu1 }
 0x1e4   : > { %7290 = vst [vmem:[#allocation108_spill] sm:$0xff] %v5330_v15 }
 0x1e5   : > { %v5332_v34 = vpop.f32.mrf.mxu0  ;;  %v5334_v21 = vpop.f32.mrf.mxu1  ;;  %3703 = vmatmul.mubr.f32.gmra.mxu0 %v5128_v54 }
 0x1e6   : > { %7291 = vst [vmem:[#allocation109_spill] sm:$0xff] %v5332_v34 }
 0x1e7   : > { %v5337_v29 = vpop.f32.mrf.mxu0  ;;  %v5339_v6 = vpop.f32.mrf.mxu1 }
 0x1e8   : > { %7292 = vst [vmem:[#allocation110_spill] sm:$0xff] %v5339_v6 }
 0x1e9   : > { %v1171_v8 = vpop.f32.mrf.mxu0  ;;  %v1504_v51 = vpop.f32.mrf.mxu1 }
 0x1ea   : > { %v5342_v49 = vadd.f32 %v1504_v51, %v4919_v52 }
 0x1eb   : > { %v1172_v63 = vpop.f32.mrf.mxu0  ;;  %v1506_v28 = vpop.f32.mrf.mxu1 }
 0x1ec   : > { %7293 = vst [vmem:[#allocation111_spill] sm:$0xff] %v5342_v49  ;;  %v2136_v30 = vadd.f32 %v1506_v28, %v4921_v53 }
 0x1ed   : > { %v1175_v22 = vpop.f32.mrf.mxu0  ;;  %v1510_v45 = vpop.f32.mrf.mxu1 }
 0x1ee   : > { %v5345_v50 = vadd.f32 %v1510_v45, %v4935_v60 }
 0x1ef   : > { %v1176_v34 = vpop.f32.mrf.mxu0  ;;  %v1512_v38 = vpop.f32.mrf.mxu1 }
 0x1f0   : > { %7294 = vst [vmem:[#allocation112_spill] sm:$0xff] %v5345_v50  ;;  %v2137_v60 = vadd.f32 %v1512_v38, %v4937_v62 }
 0x1f1   : > { %v1179_v35 = vpop.f32.mrf.mxu0  ;;  %v1516_v54 = vpop.f32.mrf.mxu1 }
 0x1f2   : > { %v5349_v37 = vadd.f32 %v1179_v35, %v4910_v48  ;;  %v5352_v8 = vadd.f32 %v1516_v54, %v4950_v14 }
 0x1f3   : > { %v1181_v52 = vpop.f32.mrf.mxu0  ;;  %v1518_v51 = vpop.f32.mrf.mxu1 }
 0x1f4   : > { %7295 = vst [vmem:[#allocation113_spill] sm:$0xff] %v5349_v37  ;;  %7296 = vst [vmem:[#allocation114_spill] sm:$0xff] %v5352_v8  ;;  %v5354_v63 = vadd.f32 %v2136_v30, %v1181_v52  ;;  %v2138_v54 = vadd.f32 %v1518_v51, %v4952_v19  ;;  %v7299_v30 = vld [vmem:[#allocation36_spill] sm:$0xff]  ;;  %v7301_v37 = vld [vmem:[#allocation42_spill] sm:$0xff] }
 0x1f5   : > { %v1185_v22 = vpop.f32.mrf.mxu0  ;;  %v1522_v49 = vpop.f32.mrf.mxu1 }
 0x1f6   : > { %v5358_v34 = vadd.f32 %v1185_v22, %v4926_v57  ;;  %v5361_v45 = vadd.f32 %v1522_v49, %v4965_v36  ;;  %v7303_v22 = vld [vmem:[#allocation39_spill] sm:$0xff] }
 0x1f7   : > { %v1187_v53 = vpop.f32.mrf.mxu0  ;;  %v1524_v48 = vpop.f32.mrf.mxu1 }
 0x1f8   : > { %7297 = vst [vmem:[#allocation115_spill] sm:$0xff] %v5358_v34  ;;  %7298 = vst [vmem:[#allocation116_spill] sm:$0xff] %v5361_v45  ;;  %v5363_v28 = vadd.f32 %v2137_v60, %v1187_v53  ;;  %v2139_v34 = vadd.f32 %v1524_v48, %v7303_v22  ;;  %v7304_v60 = vld [vmem:[#allocation38_spill] sm:$0xff] }
 0x1f9   : > { %v1191_v14 = vpop.f32.mrf.mxu0  ;;  %v1528_v35 = vpop.f32.mrf.mxu1  ;;  %v7306_v45 = vld [vmem:[#allocation46_spill] sm:$0xff] }
 0x1fa   : > { %v5367_v52 = vadd.f32 %v1191_v14, %v7299_v30  ;;  %v5370_v8 = vadd.f32 %v1528_v35, %v7301_v37  ;;  %v7308_v30 = vld [vmem:[#allocation43_spill] sm:$0xff] }
 0x1fb   : > { %v1193_v62 = vpop.f32.mrf.mxu0  ;;  %v1530_v57 = vpop.f32.mrf.mxu1 }
 0x1fc   : > { %7300 = vst [vmem:[#allocation36_spill] sm:$0xff] %v5367_v52  ;;  %7302 = vst [vmem:[#allocation42_spill] sm:$0xff] %v5370_v8  ;;  %v5372_v38 = vadd.f32 %v2138_v54, %v1193_v62  ;;  %v2140_v52 = vadd.f32 %v1530_v57, %v7308_v30  ;;  %v7309_v54 = vld [vmem:[#allocation41_spill] sm:$0xff]  ;;  %v7311_v8 = vld [vmem:[#allocation50_spill] sm:$0xff] }
 0x1fd   : > { %v1197_v36 = vpop.f32.mrf.mxu0  ;;  %v1534_v49 = vpop.f32.mrf.mxu1 }
 0x1fe   : > { %v5376_v53 = vadd.f32 %v1197_v36, %v7304_v60  ;;  %v5379_v50 = vadd.f32 %v1534_v49, %v7306_v45  ;;  %v7313_v60 = vld [vmem:[#allocation47_spill] sm:$0xff] }
 0x1ff   : > { %v1199_v19 = vpop.f32.mrf.mxu0  ;;  %v1536_v51 = vpop.f32.mrf.mxu1 }
 0x200   : > { %7305 = vst [vmem:[#allocation39_spill] sm:$0xff] %v5376_v53  ;;  %7307 = vst [vmem:[#allocation38_spill] sm:$0xff] %v5379_v50  ;;  %v5381_v14 = vadd.f32 %v2139_v34, %v1199_v19  ;;  %v2141_v53 = vadd.f32 %v1536_v51, %v7313_v60  ;;  %v7314_v34 = vld [vmem:[#allocation45_spill] sm:$0xff]  ;;  %v7316_v50 = vld [vmem:[#allocation54_spill] sm:$0xff] }
 0x201   : > { %v1203_v37 = vpop.f32.mrf.mxu0  ;;  %v1540_v35 = vpop.f32.mrf.mxu1 }
 0x202   : > { %v5385_v62 = vadd.f32 %v1203_v37, %v7309_v54  ;;  %v5388_v17 = vadd.f32 %v1540_v35, %v7311_v8  ;;  %v7318_v54 = vld [vmem:[#allocation51_spill] sm:$0xff] }
 0x203   : > { %v1205_v48 = vpop.f32.mrf.mxu0  ;;  %v1542_v36 = vpop.f32.mrf.mxu1 }
 0x204   : > { %7310 = vst [vmem:[#allocation46_spill] sm:$0xff] %v5385_v62  ;;  %7312 = vst [vmem:[#allocation43_spill] sm:$0xff] %v5388_v17  ;;  %v5390_v22 = vadd.f32 %v2140_v52, %v1205_v48  ;;  %v2142_v62 = vadd.f32 %v1542_v36, %v7318_v54  ;;  %v7319_v52 = vld [vmem:[#allocation49_spill] sm:$0xff]  ;;  %v7321_v17 = vld [vmem:[#allocation58_spill] sm:$0xff] }
 0x205   : > { %v1209_v45 = vpop.f32.mrf.mxu0  ;;  %v1546_v49 = vpop.f32.mrf.mxu1 }
 0x206   : > { %v5394_v19 = vadd.f32 %v1209_v45, %v7314_v34  ;;  %v5397_v23 = vadd.f32 %v1546_v49, %v7316_v50  ;;  %v7323_v34 = vld [vmem:[#allocation55_spill] sm:$0xff] }
 0x207   : > { %v1211_v57 = vpop.f32.mrf.mxu0  ;;  %v1548_v37 = vpop.f32.mrf.mxu1 }
 0x208   : > { %7315 = vst [vmem:[#allocation41_spill] sm:$0xff] %v5394_v19  ;;  %7317 = vst [vmem:[#allocation50_spill] sm:$0xff] %v5397_v23  ;;  %v5399_v30 = vadd.f32 %v2141_v53, %v1211_v57  ;;  %v2143_v19 = vadd.f32 %v1548_v37, %v7323_v34  ;;  %v7324_v53 = vld [vmem:[#allocation53_spill] sm:$0xff]  ;;  %v7326_v23 = vld [vmem:[#allocation62_spill] sm:$0xff] }
 0x209   : > { %v1215_v8 = vpop.f32.mrf.mxu0  ;;  %v1552_v35 = vpop.f32.mrf.mxu1 }
 0x20a   : > { %v5403_v48 = vadd.f32 %v1215_v8, %v7319_v52  ;;  %v5406_v4 = vadd.f32 %v1552_v35, %v7321_v17  ;;  %v7328_v52 = vld [vmem:[#allocation59_spill] sm:$0xff] }
 0x20b   : > { %v1217_v51 = vpop.f32.mrf.mxu0  ;;  %v1554_v45 = vpop.f32.mrf.mxu1 }
 0x20c   : > { %7320 = vst [vmem:[#allocation47_spill] sm:$0xff] %v5403_v48  ;;  %7322 = vst [vmem:[#allocation45_spill] sm:$0xff] %v5406_v4  ;;  %v5408_v60 = vadd.f32 %v2142_v62, %v1217_v51  ;;  %v2144_v48 = vadd.f32 %v1554_v45, %v7328_v52  ;;  %v7329_v62 = vld [vmem:[#allocation57_spill] sm:$0xff]  ;;  %v7331_v4 = vld [vmem:[#allocation66_spill] sm:$0xff] }
 0x20d   : > { %v1221_v50 = vpop.f32.mrf.mxu0  ;;  %v1558_v49 = vpop.f32.mrf.mxu1 }
 0x20e   : > { %v5412_v57 = vadd.f32 %v1221_v50, %v7324_v53  ;;  %v5415_v10 = vadd.f32 %v1558_v49, %v7326_v23  ;;  %v7334_v53 = vld [vmem:[#allocation63_spill] sm:$0xff] }
 0x20f   : > { %v1223_v36 = vpop.f32.mrf.mxu0  ;;  %v1560_v8 = vpop.f32.mrf.mxu1 }
 0x210   : > { %7325 = vst [vmem:[#allocation54_spill] sm:$0xff] %v5412_v57  ;;  %7327 = vst [vmem:[#allocation51_spill] sm:$0xff] %v5415_v10  ;;  %v5417_v54 = vadd.f32 %v2143_v19, %v1223_v36  ;;  %v2145_v57 = vadd.f32 %v1560_v8, %v7334_v53  ;;  %v7335_v19 = vld [vmem:[#allocation61_spill] sm:$0xff]  ;;  %v7337_v10 = vld [vmem:[#allocation27_spill] sm:$0xff] }
 0x211   : > { %v1227_v17 = vpop.f32.mrf.mxu0  ;;  %v1564_v35 = vpop.f32.mrf.mxu1 }
 0x212   : > { %v5421_v51 = vadd.f32 %v1227_v17, %v7329_v62  ;;  %v5424_v15 = vadd.f32 %v1564_v35, %v7331_v4  ;;  %v7340_v62 = vld [vmem:[#allocation67_spill] sm:$0xff] }
 0x213   : > { %v1229_v37 = vpop.f32.mrf.mxu0  ;;  %v1566_v50 = vpop.f32.mrf.mxu1 }
 0x214   : > { %7330 = vst [vmem:[#allocation49_spill] sm:$0xff] %v5421_v51  ;;  %7332 = vst [vmem:[#allocation58_spill] sm:$0xff] %v5424_v15  ;;  %v5426_v34 = vadd.f32 %v2144_v48, %v1229_v37  ;;  %v2146_v51 = vadd.f32 %v1566_v50, %v7340_v62  ;;  %v7341_v48 = vld [vmem:[#allocation65_spill] sm:$0xff]  ;;  %v7343_v15 = vld [vmem:[#allocation28_spill] sm:$0xff] }
 0x215   : > { %v1233_v23 = vpop.f32.mrf.mxu0  ;;  %v1570_v49 = vpop.f32.mrf.mxu1 }
 0x216   : > { %7333 = vst [vmem:[#allocation55_spill] sm:$0xff] %v5426_v34  ;;  %v5430_v36 = vadd.f32 %v1233_v23, %v7335_v19  ;;  %v5433_v6 = vadd.f32 %v1570_v49, %v7337_v10  ;;  %v7346_v19 = vld [vmem:[#allocation70_spill] sm:$0xff] }
 0x217   : > { %v1235_v45 = vpop.f32.mrf.mxu0  ;;  %v1572_v17 = vpop.f32.mrf.mxu1 }
 0x218   : > { %7336 = vst [vmem:[#allocation53_spill] sm:$0xff] %v5430_v36  ;;  %7338 = vst [vmem:[#allocation62_spill] sm:$0xff] %v5433_v6  ;;  %v5435_v52 = vadd.f32 %v2145_v57, %v1235_v45  ;;  %v2147_v36 = vadd.f32 %v1572_v17, %v7346_v19  ;;  %v7347_v57 = vld [vmem:[#allocation69_spill] sm:$0xff] }
 0x219   : > { %v1239_v4 = vpop.f32.mrf.mxu0  ;;  %v1576_v35 = vpop.f32.mrf.mxu1  ;;  %v7349_v6 = vld [vmem:[#allocation29_spill] sm:$0xff] }
 0x21a   : > { %7339 = vst [vmem:[#allocation59_spill] sm:$0xff] %v5435_v52  ;;  %v5439_v37 = vadd.f32 %v1239_v4, %v7341_v48  ;;  %v5442_v34 = vadd.f32 %v1576_v35, %v7343_v15  ;;  %v7351_v48 = vld [vmem:[#allocation73_spill] sm:$0xff] }
 0x21b   : > { %v1241_v8 = vpop.f32.mrf.mxu0  ;;  %v1578_v23 = vpop.f32.mrf.mxu1 }
 0x21c   : > { %7342 = vst [vmem:[#allocation57_spill] sm:$0xff] %v5439_v37  ;;  %7344 = vst [vmem:[#allocation66_spill] sm:$0xff] %v5442_v34  ;;  %v5444_v53 = vadd.f32 %v2146_v51, %v1241_v8  ;;  %v2148_v37 = vadd.f32 %v1578_v23, %v7351_v48  ;;  %v7352_v51 = vld [vmem:[#allocation72_spill] sm:$0xff]  ;;  %v7354_v34 = vld [vmem:[#allocation30_spill] sm:$0xff] }
 0x21d   : > { %v1245_v10 = vpop.f32.mrf.mxu0  ;;  %v1582_v49 = vpop.f32.mrf.mxu1 }
 0x21e   : > { %7345 = vst [vmem:[#allocation63_spill] sm:$0xff] %v5444_v53  ;;  %v5448_v45 = vadd.f32 %v1245_v10, %v7347_v57  ;;  %v5451_v52 = vadd.f32 %v1582_v49, %v7349_v6  ;;  %v7356_v57 = vld [vmem:[#allocation76_spill] sm:$0xff] }
 0x21f   : > { %v1247_v50 = vpop.f32.mrf.mxu0  ;;  %v1584_v4 = vpop.f32.mrf.mxu1 }
 0x220   : > { %7348 = vst [vmem:[#allocation61_spill] sm:$0xff] %v5448_v45  ;;  %7350 = vst [vmem:[#allocation27_spill] sm:$0xff] %v5451_v52  ;;  %v5453_v62 = vadd.f32 %v2147_v36, %v1247_v50  ;;  %v2149_v45 = vadd.f32 %v1584_v4, %v7356_v57  ;;  %v7357_v36 = vld [vmem:[#allocation75_spill] sm:$0xff] }
 0x221   : > { %v1251_v15 = vpop.f32.mrf.mxu0  ;;  %v1588_v35 = vpop.f32.mrf.mxu1 }
 0x222   : > { %v5457_v8 = vadd.f32 %v1251_v15, %v7352_v51  ;;  %v5460_v53 = vadd.f32 %v1588_v35, %v7354_v34  ;;  %v7360_v51 = vld [vmem:[#allocation79_spill] sm:$0xff] }
 0x223   : > { %v1253_v17 = vpop.f32.mrf.mxu0  ;;  %v1590_v10 = vpop.f32.mrf.mxu1 }
 0x224   : > { %7353 = vst [vmem:[#allocation67_spill] sm:$0xff] %v5457_v8  ;;  %7355 = vst [vmem:[#allocation65_spill] sm:$0xff] %v5460_v53  ;;  %v5462_v19 = vadd.f32 %v2148_v37, %v1253_v17  ;;  %v2150_v8 = vadd.f32 %v1590_v10, %v7360_v51  ;;  %v7361_v37 = vld [vmem:[#allocation78_spill] sm:$0xff] }
 0x225   : > { %v1257_v6 = vpop.f32.mrf.mxu0  ;;  %v1594_v49 = vpop.f32.mrf.mxu1 }
 0x226   : > { %v5466_v50 = vadd.f32 %v1257_v6, %v7357_v36  ;;  %v5469_v52 = vadd.f32 %v1594_v49, %v5143_v24  ;;  %v7364_v36 = vld [vmem:[#allocation31_spill] sm:$0xff] }
 0x227   : > { %v1259_v23 = vpop.f32.mrf.mxu0  ;;  %v1596_v15 = vpop.f32.mrf.mxu1 }
 0x228   : > { %7358 = vst [vmem:[#allocation28_spill] sm:$0xff] %v5466_v50  ;;  %7359 = vst [vmem:[#allocation70_spill] sm:$0xff] %v5469_v52  ;;  %v5471_v48 = vadd.f32 %v2149_v45, %v1259_v23  ;;  %v2151_v50 = vadd.f32 %v1596_v15, %v7364_v36  ;;  %v7365_v45 = vld [vmem:[#allocation81_spill] sm:$0xff] }
 0x229   : > { %v1263_v34 = vpop.f32.mrf.mxu0  ;;  %v1600_v35 = vpop.f32.mrf.mxu1 }
 0x22a   : > { %v5475_v17 = vadd.f32 %v1263_v34, %v7361_v37  ;;  %v5478_v53 = vadd.f32 %v1600_v35, %v5155_v55 }
 0x22b   : > { %v1265_v4 = vpop.f32.mrf.mxu0  ;;  %v1602_v6 = vpop.f32.mrf.mxu1 }
 0x22c   : > { %7362 = vst [vmem:[#allocation69_spill] sm:$0xff] %v5475_v17  ;;  %7363 = vst [vmem:[#allocation29_spill] sm:$0xff] %v5478_v53  ;;  %v5480_v57 = vadd.f32 %v2150_v8, %v1265_v4  ;;  %v2152_v37 = vadd.f32 %v1602_v6, %v5157_v2 }
 0x22d   : > { %v1269_v24 = vpop.f32.mrf.mxu0  ;;  %v1606_v49 = vpop.f32.mrf.mxu1 }
 0x22e   : > { %v5484_v23 = vadd.f32 %v1269_v24, %v7365_v45  ;;  %v5487_v52 = vadd.f32 %v1606_v49, %v5171_v46 }
 0x22f   : > { %v1271_v10 = vpop.f32.mrf.mxu0  ;;  %v1608_v34 = vpop.f32.mrf.mxu1 }
 0x230   : > { %7366 = vst [vmem:[#allocation73_spill] sm:$0xff] %v5484_v23  ;;  %7367 = vst [vmem:[#allocation72_spill] sm:$0xff] %v5487_v52  ;;  %v5489_v51 = vadd.f32 %v2151_v50, %v1271_v10  ;;  %v2153_v50 = vadd.f32 %v1608_v34, %v5173_v1 }
 0x231   : > { %v1275_v55 = vpop.f32.mrf.mxu0  ;;  %v1612_v35 = vpop.f32.mrf.mxu1 }
 0x232   : > { %v5493_v8 = vadd.f32 %v1275_v55, %v5149_v26  ;;  %v5496_v4 = vadd.f32 %v1612_v35, %v5185_v41 }
 0x233   : > { %v1277_v15 = vpop.f32.mrf.mxu0  ;;  %v5498_v24 = vpop.f32.mrf.mxu1 }
 0x234   : > { %7368 = vst [vmem:[#allocation30_spill] sm:$0xff] %v5493_v8  ;;  %7369 = vst [vmem:[#allocation76_spill] sm:$0xff] %v5496_v4  ;;  %v5500_v36 = vadd.f32 %v2152_v37, %v1277_v15 }
 0x235   : > { %v1281_v46 = vpop.f32.mrf.mxu0  ;;  %v1618_v49 = vpop.f32.mrf.mxu1 }
 0x236   : > { %v5504_v45 = vadd.f32 %v1281_v46, %v5166_v47  ;;  %v5507_v2 = vadd.f32 %v1618_v49, %v5199_v5 }
 0x237   : > { %v1283_v26 = vpop.f32.mrf.mxu0  ;;  %v5509_v6 = vpop.f32.mrf.mxu1 }
 0x238   : > { %7370 = vst [vmem:[#allocation75_spill] sm:$0xff] %v5504_v45  ;;  %7371 = vst [vmem:[#allocation79_spill] sm:$0xff] %v5507_v2  ;;  %v5511_v41 = vadd.f32 %v2153_v50, %v1283_v26 }
 0x239   : > { %v1287_v10 = vpop.f32.mrf.mxu0  ;;  %v1624_v55 = vpop.f32.mrf.mxu1 }
 0x23a   : > { %v5514_v35 = vadd.f32 %v1287_v10, %v5179_v44  ;;  %v5517_v37 = vadd.f32 %v1624_v55, %v5213_v12 }
 0x23b   : > { %v5519_v1 = vpop.f32.mrf.mxu0  ;;  %v5521_v47 = vpop.f32.mrf.mxu1 }
 0x23c   : > { %7372 = vst [vmem:[#allocation78_spill] sm:$0xff] %v5514_v35  ;;  %7373 = vst [vmem:[#allocation31_spill] sm:$0xff] %v5517_v37 }
 0x23d   : > { %v1293_v34 = vpop.f32.mrf.mxu0  ;;  %v1630_v5 = vpop.f32.mrf.mxu1 }
 0x23e   : > { %v5524_v15 = vadd.f32 %v1293_v34, %v5193_v7  ;;  %v5527_v46 = vadd.f32 %v1630_v5, %v5227_v18 }
 0x23f   : > { %v5529_v49 = vpop.f32.mrf.mxu0  ;;  %v5531_v50 = vpop.f32.mrf.mxu1 }
 0x240   : > { %7374 = vst [vmem:[#allocation81_spill] sm:$0xff] %v5524_v15  ;;  %7375 = vst [vmem:[#allocation117_spill] sm:$0xff] %v5527_v46 }
 0x241   : > { %v1299_v44 = vpop.f32.mrf.mxu0  ;;  %v1636_v26 = vpop.f32.mrf.mxu1 }
 0x242   : > { %v5534_v12 = vadd.f32 %v1299_v44, %v5207_v13  ;;  %v5537_v10 = vadd.f32 %v1636_v26, %v5241_v25 }
 0x243   : > { %v5539_v55 = vpop.f32.mrf.mxu0  ;;  %v5541_v35 = vpop.f32.mrf.mxu1 }
 0x244   : > { %7376 = vst [vmem:[#allocation118_spill] sm:$0xff] %v5534_v12  ;;  %7377 = vst [vmem:[#allocation119_spill] sm:$0xff] %v5537_v10 }
 0x245   : > { %v1305_v7 = vpop.f32.mrf.mxu0  ;;  %v1642_v34 = vpop.f32.mrf.mxu1 }
 0x246   : > { %v5544_v18 = vadd.f32 %v1305_v7, %v5221_v20  ;;  %v5547_v5 = vadd.f32 %v1642_v34, %v5255_v32 }
 0x247   : > { %v5549_v15 = vpop.f32.mrf.mxu0  ;;  %v5551_v45 = vpop.f32.mrf.mxu1 }
 0x248   : > { %7378 = vst [vmem:[#allocation120_spill] sm:$0xff] %v5544_v18  ;;  %7379 = vst [vmem:[#allocation121_spill] sm:$0xff] %v5547_v5 }
 0x249   : > { %v1311_v13 = vpop.f32.mrf.mxu0  ;;  %v1648_v44 = vpop.f32.mrf.mxu1 }
 0x24a   : > { %v5554_v25 = vadd.f32 %v1311_v13, %v5235_v27  ;;  %v5557_v26 = vadd.f32 %v1648_v44, %v5268_v43 }
 0x24b   : > { %v5559_v12 = vpop.f32.mrf.mxu0  ;;  %v5561_v8 = vpop.f32.mrf.mxu1 }
 0x24c   : > { %7380 = vst [vmem:[#allocation122_spill] sm:$0xff] %v5554_v25  ;;  %7381 = vst [vmem:[#allocation123_spill] sm:$0xff] %v5557_v26 }
 0x24d   : > { %v1317_v20 = vpop.f32.mrf.mxu0  ;;  %v1654_v7 = vpop.f32.mrf.mxu1 }
 0x24e   : > { %v5564_v32 = vadd.f32 %v1317_v20, %v5249_v33  ;;  %v5567_v34 = vadd.f32 %v1654_v7, %v5278_v42 }
 0x24f   : > { %v5569_v18 = vpop.f32.mrf.mxu0  ;;  %v5571_v5 = vpop.f32.mrf.mxu1 }
 0x250   : > { %7382 = vst [vmem:[#allocation124_spill] sm:$0xff] %v5564_v32  ;;  %7383 = vst [vmem:[#allocation125_spill] sm:$0xff] %v5567_v34 }
 0x251   : > { %v1323_v27 = vpop.f32.mrf.mxu0  ;;  %v1660_v13 = vpop.f32.mrf.mxu1 }
 0x252   : > { %v5574_v43 = vadd.f32 %v1323_v27, %v5264_v39  ;;  %v5577_v44 = vadd.f32 %v1660_v13, %v5288_v58 }
 0x253   : > { %v5579_v25 = vpop.f32.mrf.mxu0  ;;  %v5581_v26 = vpop.f32.mrf.mxu1 }
 0x254   : > { %7384 = vst [vmem:[#allocation126_spill] sm:$0xff] %v5574_v43  ;;  %7385 = vst [vmem:[#allocation127_spill] sm:$0xff] %v5577_v44 }
 0x255   : > { %v1329_v33 = vpop.f32.mrf.mxu0  ;;  %v1666_v20 = vpop.f32.mrf.mxu1 }
 0x256   : > { %v5584_v42 = vadd.f32 %v1329_v33, %v5274_v3  ;;  %v5587_v7 = vadd.f32 %v1666_v20, %v5298_v31 }
 0x257   : > { %v5589_v32 = vpop.f32.mrf.mxu0  ;;  %v5591_v34 = vpop.f32.mrf.mxu1 }
 0x258   : > { %7386 = vst [vmem:[#allocation128_spill] sm:$0xff] %v5584_v42  ;;  %7387 = vst [vmem:[#allocation129_spill] sm:$0xff] %v5587_v7 }
 0x259   : > { %v1335_v39 = vpop.f32.mrf.mxu0  ;;  %v1672_v27 = vpop.f32.mrf.mxu1 }
 0x25a   : > { %v5594_v58 = vadd.f32 %v1335_v39, %v5284_v40  ;;  %v5597_v13 = vadd.f32 %v1672_v27, %v5308_v59 }
 0x25b   : > { %v5599_v43 = vpop.f32.mrf.mxu0  ;;  %v5601_v44 = vpop.f32.mrf.mxu1 }
 0x25c   : > { %7388 = vst [vmem:[#allocation130_spill] sm:$0xff] %v5594_v58  ;;  %7389 = vst [vmem:[#allocation131_spill] sm:$0xff] %v5597_v13 }
 0x25d   : > { %v1341_v3 = vpop.f32.mrf.mxu0  ;;  %v1678_v33 = vpop.f32.mrf.mxu1 }
 0x25e   : > { %v5604_v31 = vadd.f32 %v1341_v3, %v5294_v11  ;;  %v5607_v20 = vadd.f32 %v1678_v33, %v5318_v0 }
 0x25f   : > { %v5609_v42 = vpop.f32.mrf.mxu0  ;;  %v5611_v7 = vpop.f32.mrf.mxu1 }
 0x260   : > { %7390 = vst [vmem:[#allocation132_spill] sm:$0xff] %v5604_v31  ;;  %7391 = vst [vmem:[#allocation133_spill] sm:$0xff] %v5607_v20 }
 0x261   : > { %v1347_v40 = vpop.f32.mrf.mxu0  ;;  %v1684_v39 = vpop.f32.mrf.mxu1 }
 0x262   : > { %v5614_v59 = vadd.f32 %v1347_v40, %v5304_v56  ;;  %v5617_v27 = vadd.f32 %v1684_v39, %v5328_v16 }
 0x263   : > { %v5619_v58 = vpop.f32.mrf.mxu0  ;;  %v1686_v13 = vpop.f32.mrf.mxu1 }
 0x264   : > { %7392 = vst [vmem:[#allocation134_spill] sm:$0xff] %v5614_v59  ;;  %7393 = vst [vmem:[#allocation135_spill] sm:$0xff] %v5617_v27 }
 0x265   : > { %v1353_v11 = vpop.f32.mrf.mxu0  ;;  %v1690_v3 = vpop.f32.mrf.mxu1 }
 0x266   : > { %v5622_v0 = vadd.f32 %v1353_v11, %v5314_v61  ;;  %v5625_v33 = vadd.f32 %v1690_v3, %v5337_v29 }
 0x267   : > { %v5627_v31 = vpop.f32.mrf.mxu0  ;;  %v1692_v20 = vpop.f32.mrf.mxu1 }
 0x268   : > { %7394 = vst [vmem:[#allocation136_spill] sm:$0xff] %v5622_v0  ;;  %7395 = vst [vmem:[#allocation137_spill] sm:$0xff] %v5625_v33  ;;  %v7411_v0 = vld [vmem:[#allocation63_spill] sm:$0xff] }
 0x269   : > { %v3659_v10 = vpop.f32.mrf.mxu0  ;;  %v1986_v56 = vpop.f32.mrf.mxu1 }
 0x26a   : > { %v5630_v40 = vadd.f32 %v1986_v56, %v5324_v9 }
 0x26b   : > { %v1761_v16 = vpop.f32.mrf.mxu0  ;;  %v1988_v39 = vpop.f32.mrf.mxu1 }
 0x26c   : > { %7396 = vst [vmem:[#allocation138_spill] sm:$0xff] %v5630_v40  ;;  %v7408_v40 = vld [vmem:[#allocation55_spill] sm:$0xff] }
 0x26d   : > { %v3662_v59 = vpop.f32.mrf.mxu0 }
 0x26e   : > { %v5633_v27 = vadd.f32 %v3662_v59, %v5363_v28  ;;  %v1992_v23 = vpop.f32.mrf.mxu1 }
 0x26f   : > { %v5636_v61 = vadd.f32 %v1992_v23, %v5334_v21  ;;  %v1769_v29 = vpop.f32.mrf.mxu0 }
 0x270   : > { %7397 = vst [vmem:[#allocation139_spill] sm:$0xff] %v5633_v27  ;;  %v5639_v11 = vadd.f32 %v5354_v63, %v1769_v29  ;;  %v1994_v33 = vpop.f32.mrf.mxu1 }
 0x271   : > { %7398 = vst [vmem:[#allocation140_spill] sm:$0xff] %v5636_v61  ;;  %v3665_v3 = vpop.f32.mrf.mxu0  ;;  %v7406_v61 = vld [vmem:[#allocation59_spill] sm:$0xff] }
 0x272   : > { %7399 = vst [vmem:[#allocation141_spill] sm:$0xff] %v5639_v11  ;;  %v5642_v10 = vadd.f32 %v3665_v3, %v5381_v14 }
 0x273   : > { %v1779_v9 = vpop.f32.mrf.mxu0 }
 0x274   : > { %7400 = vst [vmem:[#allocation142_spill] sm:$0xff] %v5642_v10  ;;  %v5645_v56 = vadd.f32 %v5372_v38, %v1779_v9 }
 0x275   : > { %v3668_v16 = vpop.f32.mrf.mxu0 }
 0x276   : > { %7401 = vst [vmem:[#allocation143_spill] sm:$0xff] %v5645_v56  ;;  %v5648_v28 = vadd.f32 %v3668_v16, %v5399_v30 }
 0x277   : > { %v1789_v59 = vpop.f32.mrf.mxu0 }
 0x278   : > { %7402 = vst [vmem:[#allocation144_spill] sm:$0xff] %v5648_v28  ;;  %v5651_v21 = vadd.f32 %v5390_v22, %v1789_v59 }
 0x279   : > { %v3671_v23 = vpop.f32.mrf.mxu0 }
 0x27a   : > { %7403 = vst [vmem:[#allocation145_spill] sm:$0xff] %v5651_v21  ;;  %v5654_v63 = vadd.f32 %v3671_v23, %v5417_v54 }
 0x27b   : > { %v1799_v29 = vpop.f32.mrf.mxu0 }
 0x27c   : > { %7404 = vst [vmem:[#allocation146_spill] sm:$0xff] %v5654_v63  ;;  %v5657_v14 = vadd.f32 %v5408_v60, %v1799_v29  ;;  %v7414_v29 = vld [vmem:[#allocation110_spill] sm:$0xff] }
 0x27d   : > { %v3674_v3 = vpop.f32.mrf.mxu0 }
 0x27e   : > { %7405 = vst [vmem:[#allocation147_spill] sm:$0xff] %v5657_v14  ;;  %v5660_v38 = vadd.f32 %v3674_v3, %v7406_v61  ;;  %v2229_v61 = vadd.f32 %v1692_v20, %v7414_v29  ;;  %v7421_v29 = vld [vmem:[#allocation86_spill] sm:$0xff] }
 0x27f   : > { %v1809_v9 = vpop.f32.mrf.mxu0 }
 0x280   : > { %7407 = vst [vmem:[#allocation59_spill] sm:$0xff] %v5660_v38  ;;  %v5663_v30 = vadd.f32 %v7408_v40, %v1809_v9  ;;  %v7416_v40 = vld [vmem:[#allocation108_spill] sm:$0xff] }
 0x281   : > { %v3677_v16 = vpop.f32.mrf.mxu0  ;;  %v2228_v9 = vadd.f32 %v1686_v13, %v7416_v40  ;;  %v2155_v13 = vadd.f32 %v5509_v6, %v7421_v29  ;;  %v7425_v40 = vld [vmem:[#allocation90_spill] sm:$0xff] }
 0x282   : > { %7409 = vst [vmem:[#allocation55_spill] sm:$0xff] %v5663_v30  ;;  %v5666_v22 = vadd.f32 %v3677_v16, %v5453_v62  ;;  %v2231_v30 = vadd.f32 %v2229_v61, %v1994_v33 }
 0x283   : > { %v1819_v59 = vpop.f32.mrf.mxu0 }
 0x284   : > { %7410 = vst [vmem:[#allocation148_spill] sm:$0xff] %v5666_v22  ;;  %v5669_v54 = vadd.f32 %v7411_v0, %v1819_v59  ;;  %v2230_v0 = vadd.f32 %v2228_v9, %v1988_v39  ;;  %v2157_v9 = vadd.f32 %v5531_v50, %v7425_v40  ;;  %v7431_v50 = vld [vmem:[#allocation92_spill] sm:$0xff] }
 0x285   : > { %v3680_v23 = vpop.f32.mrf.mxu0 }
 0x286   : > { %7412 = vst [vmem:[#allocation63_spill] sm:$0xff] %v5669_v54  ;;  %v5672_v60 = vadd.f32 %v3680_v23, %v5471_v48 }
 0x287   : > { %v1829_v3 = vpop.f32.mrf.mxu0 }
 0x288   : > { %7413 = vst [vmem:[#allocation149_spill] sm:$0xff] %v5672_v60  ;;  %v5676_v38 = vadd.f32 %v5462_v19, %v1829_v3 }
 0x289   : > { %v3683_v62 = vpop.f32.mrf.mxu0 }
 0x28a   : > { %7415 = vst [vmem:[#allocation110_spill] sm:$0xff] %v5676_v38  ;;  %v3739_v16 = vpop.f32.mrf.mxu1  ;;  %v5680_v22 = vadd.f32 %v3683_v62, %v5489_v51  ;;  %v7423_v51 = vld [vmem:[#allocation84_spill] sm:$0xff] }
 0x28b   : > { %v5682_v59 = vadd.f32 %v3739_v16, %v2231_v30  ;;  %v1839_v54 = vpop.f32.mrf.mxu0  ;;  %v2154_v39 = vadd.f32 %v5498_v24, %v7423_v51  ;;  %v2185_v30 = vadd.f32 %v2155_v13, %v5529_v49  ;;  %v2158_v13 = vadd.f32 %v5541_v35, %v7431_v50 }
 0x28c   : > { %7417 = vst [vmem:[#allocation108_spill] sm:$0xff] %v5680_v22  ;;  %v2065_v48 = vpop.f32.mrf.mxu1  ;;  %v5685_v23 = vadd.f32 %v5480_v57, %v1839_v54 }
 0x28d   : > { %7418 = vst [vmem:[#allocation150_spill] sm:$0xff] %v5682_v59  ;;  %v5687_v20 = vadd.f32 %v2230_v0, %v2065_v48  ;;  %v3686_v19 = vpop.f32.mrf.mxu0  ;;  %v2184_v54 = vadd.f32 %v2154_v39, %v5519_v1  ;;  %v2187_v0 = vadd.f32 %v2157_v9, %v5549_v15  ;;  %v7429_v48 = vld [vmem:[#allocation94_spill] sm:$0xff]  ;;  %v2188_v15 = vadd.f32 %v2158_v13, %v5559_v12 }
 0x28e   : > { %7419 = vst [vmem:[#allocation151_spill] sm:$0xff] %v5685_v23  ;;  %v5692_v33 = vadd.f32 %v3686_v19, %v5511_v41  ;;  %v7427_v41 = vld [vmem:[#allocation88_spill] sm:$0xff]  ;;  %v2159_v19 = vadd.f32 %v5551_v45, %v7429_v48  ;;  %v7433_v39 = vld [vmem:[#allocation98_spill] sm:$0xff] }
 0x28f   : > { %7420 = vst [vmem:[#allocation152_spill] sm:$0xff] %v5687_v20  ;;  %v1849_v61 = vpop.f32.mrf.mxu0  ;;  %v2156_v16 = vadd.f32 %v5521_v47, %v7427_v41  ;;  %v7435_v45 = vld [vmem:[#allocation96_spill] sm:$0xff]  ;;  %v7441_v48 = vld [vmem:[#allocation106_spill] sm:$0xff] }
 0x290   : > { %7422 = vst [vmem:[#allocation86_spill] sm:$0xff] %v5692_v33  ;;  %v5698_v3 = vadd.f32 %v5500_v36, %v1849_v61  ;;  %v2189_v61 = vadd.f32 %v2159_v19, %v5569_v18  ;;  %v2165_v19 = vadd.f32 %v5611_v7, %v7441_v48 }
 0x291   : > { %v3689_v57 = vpop.f32.mrf.mxu0  ;;  %v2186_v36 = vadd.f32 %v2156_v16, %v5539_v55 }
 0x292   : > { %7424 = vst [vmem:[#allocation84_spill] sm:$0xff] %v5698_v3  ;;  %v5703_v62 = vadd.f32 %v3689_v57, %v2185_v30  ;;  %v2161_v30 = vadd.f32 %v5571_v5, %v7433_v39  ;;  %v7439_v5 = vld [vmem:[#allocation100_spill] sm:$0xff]  ;;  %v2195_v13 = vadd.f32 %v2165_v19, %v5627_v31 }
 0x293   : > { %v1859_v6 = vpop.f32.mrf.mxu0 }
 0x294   : > { %7426 = vst [vmem:[#allocation90_spill] sm:$0xff] %v5703_v62  ;;  %v5708_v24 = vadd.f32 %v2184_v54, %v1859_v6  ;;  %v2160_v54 = vadd.f32 %v5561_v8, %v7435_v45  ;;  %v2191_v40 = vadd.f32 %v2161_v30, %v5589_v32  ;;  %v7437_v6 = vld [vmem:[#allocation102_spill] sm:$0xff] }
 0x295   : > { %v3692_v49 = vpop.f32.mrf.mxu0  ;;  %v2163_v41 = vadd.f32 %v5591_v34, %v7437_v6  ;;  %v7443_v34 = vld [vmem:[#allocation104_spill] sm:$0xff] }
 0x296   : > { %7428 = vst [vmem:[#allocation88_spill] sm:$0xff] %v5708_v24  ;;  %v5713_v1 = vadd.f32 %v3692_v49, %v2187_v0  ;;  %v2190_v18 = vadd.f32 %v2160_v54, %v5579_v25  ;;  %v2162_v0 = vadd.f32 %v5581_v26, %v7439_v5  ;;  %v2164_v50 = vadd.f32 %v5601_v44, %v7443_v34 }
 0x297   : > { %v1869_v29 = vpop.f32.mrf.mxu0  ;;  %v2193_v49 = vadd.f32 %v2163_v41, %v5609_v42 }
 0x298   : > { %7430 = vst [vmem:[#allocation94_spill] sm:$0xff] %v5713_v1  ;;  %v5718_v51 = vadd.f32 %v2186_v36, %v1869_v29  ;;  %v2192_v32 = vadd.f32 %v2162_v0, %v5599_v43  ;;  %v2194_v42 = vadd.f32 %v2164_v50, %v5619_v58 }
 0x299   : > { %v3695_v47 = vpop.f32.mrf.mxu0 }
 0x29a   : > { %7432 = vst [vmem:[#allocation92_spill] sm:$0xff] %v5718_v51  ;;  %v5723_v55 = vadd.f32 %v3695_v47, %v2189_v61 }
 0x29b   : > { %v1879_v57 = vpop.f32.mrf.mxu0 }
 0x29c   : > { %7434 = vst [vmem:[#allocation98_spill] sm:$0xff] %v5723_v55  ;;  %v5728_v9 = vadd.f32 %v2188_v15, %v1879_v57 }
 0x29d   : > { %v3698_v35 = vpop.f32.mrf.mxu0 }
 0x29e   : > { %7436 = vst [vmem:[#allocation96_spill] sm:$0xff] %v5728_v9  ;;  %v5733_v12 = vadd.f32 %v3698_v35, %v2191_v40 }
 0x29f   : > { %v1889_v16 = vpop.f32.mrf.mxu0 }
 0x2a0   : > { %7438 = vst [vmem:[#allocation102_spill] sm:$0xff] %v5733_v12  ;;  %v5738_v36 = vadd.f32 %v2190_v18, %v1889_v16 }
 0x2a1   : > { %v3701_v8 = vpop.f32.mrf.mxu0 }
 0x2a2   : > { %7440 = vst [vmem:[#allocation100_spill] sm:$0xff] %v5738_v36  ;;  %v5743_v25 = vadd.f32 %v3701_v8, %v2193_v49 }
 0x2a3   : > { %v1899_v29 = vpop.f32.mrf.mxu0 }
 0x2a4   : > { %7442 = vst [vmem:[#allocation106_spill] sm:$0xff] %v5743_v25  ;;  %v5748_v61 = vadd.f32 %v2192_v32, %v1899_v29 }
 0x2a5   : > { %v3704_v26 = vpop.f32.mrf.mxu0 }
 0x2a6   : > { %7444 = vst [vmem:[#allocation104_spill] sm:$0xff] %v5748_v61  ;;  %v5751_v47 = vadd.f32 %v3704_v26, %v2195_v13  ;;  %2236 = sbr.rel (%p3454_p3) target bundleno = 842 (0x34a), region = 68 }
 0x2a7   : > { %v1909_v15 = vpop.f32.mrf.mxu0 }
 0x2a8   : > { %7445 = vst [vmem:[#allocation153_spill] sm:$0xff] %v5751_v47  ;;  %v5753_v43 = vadd.f32 %v2194_v42, %v1909_v15 }
 0x2aa   : > { %7446 = vst [vmem:[#allocation154_spill] sm:$0xff] %v5753_v43 }
 0x2ab   : > { %v7447_v7 = vld [vmem:[#allocation33_spill] sm:$0xff]  ;;  %v7448_v39 = vld [vmem:[#allocation34_spill] sm:$0xff]  ;;  %v7449_v57 = vld [vmem:[#allocation35_spill] sm:$0xff] }
 0x2ac   : > { %v2239_v30 = vadd.f32 %v7448_v39, %v7447_v7  ;;  %v7450_v45 = vld [vmem:[#allocation37_spill] sm:$0xff]  ;;  %v2277_v54 = vmul.f32 %v7447_v7, %v7447_v7  ;;  %v2278_v58 = vmul.f32 %v7448_v39, %v7448_v39  ;;  %v7451_v40 = vld [vmem:[#allocation40_spill] sm:$0xff]  ;;  %v2279_v18 = vmul.f32 %v7449_v57, %v7449_v57  ;;  %v7453_v0 = vld [vmem:[#allocation111_spill] sm:$0xff] }
 0x2ad   : > { %v7452_v6 = vld [vmem:[#allocation44_spill] sm:$0xff]  ;;  %v2280_v16 = vmul.f32 %v7450_v45, %v7450_v45  ;;  %v2281_v19 = vmul.f32 %v7451_v40, %v7451_v40  ;;  %v7456_v34 = vld [vmem:[#allocation114_spill] sm:$0xff]  ;;  %v7473_v25 = vld [vmem:[#allocation51_spill] sm:$0xff] }
 0x2ae   : > { %v2240_v44 = vadd.f32 %v2239_v30, %v7449_v57  ;;  %v2309_v5 = vadd.f32 %v2278_v58, %v2277_v54  ;;  %v7454_v49 = vld [vmem:[#allocation112_spill] sm:$0xff]  ;;  %v2282_v42 = vmul.f32 %v7452_v6, %v7452_v6  ;;  %v7471_v43 = vld [vmem:[#allocation74_spill] sm:$0xff]  ;;  %v7475_v61 = vld [vmem:[#allocation39_spill] sm:$0xff] }
 0x2af   : > { %v2347_v8 = vadd.f32 %v7454_v49, %v7453_v0  ;;  %v7455_v32 = vld [vmem:[#allocation48_spill] sm:$0xff]  ;;  %v7476_v12 = vld [vmem:[#allocation58_spill] sm:$0xff] }
 0x2b0   : > { %v2241_v31 = vadd.f32 %v2240_v44, %v7450_v45  ;;  %v2310_v29 = vadd.f32 %v2309_v5, %v2279_v18  ;;  %v7457_v13 = vld [vmem:[#allocation52_spill] sm:$0xff]  ;;  %v2283_v44 = vmul.f32 %v7455_v32, %v7455_v32 }
 0x2b1   : > { %v2348_v50 = vadd.f32 %v2347_v8, %v7456_v34  ;;  %v7458_v7 = vld [vmem:[#allocation116_spill] sm:$0xff]  ;;  %v2385_v8 = vmul.f32 %v7453_v0, %v7453_v0 }
 0x2b2   : > { %v2242_v35 = vadd.f32 %v2241_v31, %v7451_v40  ;;  %v2311_v15 = vadd.f32 %v2310_v29, %v2280_v16  ;;  %v7459_v30 = vld [vmem:[#allocation56_spill] sm:$0xff]  ;;  %v7460_v31 = vld [vmem:[#allocation42_spill] sm:$0xff]  ;;  %v7464_v29 = vld [vmem:[#allocation43_spill] sm:$0xff] }
 0x2b3   : > { %v2349_v39 = vadd.f32 %v2348_v50, %v7458_v7  ;;  %v7461_v58 = vld [vmem:[#allocation60_spill] sm:$0xff] }
 0x2b4   : > { %v2243_v41 = vadd.f32 %v2242_v35, %v7452_v6  ;;  %v2312_v45 = vadd.f32 %v2311_v15, %v2281_v19  ;;  %v2284_v35 = vmul.f32 %v7457_v13, %v7457_v13  ;;  %v7463_v6 = vld [vmem:[#allocation64_spill] sm:$0xff] }
 0x2b5   : > { %v2350_v54 = vadd.f32 %v2349_v39, %v7460_v31 }
 0x2b6   : > { %v2244_v48 = vadd.f32 %v2243_v41, %v7455_v32  ;;  %v2313_v18 = vadd.f32 %v2312_v45, %v2282_v42  ;;  %v7462_v41 = vld [vmem:[#allocation38_spill] sm:$0xff]  ;;  %v2285_v32 = vmul.f32 %v7459_v30, %v7459_v30  ;;  %v2286_v42 = vmul.f32 %v7461_v58, %v7461_v58  ;;  %v7467_v45 = vld [vmem:[#allocation71_spill] sm:$0xff] }
 0x2b7   : > { %v2351_v5 = vadd.f32 %v2350_v54, %v7462_v41 }
 0x2b8   : > { %v2245_v26 = vadd.f32 %v2244_v48, %v7457_v13  ;;  %v2386_v48 = vmul.f32 %v7454_v49, %v7454_v49  ;;  %v2314_v19 = vadd.f32 %v2313_v18, %v2283_v44  ;;  %v2387_v13 = vmul.f32 %v7456_v34, %v7456_v34  ;;  %v7468_v44 = vld [vmem:[#allocation113_spill] sm:$0xff] }
 0x2b9   : > { %v2352_v50 = vadd.f32 %v2351_v5, %v7464_v29  ;;  %v2388_v49 = vmul.f32 %v7458_v7, %v7458_v7 }
 0x2ba   : > { %v2246_v57 = vadd.f32 %v2245_v26, %v7459_v30  ;;  %v7465_v26 = vld [vmem:[#allocation68_spill] sm:$0xff]  ;;  %v2315_v39 = vadd.f32 %v2314_v19, %v2284_v35  ;;  %v2417_v30 = vadd.f32 %v2386_v48, %v2385_v8  ;;  %v2390_v8 = vmul.f32 %v7462_v41, %v7462_v41  ;;  %v7474_v48 = vld [vmem:[#allocation77_spill] sm:$0xff]  ;;  %v7479_v41 = vld [vmem:[#allocation62_spill] sm:$0xff] }
 0x2bb   : > { %v7472_v19 = vld [vmem:[#allocation36_spill] sm:$0xff] }
 0x2bc   : > { %v2247_v40 = vadd.f32 %v2246_v57, %v7461_v58  ;;  %v7466_v57 = vld [vmem:[#allocation50_spill] sm:$0xff]  ;;  %v2316_v5 = vadd.f32 %v2315_v39, %v2285_v32  ;;  %v2389_v58 = vmul.f32 %v7460_v31, %v7460_v31  ;;  %v2418_v35 = vadd.f32 %v2417_v30, %v2387_v13  ;;  %v7477_v31 = vld [vmem:[#allocation80_spill] sm:$0xff] }
 0x2bd   : > { %v2353_v0 = vadd.f32 %v2352_v50, %v7466_v57  ;;  %v2391_v30 = vmul.f32 %v7464_v29, %v7464_v29  ;;  %v7483_v29 = vld [vmem:[#allocation32_spill] sm:$0xff] }
 0x2be   : > { %v2248_v16 = vadd.f32 %v2247_v40, %v7463_v6  ;;  %v7469_v40 = vld [vmem:[#allocation115_spill] sm:$0xff]  ;;  %v2317_v39 = vadd.f32 %v2316_v5, %v2286_v42  ;;  %v2392_v42 = vmul.f32 %v7466_v57, %v7466_v57 }
 0x2bf   : > { %v2455_v18 = vadd.f32 %v7469_v40, %v7468_v44  ;;  %v7485_v57 = vld [vmem:[#allocation27_spill] sm:$0xff] }
 0x2c0   : > { %v2249_v15 = vadd.f32 %v2248_v16, %v7465_v26  ;;  %v7470_v16 = vld [vmem:[#allocation45_spill] sm:$0xff] }
 0x2c1   : > { %v2354_v47 = vadd.f32 %v2353_v0, %v7470_v16  ;;  %v2456_v50 = vadd.f32 %v2455_v18, %v7472_v19  ;;  %v2419_v0 = vadd.f32 %v2418_v35, %v2388_v49  ;;  %v7480_v49 = vld [vmem:[#allocation82_spill] sm:$0xff] }
 0x2c2   : > { %v2250_v54 = vadd.f32 %v2249_v15, %v7467_v45  ;;  %v2287_v15 = vmul.f32 %v7463_v6, %v7463_v6  ;;  %v7478_v6 = vld [vmem:[#allocation46_spill] sm:$0xff] }
 0x2c3   : > { %v2355_v7 = vadd.f32 %v2354_v47, %v7473_v25  ;;  %v2420_v18 = vadd.f32 %v2419_v0, %v2389_v58  ;;  %v2288_v47 = vmul.f32 %v7465_v26, %v7465_v26  ;;  %v2393_v0 = vmul.f32 %v7470_v16, %v7470_v16  ;;  %v7484_v26 = vld [vmem:[#allocation47_spill] sm:$0xff]  ;;  %v7489_v16 = vld [vmem:[#allocation85_spill] sm:$0xff] }
 0x2c4   : > { %v2251_v34 = vadd.f32 %v2250_v54, %v7471_v43  ;;  %v2457_v54 = vadd.f32 %v2456_v50, %v7475_v61  ;;  %v7481_v50 = vld [vmem:[#allocation41_spill] sm:$0xff] }
 0x2c5   : > { %v2356_v59 = vadd.f32 %v2355_v7, %v7476_v12  ;;  %v2421_v35 = vadd.f32 %v2420_v18, %v2390_v8  ;;  %v7486_v8 = vld [vmem:[#allocation83_spill] sm:$0xff] }
 0x2c6   : > { %v2252_v32 = vadd.f32 %v2251_v34, %v7474_v48  ;;  %v2458_v20 = vadd.f32 %v2457_v54, %v7478_v6  ;;  %v2318_v34 = vadd.f32 %v2317_v39, %v2287_v15  ;;  %v2394_v15 = vmul.f32 %v7473_v25, %v7473_v25  ;;  %v7491_v25 = vld [vmem:[#allocation70_spill] sm:$0xff] }
 0x2c7   : > { %v2357_v36 = vadd.f32 %v2356_v59, %v7479_v41  ;;  %v2422_v54 = vadd.f32 %v2421_v35, %v2391_v30  ;;  %v2289_v59 = vmul.f32 %v7467_v45, %v7467_v45  ;;  %v2395_v35 = vmul.f32 %v7476_v12, %v7476_v12  ;;  %v7490_v45 = vld [vmem:[#allocation49_spill] sm:$0xff] }
 0x2c8   : > { %v2253_v13 = vadd.f32 %v2252_v32, %v7477_v31  ;;  %v2459_v7 = vadd.f32 %v2458_v20, %v7481_v50  ;;  %v7482_v32 = vld [vmem:[#allocation66_spill] sm:$0xff]  ;;  %v2319_v39 = vadd.f32 %v2318_v34, %v2288_v47  ;;  %v2396_v47 = vmul.f32 %v7479_v41, %v7479_v41 }
 0x2c9   : > { %v2358_v55 = vadd.f32 %v2357_v36, %v7482_v32  ;;  %v2423_v36 = vadd.f32 %v2422_v54, %v2392_v42  ;;  %v7492_v42 = vld [vmem:[#allocation87_spill] sm:$0xff]  ;;  %v2491_v12 = vmul.f32 %v7468_v44, %v7468_v44 }
 0x2ca   : > { %v2254_v5 = vadd.f32 %v2253_v13, %v7480_v49  ;;  %v2460_v9 = vadd.f32 %v2459_v7, %v7484_v26  ;;  %v7487_v13 = vld [vmem:[#allocation54_spill] sm:$0xff]  ;;  %v2320_v34 = vadd.f32 %v2319_v39, %v2289_v59  ;;  %v2291_v59 = vmul.f32 %v7474_v48, %v7474_v48  ;;  %v7496_v44 = vld [vmem:[#allocation91_spill] sm:$0xff] }
 0x2cb   : > { %v2359_v1 = vadd.f32 %v2358_v55, %v7485_v57  ;;  %v2424_v7 = vadd.f32 %v2423_v36, %v2393_v0  ;;  %v2290_v55 = vmul.f32 %v7471_v43, %v7471_v43  ;;  %v2492_v0 = vmul.f32 %v7469_v40, %v7469_v40  ;;  %v7494_v43 = vld [vmem:[#allocation89_spill] sm:$0xff] }
 0x2cc   : > { %v2255_v58 = vadd.f32 %v2254_v5, %v7483_v29  ;;  %v2461_v18 = vadd.f32 %v2460_v9, %v7487_v13  ;;  %v7488_v5 = vld [vmem:[#allocation65_spill] sm:$0xff]  ;;  %v2557_v48 = vadd.f32 %v5633_v27, %v5639_v11 }
 0x2cd   : > { %v2360_v51 = vadd.f32 %v2359_v1, %v7488_v5  ;;  %v2425_v1 = vadd.f32 %v2424_v7, %v2394_v15  ;;  %v2321_v39 = vadd.f32 %v2320_v34, %v2290_v55  ;;  %v7497_v7 = vld [vmem:[#allocation61_spill] sm:$0xff]  ;;  %v2495_v34 = vmul.f32 %v7478_v6, %v7478_v6 }
 0x2ce   : > { %v2256_v20 = vadd.f32 %v2255_v58, %v7486_v8  ;;  %v2462_v62 = vadd.f32 %v2461_v18, %v7490_v45  ;;  %v7493_v58 = vld [vmem:[#allocation53_spill] sm:$0xff] }
 0x2cf   : > { %v2361_v24 = vadd.f32 %v2360_v51, %v7491_v25  ;;  %v2397_v51 = vmul.f32 %v7482_v32, %v7482_v32  ;;  %v2426_v41 = vadd.f32 %v2425_v1, %v2395_v35  ;;  %v7495_v18 = vld [vmem:[#allocation57_spill] sm:$0xff]  ;;  %v2494_v32 = vmul.f32 %v7475_v61, %v7475_v61 }
 0x2d0   : > { %v2257_v30 = vadd.f32 %v2256_v20, %v7489_v16  ;;  %v2463_v54 = vadd.f32 %v2462_v62, %v7493_v58  ;;  %v2521_v35 = vadd.f32 %v2492_v0, %v2491_v12  ;;  %v7498_v1 = vld [vmem:[#allocation93_spill] sm:$0xff]  ;;  %v2558_v61 = vadd.f32 %v2557_v48, %v5645_v56  ;;  %v7500_v12 = vld [vmem:[#allocation95_spill] sm:$0xff] }
 0x2d1   : > { %v2362_v20 = vadd.f32 %v2361_v24, %v5478_v53  ;;  %v2493_v24 = vmul.f32 %v7472_v19, %v7472_v19  ;;  %v2427_v40 = vadd.f32 %v2426_v41, %v2396_v47  ;;  %v2398_v19 = vmul.f32 %v7485_v57, %v7485_v57  ;;  %v7502_v6 = vld [vmem:[#allocation97_spill] sm:$0xff] }
 0x2d2   : > { %v2258_v9 = vadd.f32 %v2257_v30, %v7492_v42  ;;  %v2464_v30 = vadd.f32 %v2463_v54, %v7495_v18 }
 0x2d3   : > { %v2363_v62 = vadd.f32 %v2362_v20, %v5487_v52  ;;  %v2428_v20 = vadd.f32 %v2427_v40, %v2397_v51  ;;  %v2522_v41 = vadd.f32 %v2521_v35, %v2493_v24  ;;  %v2496_v51 = vmul.f32 %v7481_v50, %v7481_v50 }
 0x2d4   : > { %v2259_v36 = vadd.f32 %v2258_v9, %v7494_v43  ;;  %v2465_v9 = vadd.f32 %v2464_v30, %v7497_v7  ;;  %v2292_v30 = vmul.f32 %v7477_v31, %v7477_v31  ;;  %v2559_v40 = vadd.f32 %v2558_v61, %v5642_v10 }
 0x2d5   : > { %v2364_v33 = vadd.f32 %v2363_v62, %v5496_v4  ;;  %v2322_v62 = vadd.f32 %v2321_v39, %v2291_v59  ;;  %v2429_v35 = vadd.f32 %v2428_v20, %v2398_v19  ;;  %v2497_v59 = vmul.f32 %v7484_v26, %v7484_v26  ;;  %v7505_v20 = vld [vmem:[#allocation99_spill] sm:$0xff] }
 0x2d6   : > { %v2260_v15 = vadd.f32 %v2259_v36, %v7496_v44  ;;  %v7499_v36 = vld [vmem:[#allocation67_spill] sm:$0xff]  ;;  %v2293_v50 = vmul.f32 %v7480_v49, %v7480_v49  ;;  %v2400_v26 = vmul.f32 %v7491_v25, %v7491_v25  ;;  %v7507_v49 = vld [vmem:[#allocation121_spill] sm:$0xff]  ;;  %v2500_v25 = vmul.f32 %v7493_v58, %v7493_v58 }
 0x2d7   : > { %v2466_v55 = vadd.f32 %v2465_v9, %v7499_v36  ;;  %v2365_v47 = vadd.f32 %v2364_v33, %v5507_v2  ;;  %v2523_v33 = vadd.f32 %v2522_v41, %v2494_v32  ;;  %v2399_v9 = vmul.f32 %v7488_v5, %v7488_v5  ;;  %v7504_v41 = vld [vmem:[#allocation119_spill] sm:$0xff] }
 0x2d8   : > { %v2261_v54 = vadd.f32 %v2260_v15, %v7498_v1  ;;  %v7501_v15 = vld [vmem:[#allocation28_spill] sm:$0xff]  ;;  %v2323_v32 = vadd.f32 %v2322_v62, %v2292_v30  ;;  %v2498_v5 = vmul.f32 %v7487_v13, %v7487_v13  ;;  %v2499_v62 = vmul.f32 %v7490_v45, %v7490_v45 }
 0x2d9   : > { %v2467_v27 = vadd.f32 %v2466_v55, %v7501_v15  ;;  %v2366_v57 = vadd.f32 %v2365_v47, %v5517_v37  ;;  %v2524_v39 = vadd.f32 %v2523_v33, %v2495_v34  ;;  %v7503_v55 = vld [vmem:[#allocation73_spill] sm:$0xff]  ;;  %v2430_v34 = vadd.f32 %v2429_v35, %v2399_v9 }
 0x2da   : > { %v2262_v0 = vadd.f32 %v2261_v54, %v7500_v12  ;;  %v2560_v54 = vadd.f32 %v2559_v40, %v5651_v21  ;;  %v2294_v13 = vmul.f32 %v7483_v29, %v7483_v29  ;;  %v2401_v45 = vmul.f32 %v5478_v53, %v5478_v53  ;;  %v7512_v29 = vld [vmem:[#allocation125_spill] sm:$0xff]  ;;  %v7517_v53 = vld [vmem:[#allocation103_spill] sm:$0xff] }
 0x2db   : > { %v2468_v48 = vadd.f32 %v2467_v27, %v5475_v17  ;;  %v2367_v31 = vadd.f32 %v2366_v57, %v5527_v46  ;;  %v2525_v27 = vadd.f32 %v2524_v39, %v2496_v51  ;;  %v7506_v57 = vld [vmem:[#allocation30_spill] sm:$0xff]  ;;  %v2324_v51 = vadd.f32 %v2323_v32, %v2293_v50  ;;  %v7509_v39 = vld [vmem:[#allocation123_spill] sm:$0xff] }
 0x2dc   : > { %v2263_v24 = vadd.f32 %v2262_v0, %v7502_v6  ;;  %v2561_v19 = vadd.f32 %v2560_v54, %v5648_v28  ;;  %v2501_v32 = vmul.f32 %v7495_v18, %v7495_v18  ;;  %v2295_v58 = vmul.f32 %v7486_v8, %v7486_v8  ;;  %v7519_v8 = vld [vmem:[#allocation129_spill] sm:$0xff] }
 0x2dd   : > { %v2469_v47 = vadd.f32 %v2468_v48, %v7503_v55  ;;  %v2368_v61 = vadd.f32 %v2367_v31, %v7504_v41  ;;  %v2526_v40 = vadd.f32 %v2525_v27, %v2497_v59  ;;  %v7508_v31 = vld [vmem:[#allocation75_spill] sm:$0xff]  ;;  %v2431_v59 = vadd.f32 %v2430_v34, %v2400_v26  ;;  %v7511_v27 = vld [vmem:[#allocation78_spill] sm:$0xff] }
 0x2de   : > { %v2264_v0 = vadd.f32 %v2263_v24, %v7505_v20  ;;  %v2562_v48 = vadd.f32 %v2561_v19, %v5657_v14  ;;  %v2502_v26 = vmul.f32 %v7497_v7, %v7497_v7  ;;  %v2402_v18 = vmul.f32 %v5487_v52, %v5487_v52  ;;  %v7523_v52 = vld [vmem:[#allocation105_spill] sm:$0xff] }
 0x2df   : > { %v2470_v33 = vadd.f32 %v2469_v47, %v7506_v57  ;;  %v2369_v30 = vadd.f32 %v2368_v61, %v7507_v49  ;;  %v2527_v9 = vadd.f32 %v2526_v40, %v2498_v5  ;;  %v7510_v47 = vld [vmem:[#allocation101_spill] sm:$0xff]  ;;  %v2325_v5 = vadd.f32 %v2324_v51, %v2294_v13 }
 0x2e0   : > { %v2563_v35 = vadd.f32 %v2562_v48, %v5654_v63  ;;  %v2265_v61 = vadd.f32 %v2264_v0, %v7510_v47  ;;  %v7514_v40 = vld [vmem:[#allocation81_spill] sm:$0xff]  ;;  %v7515_v48 = vld [vmem:[#allocation127_spill] sm:$0xff]  ;;  %v2503_v51 = vmul.f32 %v7499_v36, %v7499_v36  ;;  %v2296_v7 = vmul.f32 %v7489_v16, %v7489_v16 }
 0x2e1   : > { %v2471_v24 = vadd.f32 %v2470_v33, %v7508_v31  ;;  %v2370_v54 = vadd.f32 %v2369_v30, %v7509_v39  ;;  %v2528_v33 = vadd.f32 %v2527_v9, %v2499_v62  ;;  %v7513_v30 = vld [vmem:[#allocation55_spill] sm:$0xff]  ;;  %v2432_v62 = vadd.f32 %v2431_v59, %v2401_v45  ;;  %v7518_v9 = vld [vmem:[#allocation118_spill] sm:$0xff] }
 0x2e2   : > { %v2564_v14 = vadd.f32 %v2563_v35, %v7513_v30  ;;  %v2266_v28 = vadd.f32 %v2265_v61, %v7517_v53  ;;  %v2504_v45 = vmul.f32 %v7501_v15, %v7501_v15  ;;  %v2505_v16 = vmul.f32 %v5475_v17, %v5475_v17  ;;  %v7529_v17 = vld [vmem:[#allocation126_spill] sm:$0xff] }
 0x2e3   : > { %v2472_v19 = vadd.f32 %v2471_v24, %v7511_v27  ;;  %v2371_v50 = vadd.f32 %v2370_v54, %v7512_v29  ;;  %v2529_v34 = vadd.f32 %v2528_v33, %v2500_v25  ;;  %v7516_v24 = vld [vmem:[#allocation59_spill] sm:$0xff]  ;;  %v7521_v25 = vld [vmem:[#allocation120_spill] sm:$0xff]  ;;  %v2403_v33 = vmul.f32 %v5496_v4, %v5496_v4 }
 0x2e4   : > { %v2565_v54 = vadd.f32 %v2564_v14, %v7516_v24  ;;  %v2326_v14 = vadd.f32 %v2325_v5, %v2295_v58  ;;  %v2267_v36 = vadd.f32 %v2266_v28, %v7523_v52  ;;  %v2404_v28 = vmul.f32 %v5507_v2, %v5507_v2 }
 0x2e5   : > { %v2473_v0 = vadd.f32 %v2472_v19, %v7514_v40  ;;  %v2372_v63 = vadd.f32 %v2371_v50, %v7515_v48  ;;  %v2530_v19 = vadd.f32 %v2529_v34, %v2501_v32  ;;  %v7520_v50 = vld [vmem:[#allocation63_spill] sm:$0xff] }
 0x2e6   : > { %v2566_v30 = vadd.f32 %v2565_v54, %v7520_v50  ;;  %v7524_v32 = vld [vmem:[#allocation131_spill] sm:$0xff]  ;;  %v2433_v54 = vadd.f32 %v2432_v62, %v2402_v18  ;;  %v7525_v50 = vld [vmem:[#allocation122_spill] sm:$0xff]  ;;  %v2327_v15 = vadd.f32 %v2326_v14, %v2296_v7  ;;  %v2298_v14 = vmul.f32 %v7494_v43, %v7494_v43 }
 0x2e7   : > { %v2474_v35 = vadd.f32 %v2473_v0, %v7518_v9  ;;  %v2373_v13 = vadd.f32 %v2372_v63, %v7519_v8  ;;  %v2531_v59 = vadd.f32 %v2530_v19, %v2502_v26  ;;  %v7522_v63 = vld [vmem:[#allocation148_spill] sm:$0xff] }
 0x2e8   : > { %v2567_v0 = vadd.f32 %v2566_v30, %v7522_v63  ;;  %v7526_v26 = vld [vmem:[#allocation124_spill] sm:$0xff]  ;;  %v2506_v30 = vmul.f32 %v7503_v55, %v7503_v55 }
 0x2e9   : > { %v2475_v61 = vadd.f32 %v2474_v35, %v7521_v25  ;;  %v2374_v34 = vadd.f32 %v2373_v13, %v7524_v32  ;;  %v2532_v58 = vadd.f32 %v2531_v59, %v2503_v51  ;;  %v2297_v35 = vmul.f32 %v7492_v42, %v7492_v42  ;;  %v7527_v13 = vld [vmem:[#allocation107_spill] sm:$0xff]  ;;  %v7528_v51 = vld [vmem:[#allocation133_spill] sm:$0xff] }
 0x2ea   : > { %v2568_v5 = vadd.f32 %v2567_v0, %v5676_v38  ;;  %v2434_v0 = vadd.f32 %v2433_v54, %v2403_v33  ;;  %v2507_v42 = vmul.f32 %v7506_v57, %v7506_v57  ;;  %v2508_v33 = vmul.f32 %v7508_v31, %v7508_v31 }
 0x2eb   : > { %v2476_v24 = vadd.f32 %v2475_v61, %v7525_v50  ;;  %v2533_v18 = vadd.f32 %v2532_v58, %v2504_v45  ;;  %v2268_v61 = vadd.f32 %v2267_v36, %v7527_v13  ;;  %v2375_v59 = vadd.f32 %v2374_v34, %v7528_v51  ;;  %v7530_v45 = vld [vmem:[#allocation128_spill] sm:$0xff] }
 0x2ec   : > { %v2569_v62 = vadd.f32 %v2568_v5, %v5672_v60  ;;  %v2328_v55 = vadd.f32 %v2327_v15, %v2297_v35  ;;  %v2405_v36 = vmul.f32 %v5517_v37, %v5517_v37  ;;  %v7531_v5 = vld [vmem:[#allocation109_spill] sm:$0xff]  ;;  %v7534_v37 = vld [vmem:[#allocation132_spill] sm:$0xff]  ;;  %v2406_v31 = vmul.f32 %v5527_v46, %v5527_v46 }
 0x2ed   : > { %v2477_v19 = vadd.f32 %v2476_v24, %v7526_v26  ;;  %v2534_v24 = vadd.f32 %v2533_v18, %v2505_v16  ;;  %v2269_v57 = vadd.f32 %v2268_v61, %v7531_v5  ;;  %v7532_v16 = vld [vmem:[#allocation135_spill] sm:$0xff]  ;;  %v2435_v18 = vadd.f32 %v2434_v0, %v2404_v28  ;;  %v7535_v61 = vld [vmem:[#allocation86_spill] sm:$0xff]  ;;  %v7536_v0 = vld [vmem:[#allocation137_spill] sm:$0xff] }
 0x2ee   : > { %v2570_v7 = vadd.f32 %v2569_v62, %v5685_v23  ;;  %v7533_v62 = vld [vmem:[#allocation130_spill] sm:$0xff]  ;;  %v2329_v15 = vadd.f32 %v2328_v55, %v2298_v14  ;;  %v2407_v55 = vmul.f32 %v7504_v41, %v7504_v41  ;;  %v2303_v41 = vmul.f32 %v7505_v20, %v7505_v20 }
 0x2ef   : > { %v2478_v4 = vadd.f32 %v2477_v19, %v7529_v17  ;;  %v2535_v34 = vadd.f32 %v2534_v24, %v2506_v30  ;;  %v2376_v19 = vadd.f32 %v2375_v59, %v7532_v16  ;;  %v2509_v30 = vmul.f32 %v7511_v27, %v7511_v27 }
 0x2f0   : > { %v2571_v54 = vadd.f32 %v2570_v7, %v5680_v22  ;;  %v2270_v28 = vrot.slane %v2269_v57, 4  ;;  %v2510_v27 = vmul.f32 %v7514_v40, %v7514_v40  ;;  %v6013_v40 = vmul.f32 %v7510_v47, %v7510_v47 }
 0x2f1   : > { %v2479_v58 = vadd.f32 %v2478_v4, %v7530_v45  ;;  %v2536_v43 = vadd.f32 %v2535_v34, %v2507_v42  ;;  %v2299_v4 = vmul.f32 %v7496_v44, %v7496_v44  ;;  %v2377_v24 = vadd.f32 %v2376_v19, %v7536_v0 }
 0x2f2   : > { %v2572_v35 = vadd.f32 %v2571_v54, %v5698_v3  ;;  %v2436_v42 = vadd.f32 %v2435_v18, %v2405_v36  ;;  %v7538_v54 = vld [vmem:[#allocation88_spill] sm:$0xff]  ;;  %v2302_v18 = vmul.f32 %v7502_v6, %v7502_v6 }
 0x2f3   : > { %v2480_v2 = vadd.f32 %v2479_v58, %v7533_v62  ;;  %v2537_v7 = vadd.f32 %v2536_v43, %v2508_v33  ;;  %v7537_v58 = vld [vmem:[#allocation134_spill] sm:$0xff]  ;;  %v2330_v14 = vadd.f32 %v2329_v15, %v2299_v4  ;;  %v2378_v19 = vrot.slane %v2377_v24, 4  ;;  %v7541_v4 = vld [vmem:[#allocation92_spill] sm:$0xff] }
 0x2f4   : > { %v2573_v59 = vadd.f32 %v2572_v35, %v7535_v61  ;;  %v7539_v35 = vld [vmem:[#allocation90_spill] sm:$0xff]  ;;  %v2271_v61 = vadd.f32 %v2270_v28, %v2269_v57  ;;  %v2437_v36 = vadd.f32 %v2436_v42, %v2406_v31  ;;  %v2408_v31 = vmul.f32 %v7507_v49, %v7507_v49 }
 0x2f5   : > { %v2481_v23 = vadd.f32 %v2480_v2, %v7534_v37  ;;  %v2300_v2 = vmul.f32 %v7498_v1, %v7498_v1  ;;  %v2538_v33 = vadd.f32 %v2537_v7, %v2509_v30  ;;  %v7540_v1 = vld [vmem:[#allocation136_spill] sm:$0xff]  ;;  %v7542_v30 = vld [vmem:[#allocation94_spill] sm:$0xff]  ;;  %v2379_v42 = vadd.f32 %v2378_v19, %v2377_v24 }
 0x2f6   : > { %v2574_v44 = vadd.f32 %v2573_v59, %v7538_v54  ;;  %v2593_v59 = vmul.f32 %v5639_v11, %v5639_v11  ;;  %v2272_v20 = vrot.slane %v2271_v61, 2  ;;  %v2438_v7 = vadd.f32 %v2437_v36, %v2407_v55  ;;  %v7545_v55 = vld [vmem:[#allocation98_spill] sm:$0xff] }
 0x2f7   : > { %v2482_v34 = vadd.f32 %v2481_v23, %v7537_v58  ;;  %v2301_v23 = vmul.f32 %v7500_v12, %v7500_v12  ;;  %v2331_v57 = vadd.f32 %v2330_v14, %v2300_v2  ;;  %v2511_v12 = vmul.f32 %v7518_v9, %v7518_v9  ;;  %v7546_v36 = vld [vmem:[#allocation138_spill] sm:$0xff] }
 0x2f8   : > { %v2575_v46 = vadd.f32 %v2574_v44, %v7539_v35  ;;  %v2539_v47 = vadd.f32 %v2538_v33, %v2510_v27  ;;  %v7544_v44 = vld [vmem:[#allocation96_spill] sm:$0xff]  ;;  %v2595_v9 = vmul.f32 %v5645_v56, %v5645_v56  ;;  %v2512_v24 = vmul.f32 %v7521_v25, %v7521_v25 }
 0x2f9   : > { %v2483_v43 = vadd.f32 %v2482_v34, %v7540_v1  ;;  %v6026_v34 = vmul.f32 %v7517_v53, %v7517_v53  ;;  %v2332_v14 = vadd.f32 %v2331_v57, %v2301_v23  ;;  %v2596_v53 = vmul.f32 %v5642_v10, %v5642_v10  ;;  %v7547_v33 = vld [vmem:[#allocation140_spill] sm:$0xff] }
 0x2fa   : > { %v2576_v15 = vadd.f32 %v2575_v46, %v7541_v4  ;;  %v7543_v46 = vld [vmem:[#allocation139_spill] sm:$0xff]  ;;  %v2273_v56 = vadd.f32 %v2272_v20, %v2271_v61  ;;  %v2380_v23 = vrot.slane %v2379_v42, 2  ;;  %v2439_v57 = vadd.f32 %v2438_v7, %v2408_v31  ;;  %v7549_v10 = vld [vmem:[#allocation144_spill] sm:$0xff]  ;;  %v7552_v20 = vld [vmem:[#allocation102_spill] sm:$0xff] }
 0x2fb   : > { %v2594_v28 = vmul.f32 %v7543_v46, %v7543_v46  ;;  %v2484_v49 = vrot.slane %v2483_v43, 4  ;;  %v2410_v46 = vmul.f32 %v7512_v29, %v7512_v29  ;;  %v2540_v11 = vadd.f32 %v2539_v47, %v2511_v12  ;;  %v7553_v12 = vld [vmem:[#allocation147_spill] sm:$0xff] }
 0x2fc   : > { %v2577_v6 = vadd.f32 %v2576_v15, %v7542_v30  ;;  %v2409_v15 = vmul.f32 %v7509_v39, %v7509_v39  ;;  %v2597_v29 = vmul.f32 %v5651_v21, %v5651_v21  ;;  %v2333_v4 = vadd.f32 %v2332_v14, %v2302_v18 }
 0x2fd   : > { %v2623_v19 = vadd.f32 %v2594_v28, %v2593_v59  ;;  %v2485_v39 = vadd.f32 %v2484_v49, %v2483_v43  ;;  %v2598_v59 = vmul.f32 %v7549_v10, %v7549_v10  ;;  %v7550_v28 = vld [vmem:[#allocation152_spill] sm:$0xff]  ;;  %v2599_v43 = vmul.f32 %v7553_v12, %v7553_v12 }
 0x2fe   : > { %v2578_v2 = vadd.f32 %v2577_v6, %v7544_v44  ;;  %v2659_v6 = vadd.f32 %v7547_v33, %v7546_v36  ;;  %v7548_v44 = vld [vmem:[#allocation100_spill] sm:$0xff]  ;;  %v7551_v33 = vld [vmem:[#allocation150_spill] sm:$0xff]  ;;  %v2274_v49 = vrot.slane %v2273_v56, 1  ;;  %v2541_v18 = vadd.f32 %v2540_v11, %v2512_v24 }
 0x2ff   : > { %v2624_v25 = vadd.f32 %v2623_v19, %v2595_v9  ;;  %v2677_v61 = vadd.f32 %v7551_v33, %v7550_v28  ;;  %v2440_v9 = vadd.f32 %v2439_v57, %v2409_v15  ;;  %v2486_v14 = vrot.slane %v2485_v39, 2  ;;  %v7554_v19 = vld [vmem:[#allocation104_spill] sm:$0xff] }
 0x300   : > { %v2579_v27 = vadd.f32 %v2578_v2, %v7545_v55  ;;  %v2513_v2 = vmul.f32 %v7525_v50, %v7525_v50  ;;  %v2660_v47 = vrot.slane %v2659_v6, 4  ;;  %v2334_v10 = vadd.f32 %v2333_v4, %v2303_v41  ;;  %v2237_v41 = vld [vmem:[#allocation2] sm:$0x1] }
 0x301   : > { %v2625_v7 = vadd.f32 %v2624_v25, %v2596_v53  ;;  %v2411_v33 = vmul.f32 %v7515_v48, %v7515_v48  ;;  %v7556_v25 = vld [vmem:[#allocation106_spill] sm:$0xff] }
 0x302   : > { %v2580_v30 = vadd.f32 %v2579_v27, %v7548_v44  ;;  %v2381_v27 = vadd.f32 %v2380_v23, %v2379_v42  ;;  %v2678_v44 = vrot.slane %v2677_v61, 4  ;;  %v7557_v42 = vld [vmem:[#allocation55_spill] sm:$0xff]  ;;  %v2661_v24 = vadd.f32 %v2660_v47, %v2659_v6  ;;  %v7558_v48 = vld [vmem:[#allocation154_spill] sm:$0xff]  ;;  %v7560_v6 = vld [vmem:[#allocation153_spill] sm:$0xff] }
 0x303   : > { %v2626_v21 = vadd.f32 %v2625_v7, %v2597_v29  ;;  %v2601_v11 = vmul.f32 %v7557_v42, %v7557_v42  ;;  %v2275_v23 = vadd.f32 %v2274_v49, %v2273_v56  ;;  %v2441_v29 = vadd.f32 %v2440_v9, %v2410_v46 }
 0x304   : > { %v2581_v31 = vadd.f32 %v2580_v30, %v7552_v20  ;;  %v2514_v30 = vmul.f32 %v7526_v26, %v7526_v26  ;;  %v7555_v20 = vld [vmem:[#allocation146_spill] sm:$0xff]  ;;  %v2382_v57 = vrot.slane %v2381_v27, 1  ;;  %v2542_v4 = vadd.f32 %v2541_v18, %v2513_v2  ;;  %v7561_v2 = vld [vmem:[#allocation63_spill] sm:$0xff] }
 0x305   : > { %v2600_v53 = vmul.f32 %v7555_v20, %v7555_v20  ;;  %v2627_v15 = vadd.f32 %v2626_v21, %v2598_v59  ;;  %v2679_v26 = vadd.f32 %v2678_v44, %v2677_v61  ;;  %v2335_v28 = vadd.f32 %v2334_v10, %v6013_v40  ;;  %v7559_v21 = vld [vmem:[#allocation59_spill] sm:$0xff] }
 0x306   : > { %v2582_v50 = vadd.f32 %v2581_v31, %v7554_v19  ;;  %v2487_v31 = vadd.f32 %v2486_v14, %v2485_v39  ;;  %v2412_v20 = vmul.f32 %v7519_v8, %v7519_v8  ;;  %v2602_v56 = vmul.f32 %v7559_v21, %v7559_v21 }
 0x307   : > { %v2628_v19 = vadd.f32 %v2627_v15, %v2599_v43  ;;  %v2603_v39 = vmul.f32 %v7561_v2, %v7561_v2  ;;  %v2662_v47 = vrot.slane %v2661_v24, 2  ;;  %v2276_v43 = vadd.f32 %v2275_v23, %v2237_v41 }
 0x308   : > { %v2583_v12 = vadd.f32 %v2582_v50, %v7556_v25  ;;  %v2515_v50 = vmul.f32 %v7529_v17, %v7529_v17  ;;  %v2383_v44 = vadd.f32 %v2382_v57, %v2381_v27  ;;  %v2442_v61 = vadd.f32 %v2441_v29, %v2411_v33 }
 0x309   : > { %v2629_v59 = vadd.f32 %v2628_v19, %v2600_v53  ;;  %v2543_v40 = vadd.f32 %v2542_v4, %v2514_v30  ;;  %v2488_v49 = vrot.slane %v2487_v31, 1  ;;  %v2680_v18 = vrot.slane %v2679_v26, 2 }
 0x30a   : > { %v2584_v7 = vadd.f32 %v2583_v12, %v7558_v48  ;;  %v2306_v17 = vmul.f32 %v7523_v52, %v7523_v52  ;;  %v2336_v14 = vadd.f32 %v2335_v28, %v6026_v34  ;;  %v2413_v10 = vmul.f32 %v7524_v32, %v7524_v32 }
 0x30b   : > { %v2630_v8 = vadd.f32 %v2629_v59, %v2601_v11  ;;  %v2516_v19 = vmul.f32 %v7530_v45, %v7530_v45  ;;  %v2604_v33 = vmul.f32 %v7522_v63, %v7522_v63  ;;  %v2663_v30 = vadd.f32 %v2662_v47, %v2661_v24 }
 0x30c   : > { %v2585_v46 = vadd.f32 %v2584_v7, %v7560_v6  ;;  %v2384_v12 = vadd.f32 %v2383_v44, %v2276_v43  ;;  %v2443_v42 = vadd.f32 %v2442_v61, %v2412_v20  ;;  %v2544_v11 = vadd.f32 %v2543_v40, %v2515_v50  ;;  %v7562_v20 = vld [vmem:[#allocation151_spill] sm:$0xff] }
 0x30d   : > { %v2631_v27 = vadd.f32 %v2630_v8, %v2602_v56  ;;  %v2605_v52 = vmul.f32 %v5676_v38, %v5676_v38  ;;  %v2489_v15 = vadd.f32 %v2488_v49, %v2487_v31  ;;  %v2681_v23 = vadd.f32 %v2680_v18, %v2679_v26  ;;  %v7563_v8 = vld [vmem:[#allocation86_spill] sm:$0xff] }
 0x30e   : > { %v2586_v9 = vrot.slane %v2585_v46, 4  ;;  %v2307_v32 = vmul.f32 %v7527_v13, %v7527_v13  ;;  %v2414_v45 = vmul.f32 %v7528_v51, %v7528_v51  ;;  %v2517_v63 = vmul.f32 %v7533_v62, %v7533_v62 }
 0x30f   : > { %v2632_v28 = vadd.f32 %v2631_v27, %v2603_v39  ;;  %v2606_v57 = vmul.f32 %v5672_v60, %v5672_v60  ;;  %v2664_v4 = vrot.slane %v2663_v30, 1  ;;  %v2337_v41 = vadd.f32 %v2336_v14, %v2306_v17 }
 0x310   : > { %v2587_v53 = vadd.f32 %v2586_v9, %v2585_v46  ;;  %v2444_v31 = vadd.f32 %v2443_v42, %v2413_v10  ;;  %v2545_v7 = vadd.f32 %v2544_v11, %v2516_v19  ;;  %v2607_v26 = vmul.f32 %v7562_v20, %v7562_v20 }
 0x311   : > { %v2633_v29 = vadd.f32 %v2632_v28, %v2604_v33  ;;  %v2490_v50 = vadd.f32 %v2489_v15, %v2384_v12  ;;  %v2682_v56 = vrot.slane %v2681_v23, 1  ;;  %v2308_v51 = vmul.f32 %v7531_v5, %v7531_v5 }
 0x312   : > { %v2588_v34 = vrot.slane %v2587_v53, 2  ;;  %v2415_v62 = vmul.f32 %v7532_v16, %v7532_v16  ;;  %v2608_v2 = vmul.f32 %v5680_v22, %v5680_v22  ;;  %v2665_v59 = vadd.f32 %v2664_v4, %v2663_v30 }
 0x313   : > { %v2634_v21 = vadd.f32 %v2633_v29, %v2605_v52  ;;  %v2338_v47 = vadd.f32 %v2337_v41, %v2307_v32  ;;  %v2445_v43 = vadd.f32 %v2444_v31, %v2414_v45  ;;  %v2518_v44 = vmul.f32 %v7534_v37, %v7534_v37  ;;  %v7567_v31 = vld [vmem:[#allocation140_spill] sm:$0xff] }
 0x314   : > { %v2589_v24 = vadd.f32 %v2588_v34, %v2587_v53  ;;  %v2609_v61 = vmul.f32 %v5698_v3, %v5698_v3  ;;  %v2546_v40 = vadd.f32 %v2545_v7, %v2517_v63  ;;  %v2683_v9 = vadd.f32 %v2682_v56, %v2681_v23  ;;  %v7564_v34 = vld [vmem:[#allocation92_spill] sm:$0xff]  ;;  %v7565_v23 = vld [vmem:[#allocation94_spill] sm:$0xff] }
 0x315   : > { %v2635_v39 = vadd.f32 %v2634_v21, %v2606_v57  ;;  %v2610_v16 = vmul.f32 %v7563_v8, %v7563_v8  ;;  %v2339_v14 = vadd.f32 %v2338_v47, %v2308_v51  ;;  %v2416_v10 = vmul.f32 %v7536_v0, %v7536_v0  ;;  %v7569_v51 = vld [vmem:[#allocation152_spill] sm:$0xff] }
 0x316   : > { %v2590_v13 = vrot.slane %v2589_v24, 1  ;;  %v2446_v19 = vadd.f32 %v2445_v43, %v2415_v62  ;;  %v2519_v37 = vmul.f32 %v7537_v58, %v7537_v58  ;;  %v2547_v53 = vadd.f32 %v2546_v40, %v2518_v44  ;;  %v7572_v43 = vld [vmem:[#allocation104_spill] sm:$0xff] }
 0x317   : > { %v2636_v5 = vadd.f32 %v2635_v39, %v2607_v26  ;;  %v2611_v33 = vmul.f32 %v7538_v54, %v7538_v54  ;;  %v2612_v12 = vmul.f32 %v7539_v35, %v7539_v35  ;;  %v2340_v11 = vrot.slane %v2339_v14, 4  ;;  %v7566_v35 = vld [vmem:[#allocation96_spill] sm:$0xff] }
 0x318   : > { %v2591_v46 = vadd.f32 %v2590_v13, %v2589_v24  ;;  %v2447_v52 = vadd.f32 %v2446_v19, %v2416_v10  ;;  %v2520_v0 = vmul.f32 %v7540_v1, %v7540_v1  ;;  %v2548_v15 = vadd.f32 %v2547_v53, %v2519_v37 }
 0x319   : > { %v2637_v18 = vadd.f32 %v2636_v5, %v2608_v2  ;;  %v2613_v58 = vmul.f32 %v7564_v34, %v7564_v34  ;;  %v2614_v54 = vmul.f32 %v7565_v23, %v7565_v23  ;;  %v2341_v45 = vadd.f32 %v2340_v11, %v2339_v14  ;;  %v7571_v2 = vld [vmem:[#allocation102_spill] sm:$0xff] }
 0x31a   : > { %v2592_v49 = vadd.f32 %v2591_v46, %v2490_v50  ;;  %v2448_v63 = vrot.slane %v2447_v52, 4  ;;  %v2549_v24 = vadd.f32 %v2548_v15, %v2520_v0  ;;  %v2615_v57 = vmul.f32 %v7566_v35, %v7566_v35  ;;  %v7568_v50 = vld [vmem:[#allocation100_spill] sm:$0xff]  ;;  %v7570_v46 = vld [vmem:[#allocation150_spill] sm:$0xff] }
 0x31b   : > { %v2638_v27 = vadd.f32 %v2637_v18, %v2609_v61  ;;  %v2616_v4 = vmul.f32 %v7545_v55, %v7545_v55  ;;  %v2667_v41 = vmul.f32 %v7546_v36, %v7546_v36  ;;  %v2668_v7 = vmul.f32 %v7567_v31, %v7567_v31 }
 0x31c   : > { %v2666_v17 = vadd.f32 %v2665_v59, %v2592_v49  ;;  %v2342_v20 = vrot.slane %v2341_v45, 2  ;;  %v2449_v26 = vadd.f32 %v2448_v63, %v2447_v52  ;;  %v2617_v13 = vmul.f32 %v7568_v50, %v7568_v50 }
 0x31d   : > { %v2639_v42 = vadd.f32 %v2638_v27, %v2610_v16  ;;  %v2550_v21 = vrot.slane %v2549_v24, 4  ;;  %v2685_v62 = vmul.f32 %v7569_v51, %v7569_v51  ;;  %v2686_v55 = vmul.f32 %v7570_v46, %v7570_v46 }
 0x31e   : > { %v2684_v30 = vadd.f32 %v2683_v9, %v2666_v17  ;;  %v2618_v39 = vmul.f32 %v7571_v2, %v7571_v2  ;;  %v2669_v59 = vadd.f32 %v2668_v7, %v2667_v41  ;;  %v2343_v47 = vadd.f32 %v2342_v20, %v2341_v45 }
 0x31f   : > { %v2640_v28 = vadd.f32 %v2639_v42, %v2611_v33  ;;  %v2619_v44 = vmul.f32 %v7572_v43, %v7572_v43  ;;  %v2450_v61 = vrot.slane %v2449_v26, 2  ;;  %v2551_v40 = vadd.f32 %v2550_v21, %v2549_v24 }
 0x320   : > { %2695 = vst [vmem:[#allocation2] sm:$0x1] %v2684_v30  ;;  %v2687_v5 = vadd.f32 %v2686_v55, %v2685_v62  ;;  %v2620_v9 = vmul.f32 %v7556_v25, %v7556_v25  ;;  %v2670_v16 = vrot.slane %v2669_v59, 4  ;;  %v2344_v18 = vrot.slane %v2343_v47, 1 }
 0x321   : > { %v2641_v32 = vadd.f32 %v2640_v28, %v2612_v12  ;;  %v2621_v17 = vmul.f32 %v7558_v48, %v7558_v48  ;;  %v2451_v14 = vadd.f32 %v2450_v61, %v2449_v26  ;;  %v2552_v10 = vrot.slane %v2551_v40, 2  ;;  %v2238_v12 = vld [vmem:[#allocation3] sm:$0x1] }
 0x322   : > { %v2688_v37 = vrot.slane %v2687_v5, 4  ;;  %v2622_v53 = vmul.f32 %v7560_v6, %v7560_v6  ;;  %v2671_v27 = vadd.f32 %v2670_v16, %v2669_v59  ;;  %v2345_v30 = vadd.f32 %v2344_v18, %v2343_v47 }
 0x323   : > { %v2642_v29 = vadd.f32 %v2641_v32, %v2613_v58  ;;  %v2452_v42 = vrot.slane %v2451_v14, 1  ;;  %v2553_v11 = vadd.f32 %v2552_v10, %v2551_v40 }
 0x324   : > { %v2689_v52 = vadd.f32 %v2688_v37, %v2687_v5  ;;  %v2672_v15 = vrot.slane %v2671_v27, 2  ;;  %v2346_v34 = vadd.f32 %v2345_v30, %v2238_v12 }
 0x325   : > { %v2643_v1 = vadd.f32 %v2642_v29, %v2614_v54  ;;  %v2453_v58 = vadd.f32 %v2452_v42, %v2451_v14  ;;  %v2554_v48 = vrot.slane %v2553_v11, 1 }
 0x326   : > { %v2690_v23 = vrot.slane %v2689_v52, 2  ;;  %v2673_v32 = vadd.f32 %v2672_v15, %v2671_v27 }
 0x327   : > { %v2644_v56 = vadd.f32 %v2643_v1, %v2615_v57  ;;  %v2454_v45 = vadd.f32 %v2453_v58, %v2346_v34  ;;  %v2555_v63 = vadd.f32 %v2554_v48, %v2553_v11 }
 0x328   : > { %v2691_v24 = vadd.f32 %v2690_v23, %v2689_v52  ;;  %v2674_v57 = vrot.slane %v2673_v32, 1 }
 0x329   : > { %v2645_v36 = vadd.f32 %v2644_v56, %v2616_v4  ;;  %v2556_v29 = vadd.f32 %v2555_v63, %v2454_v45 }
 0x32a   : > { %v2692_v1 = vrot.slane %v2691_v24, 1  ;;  %v2675_v31 = vadd.f32 %v2674_v57, %v2673_v32 }
 0x32b   : > { %v2646_v49 = vadd.f32 %v2645_v36, %v2617_v13 }
 0x32c   : > { %v2693_v20 = vadd.f32 %v2692_v1, %v2691_v24 }
 0x32d   : > { %v2647_v8 = vadd.f32 %v2646_v49, %v2618_v39 }
 0x32f   : > { %v2648_v19 = vadd.f32 %v2647_v8, %v2619_v44 }
 0x331   : > { %v2649_v33 = vadd.f32 %v2648_v19, %v2620_v9 }
 0x333   : > { %v2650_v25 = vadd.f32 %v2649_v33, %v2621_v17 }
 0x335   : > { %v2651_v0 = vadd.f32 %v2650_v25, %v2622_v53 }
 0x337   : > { %v2652_v28 = vrot.slane %v2651_v0, 4 }
 0x339   : > { %v2653_v54 = vadd.f32 %v2652_v28, %v2651_v0 }
 0x33b   : > { %v2654_v6 = vrot.slane %v2653_v54, 2 }
 0x33d   : > { %v2655_v35 = vadd.f32 %v2654_v6, %v2653_v54 }
 0x33f   : > { %v2656_v4 = vrot.slane %v2655_v35, 1 }
 0x341   : > { %v2657_v41 = vadd.f32 %v2656_v4, %v2655_v35 }
 0x343   : > { %v2658_v7 = vadd.f32 %v2657_v41, %v2556_v29 }
 0x345   : > { %v2676_v26 = vadd.f32 %v2675_v31, %v2658_v7 }
 0x347   : > { %v2694_v50 = vadd.f32 %v2693_v20, %v2676_v26 }
 0x349   : > { %2696 = vst [vmem:[#allocation3] sm:$0x1] %v2694_v50 }
 0x34a PF: > { %p3455_p7 = scmp.ne.s32.totalorder %s4088_s21, 1 }
 0x34c   : > { %2700 = sbr.rel (%p3455_p7) target bundleno = 978 (0x3d2), region = 72 }
 0x351   : > { %v2701_v13 = vld [vmem:[#allocation2] sm:$0x1]  ;;  %v2703_v21 = vld [vmem:[#allocation3] sm:$0x1]  ;;  %v2711_v56 = vlaneseq  ;;  %v7573_v47 = vld [vmem:[#allocation33_spill] sm:$0xff] }
 0x352   : > { %v2702_v51 = vmul.f32 0.0009765625, %v2701_v13  ;;  %v2704_v62 = vmul.f32 0.0009765625, %v2703_v21  ;;  %v7574_v44 = vld [vmem:[#allocation34_spill] sm:$0xff]  ;;  %v7575_v40 = vld [vmem:[#allocation35_spill] sm:$0xff]  ;;  %v7576_v5 = vld [vmem:[#allocation37_spill] sm:$0xff] }
 0x353   : > { %v6147_v46 = vshrl.u32 %v2711_v56, 7  ;;  %v7577_v16 = vld [vmem:[#allocation40_spill] sm:$0xff]  ;;  %v7585_v0 = vld [vmem:[#allocation71_spill] sm:$0xff]  ;;  %v7586_v34 = vld [vmem:[#allocation74_spill] sm:$0xff] }
 0x354   : > { %v2705_v55 = vmul.f32 %v2702_v51, %v2702_v51  ;;  %v7578_v17 = vld [vmem:[#allocation44_spill] sm:$0xff]  ;;  %v7587_v48 = vld [vmem:[#allocation77_spill] sm:$0xff]  ;;  %v7589_v32 = vld [vmem:[#allocation82_spill] sm:$0xff] }
 0x355   : > { %v7168_v2 = vsub.s32 0, %v6147_v46  ;;  %v7579_v10 = vld [vmem:[#allocation48_spill] sm:$0xff]  ;;  %v7591_v24 = vld [vmem:[#allocation83_spill] sm:$0xff]  ;;  %v7592_v57 = vld [vmem:[#allocation85_spill] sm:$0xff]  ;;  %v7639_v18 = vsub.s32 0, %v6147_v46 }
 0x356   : > { %v2706_v39 = vsub.f32 %v2704_v62, %v2705_v55  ;;  %v7580_v37 = vld [vmem:[#allocation52_spill] sm:$0xff]  ;;  %v7593_v4 = vld [vmem:[#allocation87_spill] sm:$0xff]  ;;  %v7594_v41 = vld [vmem:[#allocation89_spill] sm:$0xff] }
 0x357   : > { %v6152_v36 = vrot.slane %v2702_v51, %v7168_v2  ;;  %v7581_v33 = vld [vmem:[#allocation56_spill] sm:$0xff]  ;;  %v7595_v7 = vld [vmem:[#allocation91_spill] sm:$0xff]  ;;  %v7596_v26 = vld [vmem:[#allocation93_spill] sm:$0xff] }
 0x358   : > { %v2707_v59 = vmax.f32 %v2706_v39, 0.0  ;;  %v7582_v30 = vld [vmem:[#allocation60_spill] sm:$0xff]  ;;  %v7597_v13 = vld [vmem:[#allocation95_spill] sm:$0xff]  ;;  %v7598_v56 = vld [vmem:[#allocation97_spill] sm:$0xff] }
 0x359   : > { %v7583_v42 = vld [vmem:[#allocation64_spill] sm:$0xff]  ;;  %v7599_v62 = vld [vmem:[#allocation99_spill] sm:$0xff]  ;;  %v7600_v39 = vld [vmem:[#allocation101_spill] sm:$0xff]  ;;  %v7647_v49 = vsub.f32 %v7573_v47, %v6152_v36  ;;  %v7648_v27 = vsub.f32 %v7574_v44, %v6152_v36  ;;  %v7649_v19 = vsub.f32 %v7575_v40, %v6152_v36 }
 0x35a   : > { %v2708_v8 = vadd.f32 1e-05, %v2707_v59  ;;  %v7584_v25 = vld [vmem:[#allocation68_spill] sm:$0xff]  ;;  %v7602_v20 = vld [vmem:[#allocation105_spill] sm:$0xff]  ;;  %v7603_v50 = vld [vmem:[#allocation107_spill] sm:$0xff] }
 0x35b   : > { %v7588_v23 = vld [vmem:[#allocation80_spill] sm:$0xff]  ;;  %v7604_v21 = vld [vmem:[#allocation109_spill] sm:$0xff]  ;;  %v7605_v51 = vld [vmem:[#allocation111_spill] sm:$0xff] }
 0x35c   : > { %3854 = vrsqrt.f32 %v2708_v8  ;;  %v7590_v63 = vld [vmem:[#allocation32_spill] sm:$0xff]  ;;  %v7601_v8 = vld [vmem:[#allocation103_spill] sm:$0xff]  ;;  %v7607_v59 = vld [vmem:[#allocation114_spill] sm:$0xff] }
 0x35d   : > { %v7606_v55 = vld [vmem:[#allocation112_spill] sm:$0xff]  ;;  %v7609_v1 = vld [vmem:[#allocation42_spill] sm:$0xff]  ;;  %v7611_v35 = vld [vmem:[#allocation43_spill] sm:$0xff] }
 0x35e   : > { %v7608_v31 = vld [vmem:[#allocation116_spill] sm:$0xff]  ;;  %v7610_v29 = vld [vmem:[#allocation38_spill] sm:$0xff]  ;;  %v7613_v45 = vld [vmem:[#allocation45_spill] sm:$0xff] }
 0x35f   : > { %v7612_v6 = vld [vmem:[#allocation50_spill] sm:$0xff]  ;;  %v7614_v54 = vld [vmem:[#allocation51_spill] sm:$0xff]  ;;  %v7619_v11 = vld [vmem:[#allocation65_spill] sm:$0xff] }
 0x360   : > { %v7615_v28 = vld [vmem:[#allocation58_spill] sm:$0xff]  ;;  %v7618_v52 = vld [vmem:[#allocation27_spill] sm:$0xff]  ;;  %v7640_v9 = vld [vmem:[#allocation36_spill] sm:$0xff] }
 0x361   : > { %v7616_v58 = vld [vmem:[#allocation62_spill] sm:$0xff]  ;;  %v7638_v14 = vld [vmem:[#allocation115_spill] sm:$0xff] }
 0x362   : > { %v7617_v15 = vld [vmem:[#allocation66_spill] sm:$0xff]  ;;  %v7641_v38 = vld [vmem:[#allocation39_spill] sm:$0xff] }
 0x369   : > { %v3855_v12 = vpop.eup %3854 }
 0x36a   : > { %v6288_v22 = vrot.slane %v3855_v12, %v7639_v18  ;;  %v7650_v12 = vsub.f32 %v7576_v5, %v6152_v36  ;;  %v7654_v5 = vsub.f32 %v7580_v37, %v6152_v36  ;;  %v7656_v37 = vsub.f32 %v7582_v30, %v6152_v36 }
 0x36c   : > { %v2754_v60 = vmul.f32 %v6288_v22, %v7647_v49  ;;  %v2755_v53 = vmul.f32 %v6288_v22, %v7648_v27  ;;  %v2756_v46 = vmul.f32 %v6288_v22, %v7649_v19  ;;  %v2757_v47 = vmul.f32 %v6288_v22, %v7650_v12 }
 0x36d   : > { %v7651_v49 = vsub.f32 %v7577_v16, %v6152_v36  ;;  %v7652_v27 = vsub.f32 %v7578_v17, %v6152_v36  ;;  %v7653_v19 = vsub.f32 %v7579_v10, %v6152_v36  ;;  %v2761_v12 = vmul.f32 %v6288_v22, %v7654_v5 }
 0x36e   : > { %v2786_v3 = vmax.f32 %v2754_v60, 0.0  ;;  %v2787_v16 = vmax.f32 %v2755_v53, 0.0  ;;  %v2789_v2 = vmax.f32 %v2757_v47, 0.0  ;;  %v7655_v10 = vsub.f32 %v7581_v33, %v6152_v36 }
 0x36f   : > { %v2758_v44 = vmul.f32 %v6288_v22, %v7651_v49  ;;  %v2759_v40 = vmul.f32 %v6288_v22, %v7652_v27  ;;  %v2760_v18 = vmul.f32 %v6288_v22, %v7653_v19  ;;  %v2788_v49 = vmax.f32 %v2756_v46, 0.0 }
 0x370   : > { %v2793_v61 = vmax.f32 %v2761_v12, 0.0  ;;  %2818 = vst [vmem:[%s4373_s11] sm:$0xff] %v2786_v3  ;;  %2819 = vst [vmem:[%s4373_s11 + $0x8] sm:$0xff] %v2787_v16  ;;  %v2762_v60 = vmul.f32 %v6288_v22, %v7655_v10  ;;  %v2763_v53 = vmul.f32 %v6288_v22, %v7656_v37  ;;  %v7657_v46 = vsub.f32 %v7583_v42, %v6152_v36 }
 0x371   : > { %v2790_v17 = vmax.f32 %v2758_v44, 0.0  ;;  %v2791_v27 = vmax.f32 %v2759_v40, 0.0  ;;  %v2792_v43 = vmax.f32 %v2760_v18, 0.0  ;;  %2820 = vst [vmem:[%s4373_s11 + $0x10] sm:$0xff] %v2788_v49  ;;  %2821 = vst [vmem:[%s4373_s11 + $0x18] sm:$0xff] %v2789_v2  ;;  %v7658_v3 = vsub.f32 %v7584_v25, %v6152_v36 }
 0x372   : > { %v2764_v18 = vmul.f32 %v6288_v22, %v7657_v46  ;;  %2825 = vst [vmem:[%s4373_s11 + $0x38] sm:$0xff] %v2793_v61  ;;  %v7659_v33 = vsub.f32 %v7585_v0, %v6152_v36  ;;  %v7660_v42 = vsub.f32 %v7586_v34, %v6152_v36  ;;  %v7661_v47 = vsub.f32 %v7587_v48, %v6152_v36 }
 0x373   : > { %v2765_v2 = vmul.f32 %v6288_v22, %v7658_v3  ;;  %2822 = vst [vmem:[%s4373_s11 + $0x20] sm:$0xff] %v2790_v17  ;;  %2823 = vst [vmem:[%s4373_s11 + $0x28] sm:$0xff] %v2791_v27  ;;  %v2794_v40 = vmax.f32 %v2762_v60, 0.0  ;;  %v2795_v0 = vmax.f32 %v2763_v53, 0.0  ;;  %v7663_v48 = vsub.f32 %v7589_v32, %v6152_v36 }
 0x374   : > { %2824 = vst [vmem:[%s4373_s11 + $0x30] sm:$0xff] %v2792_v43  ;;  %v2766_v30 = vmul.f32 %v6288_v22, %v7659_v33  ;;  %v2767_v25 = vmul.f32 %v6288_v22, %v7660_v42  ;;  %v2768_v44 = vmul.f32 %v6288_v22, %v7661_v47  ;;  %v7662_v43 = vsub.f32 %v7588_v23, %v6152_v36 }
 0x375   : > { %v2796_v19 = vmax.f32 %v2764_v18, 0.0  ;;  %v2797_v5 = vmax.f32 %v2765_v2, 0.0  ;;  %2826 = vst [vmem:[%s4373_s11 + $0x40] sm:$0xff] %v2794_v40  ;;  %2827 = vst [vmem:[%s4373_s11 + $0x48] sm:$0xff] %v2795_v0  ;;  %v2770_v23 = vmul.f32 %v6288_v22, %v7663_v48  ;;  %v7664_v17 = vsub.f32 %v7590_v63, %v6152_v36 }
 0x376   : > { %v2769_v61 = vmul.f32 %v6288_v22, %v7662_v43  ;;  %v2798_v34 = vmax.f32 %v2766_v30, 0.0  ;;  %v2799_v12 = vmax.f32 %v2767_v25, 0.0  ;;  %v2800_v16 = vmax.f32 %v2768_v44, 0.0 }
 0x377   : > { %2828 = vst [vmem:[%s4373_s11 + $0x50] sm:$0xff] %v2796_v19  ;;  %2829 = vst [vmem:[%s4373_s11 + $0x58] sm:$0xff] %v2797_v5  ;;  %v2771_v27 = vmul.f32 %v6288_v22, %v7664_v17  ;;  %v7665_v10 = vsub.f32 %v7591_v24, %v6152_v36  ;;  %v7666_v37 = vsub.f32 %v7592_v57, %v6152_v36  ;;  %v2802_v33 = vmax.f32 %v2770_v23, 0.0 }
 0x378   : > { %v2801_v49 = vmax.f32 %v2769_v61, 0.0  ;;  %2830 = vst [vmem:[%s4373_s11 + $0x60] sm:$0xff] %v2798_v34  ;;  %2831 = vst [vmem:[%s4373_s11 + $0x68] sm:$0xff] %v2799_v12  ;;  %v7667_v32 = vsub.f32 %v7593_v4, %v6152_v36  ;;  %v7668_v24 = vsub.f32 %v7594_v41, %v6152_v36  ;;  %v7669_v46 = vsub.f32 %v7595_v7, %v6152_v36 }
 0x379   : > { %v2772_v60 = vmul.f32 %v6288_v22, %v7665_v10  ;;  %v2773_v53 = vmul.f32 %v6288_v22, %v7666_v37  ;;  %2832 = vst [vmem:[%s4373_s11 + $0x70] sm:$0xff] %v2800_v16  ;;  %v7670_v3 = vsub.f32 %v7596_v26, %v6152_v36  ;;  %v2803_v4 = vmax.f32 %v2771_v27, 0.0  ;;  %2834 = vst [vmem:[%s4373_s11 + $0x80] sm:$0xff] %v2802_v33 }
 0x37a   : > { %2833 = vst [vmem:[%s4373_s11 + $0x78] sm:$0xff] %v2801_v49  ;;  %v2774_v63 = vmul.f32 %v6288_v22, %v7667_v32  ;;  %v2775_v57 = vmul.f32 %v6288_v22, %v7668_v24  ;;  %v2776_v18 = vmul.f32 %v6288_v22, %v7669_v46  ;;  %v7671_v7 = vsub.f32 %v7597_v13, %v6152_v36 }
 0x37b   : > { %v2777_v2 = vmul.f32 %v6288_v22, %v7670_v3  ;;  %v2804_v30 = vmax.f32 %v2772_v60, 0.0  ;;  %v2805_v42 = vmax.f32 %v2773_v53, 0.0  ;;  %2835 = vst [vmem:[%s4373_s11 + $0x88] sm:$0xff] %v2803_v4  ;;  %v7672_v43 = vsub.f32 %v7598_v56, %v6152_v36 }
 0x37c   : > { %v2806_v41 = vmax.f32 %v2774_v63, 0.0  ;;  %v2807_v25 = vmax.f32 %v2775_v57, 0.0  ;;  %v2808_v47 = vmax.f32 %v2776_v18, 0.0  ;;  %v2778_v26 = vmul.f32 %v6288_v22, %v7671_v7 }
 0x37d   : > { %v2809_v44 = vmax.f32 %v2777_v2, 0.0  ;;  %2836 = vst [vmem:[%s4373_s11 + $0x90] sm:$0xff] %v2804_v30  ;;  %2837 = vst [vmem:[%s4373_s11 + $0x98] sm:$0xff] %v2805_v42  ;;  %v2779_v61 = vmul.f32 %v6288_v22, %v7672_v43  ;;  %v7673_v40 = vsub.f32 %v7599_v62, %v6152_v36  ;;  %v7674_v19 = vsub.f32 %v7600_v39, %v6152_v36 }
 0x37e   : > { %2838 = vst [vmem:[%s4373_s11 + $0xa0] sm:$0xff] %v2806_v41  ;;  %2839 = vst [vmem:[%s4373_s11 + $0xa8] sm:$0xff] %v2807_v25  ;;  %v7675_v13 = vsub.f32 %v7601_v8, %v6152_v36  ;;  %v7676_v62 = vsub.f32 %v7602_v20, %v6152_v36  ;;  %v7677_v34 = vsub.f32 %v7603_v50, %v6152_v36  ;;  %v2810_v48 = vmax.f32 %v2778_v26, 0.0 }
 0x37f   : > { %v2780_v0 = vmul.f32 %v6288_v22, %v7673_v40  ;;  %v2781_v5 = vmul.f32 %v6288_v22, %v7674_v19  ;;  %2840 = vst [vmem:[%s4373_s11 + $0xb0] sm:$0xff] %v2808_v47  ;;  %2841 = vst [vmem:[%s4373_s11 + $0xb8] sm:$0xff] %v2809_v44  ;;  %v7678_v16 = vsub.f32 %v7604_v21, %v6152_v36  ;;  %v2811_v8 = vmax.f32 %v2779_v61, 0.0  ;;  %v7694_v19 = vld [vmem:[#allocation70_spill] sm:$0xff] }
 0x380   : > { %v2782_v56 = vmul.f32 %v6288_v22, %v7675_v13  ;;  %v2783_v39 = vmul.f32 %v6288_v22, %v7676_v62  ;;  %v2784_v12 = vmul.f32 %v6288_v22, %v7677_v34  ;;  %2842 = vst [vmem:[%s4373_s11 + $0xc0] sm:$0xff] %v2810_v48  ;;  %v7679_v50 = vsub.f32 %v7605_v51, %v6152_v36 }
 0x381   : > { %v2785_v49 = vmul.f32 %v6288_v22, %v7678_v16  ;;  %v2812_v23 = vmax.f32 %v2780_v0, 0.0  ;;  %v2813_v17 = vmax.f32 %v2781_v5, 0.0  ;;  %2843 = vst [vmem:[%s4373_s11 + $0xc8] sm:$0xff] %v2811_v8  ;;  %v7680_v37 = vsub.f32 %v7606_v55, %v6152_v36  ;;  %v7698_v8 = vld [vmem:[#allocation72_spill] sm:$0xff] }
 0x382   : > { %v2814_v20 = vmax.f32 %v2782_v56, 0.0  ;;  %v2815_v27 = vmax.f32 %v2783_v39, 0.0  ;;  %v2816_v10 = vmax.f32 %v2784_v12, 0.0  ;;  %v2882_v21 = vmul.f32 %v7679_v50, %v6288_v22 }
 0x383   : > { %v2817_v60 = vmax.f32 %v2785_v49, 0.0  ;;  %2844 = vst [vmem:[%s4373_s11 + $0xd0] sm:$0xff] %v2812_v23  ;;  %2845 = vst [vmem:[%s4373_s11 + $0xd8] sm:$0xff] %v2813_v17  ;;  %v2883_v53 = vmul.f32 %v7680_v37, %v6288_v22  ;;  %v7681_v32 = vsub.f32 %v7607_v59, %v6152_v36  ;;  %v7682_v24 = vsub.f32 %v7608_v31, %v6152_v36  ;;  %v7704_v37 = vld [vmem:[#allocation31_spill] sm:$0xff] }
 0x384   : > { %2846 = vst [vmem:[%s4373_s11 + $0xe0] sm:$0xff] %v2814_v20  ;;  %2847 = vst [vmem:[%s4373_s11 + $0xe8] sm:$0xff] %v2815_v27  ;;  %v7683_v51 = vsub.f32 %v7609_v1, %v6152_v36  ;;  %v7684_v59 = vsub.f32 %v7610_v29, %v6152_v36  ;;  %v7685_v31 = vsub.f32 %v7611_v35, %v6152_v36  ;;  %v2914_v33 = vmax.f32 %v2882_v21, 0.0  ;;  %v7700_v20 = vld [vmem:[#allocation76_spill] sm:$0xff] }
 0x385   : > { %v2884_v63 = vmul.f32 %v7681_v32, %v6288_v22  ;;  %v2885_v57 = vmul.f32 %v7682_v24, %v6288_v22  ;;  %2848 = vst [vmem:[%s4373_s11 + $0xf0] sm:$0xff] %v2816_v10  ;;  %2849 = vst [vmem:[%s4373_s11 + $0xf8] sm:$0xff] %v2817_v60  ;;  %v7686_v3 = vsub.f32 %v7612_v6, %v6152_v36  ;;  %v2915_v1 = vmax.f32 %v2883_v53, 0.0  ;;  %v7702_v60 = vld [vmem:[#allocation79_spill] sm:$0xff] }
 0x386   : > { %v2886_v55 = vmul.f32 %v7683_v51, %v6288_v22  ;;  %v2887_v46 = vmul.f32 %v7684_v59, %v6288_v22  ;;  %v2888_v18 = vmul.f32 %v7685_v31, %v6288_v22  ;;  %3456 = vst [vmem:[%s4373_s11 + $0x100] sm:$0xff] %v2914_v33  ;;  %v7687_v6 = vsub.f32 %v7613_v45, %v6152_v36  ;;  %v7708_v51 = vld [vmem:[#allocation119_spill] sm:$0xff] }
 0x387   : > { %v2889_v2 = vmul.f32 %v7686_v3, %v6288_v22  ;;  %v2916_v4 = vmax.f32 %v2884_v63, 0.0  ;;  %v2917_v30 = vmax.f32 %v2885_v57, 0.0  ;;  %3457 = vst [vmem:[%s4373_s11 + $0x108] sm:$0xff] %v2915_v1  ;;  %v7688_v47 = vsub.f32 %v7614_v54, %v6152_v36  ;;  %v7706_v63 = vld [vmem:[#allocation117_spill] sm:$0xff] }
 0x388   : > { %v2918_v29 = vmax.f32 %v2886_v55, 0.0  ;;  %v2919_v42 = vmax.f32 %v2887_v46, 0.0  ;;  %v2920_v41 = vmax.f32 %v2888_v18, 0.0  ;;  %v2890_v35 = vmul.f32 %v7687_v6, %v6288_v22  ;;  %v7710_v46 = vld [vmem:[#allocation121_spill] sm:$0xff] }
 0x389   : > { %v2921_v25 = vmax.f32 %v2889_v2, 0.0  ;;  %3458 = vst [vmem:[%s4373_s11 + $0x110] sm:$0xff] %v2916_v4  ;;  %3459 = vst [vmem:[%s4373_s11 + $0x118] sm:$0xff] %v2917_v30  ;;  %v2891_v44 = vmul.f32 %v7688_v47, %v6288_v22  ;;  %v7689_v7 = vsub.f32 %v7615_v28, %v6152_v36  ;;  %v7690_v43 = vsub.f32 %v7616_v58, %v6152_v36 }
 0x38a   : > { %3460 = vst [vmem:[%s4373_s11 + $0x120] sm:$0xff] %v2918_v29  ;;  %3461 = vst [vmem:[%s4373_s11 + $0x128] sm:$0xff] %v2919_v42  ;;  %v7691_v54 = vsub.f32 %v7617_v15, %v6152_v36  ;;  %v7692_v28 = vsub.f32 %v7618_v52, %v6152_v36  ;;  %v7693_v58 = vsub.f32 %v7619_v11, %v6152_v36  ;;  %v2922_v56 = vmax.f32 %v2890_v35, 0.0  ;;  %v7696_v11 = vld [vmem:[#allocation29_spill] sm:$0xff] }
 0x38b   : > { %v2892_v26 = vmul.f32 %v7689_v7, %v6288_v22  ;;  %v2893_v61 = vmul.f32 %v7690_v43, %v6288_v22  ;;  %3462 = vst [vmem:[%s4373_s11 + $0x130] sm:$0xff] %v2920_v41  ;;  %3463 = vst [vmem:[%s4373_s11 + $0x138] sm:$0xff] %v2921_v25  ;;  %v7695_v5 = vsub.f32 %v7694_v19, %v6152_v36  ;;  %v2923_v15 = vmax.f32 %v2891_v44, 0.0  ;;  %v7712_v41 = vld [vmem:[#allocation123_spill] sm:$0xff]  ;;  %v7714_v35 = vld [vmem:[#allocation125_spill] sm:$0xff] }
 0x38c   : > { %v2894_v45 = vmul.f32 %v7691_v54, %v6288_v22  ;;  %v2895_v40 = vmul.f32 %v7692_v28, %v6288_v22  ;;  %v2896_v0 = vmul.f32 %v7693_v58, %v6288_v22  ;;  %3464 = vst [vmem:[%s4373_s11 + $0x140] sm:$0xff] %v2922_v56  ;;  %v7697_v49 = vsub.f32 %v7696_v11, %v6152_v36  ;;  %v7716_v7 = vld [vmem:[#allocation127_spill] sm:$0xff] }
 0x38d   : > { %v2897_v13 = vmul.f32 %v7695_v5, %v6288_v22  ;;  %v2924_v62 = vmax.f32 %v2892_v26, 0.0  ;;  %v2925_v39 = vmax.f32 %v2893_v61, 0.0  ;;  %3465 = vst [vmem:[%s4373_s11 + $0x148] sm:$0xff] %v2923_v15  ;;  %v7699_v23 = vsub.f32 %v7698_v8, %v6152_v36  ;;  %v7718_v61 = vld [vmem:[#allocation129_spill] sm:$0xff]  ;;  %v7720_v28 = vld [vmem:[#allocation131_spill] sm:$0xff] }
 0x38e   : > { %v2926_v52 = vmax.f32 %v2894_v45, 0.0  ;;  %v2927_v34 = vmax.f32 %v2895_v40, 0.0  ;;  %v2928_v12 = vmax.f32 %v2896_v0, 0.0  ;;  %v2898_v48 = vmul.f32 %v7697_v49, %v6288_v22  ;;  %v7722_v0 = vld [vmem:[#allocation133_spill] sm:$0xff] }
 0x38f   : > { %v2929_v16 = vmax.f32 %v2897_v13, 0.0  ;;  %3466 = vst [vmem:[%s4373_s11 + $0x150] sm:$0xff] %v2924_v62  ;;  %3467 = vst [vmem:[%s4373_s11 + $0x158] sm:$0xff] %v2925_v39  ;;  %v2899_v17 = vmul.f32 %v7699_v23, %v6288_v22  ;;  %v7701_v27 = vsub.f32 %v7700_v20, %v6152_v36  ;;  %v7703_v50 = vsub.f32 %v7702_v60, %v6152_v36  ;;  %v7724_v13 = vld [vmem:[#allocation135_spill] sm:$0xff]  ;;  %v7726_v62 = vld [vmem:[#allocation137_spill] sm:$0xff] }
 0x390   : > { %3468 = vst [vmem:[%s4373_s11 + $0x160] sm:$0xff] %v2926_v52  ;;  %3469 = vst [vmem:[%s4373_s11 + $0x168] sm:$0xff] %v2927_v34  ;;  %v7705_v53 = vsub.f32 %v7704_v37, %v6152_v36  ;;  %v7707_v24 = vsub.f32 %v7706_v63, %v6152_v36  ;;  %v7709_v55 = vsub.f32 %v7708_v51, %v6152_v36  ;;  %v2930_v3 = vmax.f32 %v2898_v48, 0.0 }
 0x391   : > { %v2900_v10 = vmul.f32 %v7701_v27, %v6288_v22  ;;  %v2901_v21 = vmul.f32 %v7703_v50, %v6288_v22  ;;  %3470 = vst [vmem:[%s4373_s11 + $0x170] sm:$0xff] %v2928_v12  ;;  %3471 = vst [vmem:[%s4373_s11 + $0x178] sm:$0xff] %v2929_v16  ;;  %v7711_v31 = vsub.f32 %v7710_v46, %v6152_v36  ;;  %v2931_v2 = vmax.f32 %v2899_v17, 0.0  ;;  %v7728_v17 = vld [vmem:[#allocation113_spill] sm:$0xff] }
 0x392   : > { %v2902_v32 = vmul.f32 %v7705_v53, %v6288_v22  ;;  %v2903_v57 = vmul.f32 %v7707_v24, %v6288_v22  ;;  %v2904_v59 = vmul.f32 %v7709_v55, %v6288_v22  ;;  %3472 = vst [vmem:[%s4373_s11 + $0x180] sm:$0xff] %v2930_v3  ;;  %v7713_v25 = vsub.f32 %v7712_v41, %v6152_v36 }
 0x393   : > { %v2905_v18 = vmul.f32 %v7711_v31, %v6288_v22  ;;  %v2932_v33 = vmax.f32 %v2900_v10, 0.0  ;;  %v2933_v1 = vmax.f32 %v2901_v21, 0.0  ;;  %3473 = vst [vmem:[%s4373_s11 + $0x188] sm:$0xff] %v2931_v2  ;;  %v7715_v47 = vsub.f32 %v7714_v35, %v6152_v36 }
 0x394   : > { %v2934_v4 = vmax.f32 %v2902_v32, 0.0  ;;  %v2935_v30 = vmax.f32 %v2903_v57, 0.0  ;;  %v2936_v29 = vmax.f32 %v2904_v59, 0.0  ;;  %v2906_v6 = vmul.f32 %v7713_v25, %v6288_v22  ;;  %v7739_v59 = vld [vmem:[#allocation54_spill] sm:$0xff] }
 0x395   : > { %v2937_v42 = vmax.f32 %v2905_v18, 0.0  ;;  %3474 = vst [vmem:[%s4373_s11 + $0x190] sm:$0xff] %v2932_v33  ;;  %3475 = vst [vmem:[%s4373_s11 + $0x198] sm:$0xff] %v2933_v1  ;;  %v2907_v44 = vmul.f32 %v7715_v47, %v6288_v22  ;;  %v7717_v26 = vsub.f32 %v7716_v7, %v6152_v36  ;;  %v7719_v54 = vsub.f32 %v7718_v61, %v6152_v36  ;;  %v7744_v47 = vld [vmem:[#allocation57_spill] sm:$0xff] }
 0x396   : > { %3476 = vst [vmem:[%s4373_s11 + $0x1a0] sm:$0xff] %v2934_v4  ;;  %3477 = vst [vmem:[%s4373_s11 + $0x1a8] sm:$0xff] %v2935_v30  ;;  %v7721_v40 = vsub.f32 %v7720_v28, %v6152_v36  ;;  %v7723_v19 = vsub.f32 %v7722_v0, %v6152_v36  ;;  %v7725_v56 = vsub.f32 %v7724_v13, %v6152_v36  ;;  %v2938_v34 = vmax.f32 %v2906_v6, 0.0  ;;  %v7743_v6 = vld [vmem:[#allocation53_spill] sm:$0xff] }
 0x397   : > { %v2908_v43 = vmul.f32 %v7717_v26, %v6288_v22  ;;  %v2909_v45 = vmul.f32 %v7719_v54, %v6288_v22  ;;  %3478 = vst [vmem:[%s4373_s11 + $0x1b0] sm:$0xff] %v2936_v29  ;;  %3479 = vst [vmem:[%s4373_s11 + $0x1b8] sm:$0xff] %v2937_v42  ;;  %v7727_v39 = vsub.f32 %v7726_v62, %v6152_v36  ;;  %v2939_v12 = vmax.f32 %v2907_v44, 0.0  ;;  %v7741_v42 = vld [vmem:[#allocation49_spill] sm:$0xff]  ;;  %v7747_v54 = vld [vmem:[#allocation28_spill] sm:$0xff] }
 0x398   : > { %v2910_v58 = vmul.f32 %v7721_v40, %v6288_v22  ;;  %v2911_v5 = vmul.f32 %v7723_v19, %v6288_v22  ;;  %v2912_v15 = vmul.f32 %v7725_v56, %v6288_v22  ;;  %3480 = vst [vmem:[%s4373_s11 + $0x1c0] sm:$0xff] %v2938_v34  ;;  %v7729_v20 = vsub.f32 %v7728_v17, %v6152_v36  ;;  %v7745_v7 = vld [vmem:[#allocation61_spill] sm:$0xff] }
 0x399   : > { %v2913_v52 = vmul.f32 %v7727_v39, %v6288_v22  ;;  %v2940_v16 = vmax.f32 %v2908_v43, 0.0  ;;  %v2941_v11 = vmax.f32 %v2909_v45, 0.0  ;;  %3481 = vst [vmem:[%s4373_s11 + $0x1c8] sm:$0xff] %v2939_v12  ;;  %v7730_v10 = vsub.f32 %v7638_v14, %v6152_v36  ;;  %v7733_v14 = vld [vmem:[#allocation46_spill] sm:$0xff]  ;;  %v7746_v43 = vld [vmem:[#allocation67_spill] sm:$0xff]  ;;  %v7748_v28 = vld [vmem:[#allocation69_spill] sm:$0xff] }
 0x39a   : > { %v2942_v49 = vmax.f32 %v2910_v58, 0.0  ;;  %v2943_v48 = vmax.f32 %v2911_v5, 0.0  ;;  %v2944_v8 = vmax.f32 %v2912_v15, 0.0  ;;  %v3009_v27 = vmul.f32 %v7729_v20, %v6288_v22  ;;  %v7749_v58 = vld [vmem:[#allocation73_spill] sm:$0xff] }
 0x39b   : > { %v2945_v23 = vmax.f32 %v2913_v52, 0.0  ;;  %3482 = vst [vmem:[%s4373_s11 + $0x1d0] sm:$0xff] %v2940_v16  ;;  %3483 = vst [vmem:[%s4373_s11 + $0x1d8] sm:$0xff] %v2941_v11  ;;  %v3010_v60 = vmul.f32 %v7730_v10, %v6288_v22  ;;  %v7731_v50 = vsub.f32 %v7640_v9, %v6152_v36  ;;  %v7732_v37 = vsub.f32 %v7641_v38, %v6152_v36  ;;  %v7735_v9 = vld [vmem:[#allocation41_spill] sm:$0xff]  ;;  %v7737_v38 = vld [vmem:[#allocation47_spill] sm:$0xff] }
 0x39c   : > { %3484 = vst [vmem:[%s4373_s11 + $0x1e0] sm:$0xff] %v2942_v49  ;;  %3485 = vst [vmem:[%s4373_s11 + $0x1e8] sm:$0xff] %v2943_v48  ;;  %v7734_v32 = vsub.f32 %v7733_v14, %v6152_v36  ;;  %v7736_v24 = vsub.f32 %v7735_v9, %v6152_v36  ;;  %v7738_v51 = vsub.f32 %v7737_v38, %v6152_v36  ;;  %v3039_v18 = vmax.f32 %v3009_v27, 0.0  ;;  %v7750_v11 = vld [vmem:[#allocation30_spill] sm:$0xff]  ;;  %v7751_v27 = vld [vmem:[#allocation75_spill] sm:$0xff] }
 0x39d   : > { %v3011_v21 = vmul.f32 %v7731_v50, %v6288_v22  ;;  %v3012_v53 = vmul.f32 %v7732_v37, %v6288_v22  ;;  %3486 = vst [vmem:[%s4373_s11 + $0x1f0] sm:$0xff] %v2944_v8  ;;  %3487 = vst [vmem:[%s4373_s11 + $0x1f8] sm:$0xff] %v2945_v23  ;;  %v7740_v46 = vsub.f32 %v7739_v59, %v6152_v36  ;;  %v3040_v3 = vmax.f32 %v3010_v60, 0.0  ;;  %v7752_v60 = vld [vmem:[#allocation78_spill] sm:$0xff] }
 0x39e   : > { %v3013_v63 = vmul.f32 %v7734_v32, %v6288_v22  ;;  %v3014_v57 = vmul.f32 %v7736_v24, %v6288_v22  ;;  %v3015_v55 = vmul.f32 %v7738_v51, %v6288_v22  ;;  %3488 = vst [vmem:[%s4373_s11 + $0x200] sm:$0xff] %v3039_v18  ;;  %v7742_v41 = vsub.f32 %v7741_v42, %v6152_v36  ;;  %v7755_v32 = vld [vmem:[#allocation120_spill] sm:$0xff]  ;;  %v7756_v9 = vld [vmem:[#allocation122_spill] sm:$0xff] }
 0x39f   : > { %v3016_v31 = vmul.f32 %v7740_v46, %v6288_v22  ;;  %v3041_v2 = vmax.f32 %v3011_v21, 0.0  ;;  %v3042_v33 = vmax.f32 %v3012_v53, 0.0  ;;  %3489 = vst [vmem:[%s4373_s11 + $0x208] sm:$0xff] %v3040_v3  ;;  %v2988_v35 = vsub.f32 %v7743_v6, %v6152_v36  ;;  %v7753_v21 = vld [vmem:[#allocation81_spill] sm:$0xff]  ;;  %v7754_v53 = vld [vmem:[#allocation118_spill] sm:$0xff] }
 0x3a0   : > { %v3043_v1 = vmax.f32 %v3013_v63, 0.0  ;;  %v3044_v4 = vmax.f32 %v3014_v57, 0.0  ;;  %v3045_v30 = vmax.f32 %v3015_v55, 0.0  ;;  %v3017_v25 = vmul.f32 %v7742_v41, %v6288_v22  ;;  %v7757_v57 = vld [vmem:[#allocation124_spill] sm:$0xff] }
 0x3a1   : > { %v3046_v29 = vmax.f32 %v3016_v31, 0.0  ;;  %3490 = vst [vmem:[%s4373_s11 + $0x210] sm:$0xff] %v3041_v2  ;;  %3491 = vst [vmem:[%s4373_s11 + $0x218] sm:$0xff] %v3042_v33  ;;  %v2989_v44 = vsub.f32 %v7744_v47, %v6152_v36  ;;  %v2990_v26 = vsub.f32 %v7745_v7, %v6152_v36  ;;  %v2991_v61 = vsub.f32 %v7746_v43, %v6152_v36  ;;  %v7759_v47 = vld [vmem:[#allocation128_spill] sm:$0xff]  ;;  %v7760_v7 = vld [vmem:[#allocation130_spill] sm:$0xff] }
 0x3a2   : > { %3492 = vst [vmem:[%s4373_s11 + $0x220] sm:$0xff] %v3043_v1  ;;  %3493 = vst [vmem:[%s4373_s11 + $0x228] sm:$0xff] %v3044_v4  ;;  %v2992_v45 = vsub.f32 %v7747_v54, %v6152_v36  ;;  %v2993_v40 = vsub.f32 %v7748_v28, %v6152_v36  ;;  %v2994_v0 = vsub.f32 %v7749_v58, %v6152_v36  ;;  %v3047_v19 = vmax.f32 %v3017_v25, 0.0  ;;  %v7761_v43 = vld [vmem:[#allocation132_spill] sm:$0xff]  ;;  %v7762_v54 = vld [vmem:[#allocation134_spill] sm:$0xff] }
 0x3a3   : > { %3494 = vst [vmem:[%s4373_s11 + $0x230] sm:$0xff] %v3045_v30  ;;  %3495 = vst [vmem:[%s4373_s11 + $0x238] sm:$0xff] %v3046_v29  ;;  %v3018_v5 = vmul.f32 %v2988_v35, %v6288_v22  ;;  %v3019_v13 = vmul.f32 %v2989_v44, %v6288_v22  ;;  %v3020_v56 = vmul.f32 %v2990_v26, %v6288_v22  ;;  %v7758_v30 = vld [vmem:[#allocation126_spill] sm:$0xff]  ;;  %v7763_v28 = vld [vmem:[#allocation136_spill] sm:$0xff] }
 0x3a4   : > { %v3021_v15 = vmul.f32 %v2991_v61, %v6288_v22  ;;  %v3022_v62 = vmul.f32 %v2992_v45, %v6288_v22  ;;  %v3023_v39 = vmul.f32 %v2993_v40, %v6288_v22  ;;  %v3024_v52 = vmul.f32 %v2994_v0, %v6288_v22  ;;  %3496 = vst [vmem:[%s4373_s11 + $0x240] sm:$0xff] %v3047_v19  ;;  %v7764_v58 = vld [vmem:[#allocation141_spill] sm:$0xff]  ;;  %v7765_v19 = vld [vmem:[#allocation139_spill] sm:$0xff] }
 0x3a5   : > { %v3048_v34 = vmax.f32 %v3018_v5, 0.0  ;;  %v3049_v12 = vmax.f32 %v3019_v13, 0.0  ;;  %v3050_v16 = vmax.f32 %v3020_v56, 0.0  ;;  %v2995_v49 = vsub.f32 %v7750_v11, %v6152_v36 }
 0x3a6   : > { %v3051_v48 = vmax.f32 %v3021_v15, 0.0  ;;  %v3052_v8 = vmax.f32 %v3022_v62, 0.0  ;;  %v3053_v23 = vmax.f32 %v3023_v39, 0.0  ;;  %v3054_v17 = vmax.f32 %v3024_v52, 0.0 }
 0x3a7   : > { %3497 = vst [vmem:[%s4373_s11 + $0x248] sm:$0xff] %v3048_v34  ;;  %3498 = vst [vmem:[%s4373_s11 + $0x250] sm:$0xff] %v3049_v12  ;;  %v3025_v20 = vmul.f32 %v2995_v49, %v6288_v22  ;;  %v2996_v10 = vsub.f32 %v7751_v27, %v6152_v36  ;;  %v2997_v50 = vsub.f32 %v7752_v60, %v6152_v36  ;;  %v7767_v60 = vld [vmem:[#allocation142_spill] sm:$0xff] }
 0x3a8   : > { %3499 = vst [vmem:[%s4373_s11 + $0x258] sm:$0xff] %v3050_v16  ;;  %v2998_v37 = vsub.f32 %v7753_v21, %v6152_v36  ;;  %3500 = vst [vmem:[%s4373_s11 + $0x260] sm:$0xff] %v3051_v48  ;;  %v2999_v14 = vsub.f32 %v7754_v53, %v6152_v36  ;;  %v3000_v63 = vsub.f32 %v7755_v32, %v6152_v36  ;;  %v7766_v48 = vld [vmem:[#allocation143_spill] sm:$0xff]  ;;  %v7768_v21 = vld [vmem:[#allocation145_spill] sm:$0xff] }
 0x3a9   : > { %3501 = vst [vmem:[%s4373_s11 + $0x268] sm:$0xff] %v3052_v8  ;;  %3502 = vst [vmem:[%s4373_s11 + $0x270] sm:$0xff] %v3053_v23  ;;  %v3001_v24 = vsub.f32 %v7756_v9, %v6152_v36  ;;  %v3002_v38 = vsub.f32 %v7757_v57, %v6152_v36  ;;  %v3055_v51 = vmax.f32 %v3025_v20, 0.0  ;;  %v3026_v55 = vmul.f32 %v2996_v10, %v6288_v22  ;;  %v7769_v53 = vld [vmem:[#allocation144_spill] sm:$0xff]  ;;  %v7770_v32 = vld [vmem:[#allocation147_spill] sm:$0xff] }
 0x3aa   : > { %3503 = vst [vmem:[%s4373_s11 + $0x278] sm:$0xff] %v3054_v17  ;;  %v3027_v59 = vmul.f32 %v2997_v50, %v6288_v22  ;;  %v3028_v46 = vmul.f32 %v2998_v37, %v6288_v22  ;;  %v3029_v31 = vmul.f32 %v2999_v14, %v6288_v22  ;;  %v3030_v18 = vmul.f32 %v3000_v63, %v6288_v22  ;;  %v7771_v9 = vld [vmem:[#allocation146_spill] sm:$0xff]  ;;  %v7772_v57 = vld [vmem:[#allocation55_spill] sm:$0xff] }
 0x3ab   : > { %v3031_v3 = vmul.f32 %v3001_v24, %v6288_v22  ;;  %v3032_v2 = vmul.f32 %v3002_v38, %v6288_v22  ;;  %3504 = vst [vmem:[%s4373_s11 + $0x280] sm:$0xff] %v3055_v51  ;;  %v3056_v33 = vmax.f32 %v3026_v55, 0.0  ;;  %v3003_v29 = vsub.f32 %v7758_v30, %v6152_v36  ;;  %v7773_v51 = vld [vmem:[#allocation59_spill] sm:$0xff] }
 0x3ac   : > { %v3057_v1 = vmax.f32 %v3027_v59, 0.0  ;;  %v3058_v4 = vmax.f32 %v3028_v46, 0.0  ;;  %v3059_v42 = vmax.f32 %v3029_v31, 0.0  ;;  %v3060_v41 = vmax.f32 %v3030_v18, 0.0 }
 0x3ad   : > { %v3061_v25 = vmax.f32 %v3031_v3, 0.0  ;;  %v3062_v6 = vmax.f32 %v3032_v2, 0.0  ;;  %3505 = vst [vmem:[%s4373_s11 + $0x288] sm:$0xff] %v3056_v33  ;;  %v3033_v35 = vmul.f32 %v3003_v29, %v6288_v22  ;;  %v3004_v44 = vsub.f32 %v7759_v47, %v6152_v36 }
 0x3ae   : > { %3506 = vst [vmem:[%s4373_s11 + $0x290] sm:$0xff] %v3057_v1  ;;  %3507 = vst [vmem:[%s4373_s11 + $0x298] sm:$0xff] %v3058_v4  ;;  %v3005_v26 = vsub.f32 %v7760_v7, %v6152_v36  ;;  %v3006_v61 = vsub.f32 %v7761_v43, %v6152_v36  ;;  %v3007_v45 = vsub.f32 %v7762_v54, %v6152_v36  ;;  %v7775_v7 = vld [vmem:[#allocation148_spill] sm:$0xff]  ;;  %v7776_v43 = vld [vmem:[#allocation110_spill] sm:$0xff] }
 0x3af   : > { %3508 = vst [vmem:[%s4373_s11 + $0x2a0] sm:$0xff] %v3059_v42  ;;  %3509 = vst [vmem:[%s4373_s11 + $0x2a8] sm:$0xff] %v3060_v41  ;;  %v3008_v40 = vsub.f32 %v7763_v28, %v6152_v36  ;;  %v3100_v0 = vsub.f32 %v7764_v58, %v6152_v36  ;;  %v3101_v5 = vsub.f32 %v7765_v19, %v6152_v36  ;;  %v3063_v13 = vmax.f32 %v3033_v35, 0.0  ;;  %v7774_v42 = vld [vmem:[#allocation63_spill] sm:$0xff]  ;;  %v7777_v54 = vld [vmem:[#allocation149_spill] sm:$0xff] }
 0x3b0   : > { %3510 = vst [vmem:[%s4373_s11 + $0x2b0] sm:$0xff] %v3061_v25  ;;  %3511 = vst [vmem:[%s4373_s11 + $0x2b8] sm:$0xff] %v3062_v6  ;;  %v3034_v56 = vmul.f32 %v3004_v44, %v6288_v22  ;;  %v3035_v15 = vmul.f32 %v3005_v26, %v6288_v22  ;;  %v3036_v62 = vmul.f32 %v3006_v61, %v6288_v22  ;;  %v7778_v28 = vld [vmem:[#allocation151_spill] sm:$0xff]  ;;  %v7779_v58 = vld [vmem:[#allocation108_spill] sm:$0xff] }
 0x3b1   : > { %v3037_v39 = vmul.f32 %v3007_v45, %v6288_v22  ;;  %v3038_v52 = vmul.f32 %v3008_v40, %v6288_v22  ;;  %v3130_v34 = vmul.f32 %v3100_v0, %v6288_v22  ;;  %v3131_v12 = vmul.f32 %v3101_v5, %v6288_v22  ;;  %3512 = vst [vmem:[%s4373_s11 + $0x2c0] sm:$0xff] %v3063_v13  ;;  %v7780_v19 = vld [vmem:[#allocation84_spill] sm:$0xff]  ;;  %v7781_v13 = vld [vmem:[#allocation86_spill] sm:$0xff] }
 0x3b2   : > { %v3064_v16 = vmax.f32 %v3034_v56, 0.0  ;;  %v3065_v11 = vmax.f32 %v3035_v15, 0.0  ;;  %v3066_v49 = vmax.f32 %v3036_v62, 0.0  ;;  %v3102_v8 = vsub.f32 %v7766_v48, %v6152_v36 }
 0x3b3   : > { %v3067_v23 = vmax.f32 %v3037_v39, 0.0  ;;  %v3068_v17 = vmax.f32 %v3038_v52, 0.0  ;;  %v3160_v20 = vmax.f32 %v3130_v34, 0.0  ;;  %v3161_v27 = vmax.f32 %v3131_v12, 0.0 }
 0x3b4   : > { %3513 = vst [vmem:[%s4373_s11 + $0x2c8] sm:$0xff] %v3064_v16  ;;  %3514 = vst [vmem:[%s4373_s11 + $0x2d0] sm:$0xff] %v3065_v11  ;;  %v3132_v10 = vmul.f32 %v3102_v8, %v6288_v22  ;;  %v3103_v50 = vsub.f32 %v7767_v60, %v6152_v36  ;;  %v3104_v37 = vsub.f32 %v7768_v21, %v6152_v36  ;;  %v7783_v21 = vld [vmem:[#allocation90_spill] sm:$0xff] }
 0x3b5   : > { %3515 = vst [vmem:[%s4373_s11 + $0x2d8] sm:$0xff] %v3066_v49  ;;  %v3105_v14 = vsub.f32 %v7769_v53, %v6152_v36  ;;  %3516 = vst [vmem:[%s4373_s11 + $0x2e0] sm:$0xff] %v3067_v23  ;;  %v3106_v63 = vsub.f32 %v7770_v32, %v6152_v36  ;;  %v3107_v24 = vsub.f32 %v7771_v9, %v6152_v36  ;;  %v7782_v23 = vld [vmem:[#allocation88_spill] sm:$0xff]  ;;  %v7785_v32 = vld [vmem:[#allocation94_spill] sm:$0xff] }
 0x3b6   : > { %3517 = vst [vmem:[%s4373_s11 + $0x2e8] sm:$0xff] %v3068_v17  ;;  %3518 = vst [vmem:[%s4373_s11 + $0x300] sm:$0xff] %v3160_v20  ;;  %v3108_v38 = vsub.f32 %v7772_v57, %v6152_v36  ;;  %v3109_v55 = vsub.f32 %v7773_v51, %v6152_v36  ;;  %v3162_v59 = vmax.f32 %v3132_v10, 0.0  ;;  %v3133_v46 = vmul.f32 %v3103_v50, %v6288_v22  ;;  %v7784_v53 = vld [vmem:[#allocation92_spill] sm:$0xff]  ;;  %v7787_v57 = vld [vmem:[#allocation98_spill] sm:$0xff] }
 0x3b7   : > { %3519 = vst [vmem:[%s4373_s11 + $0x308] sm:$0xff] %v3161_v27  ;;  %v3134_v31 = vmul.f32 %v3104_v37, %v6288_v22  ;;  %v3135_v18 = vmul.f32 %v3105_v14, %v6288_v22  ;;  %v3136_v3 = vmul.f32 %v3106_v63, %v6288_v22  ;;  %v3137_v2 = vmul.f32 %v3107_v24, %v6288_v22  ;;  %v7786_v9 = vld [vmem:[#allocation96_spill] sm:$0xff] }
 0x3b8   : > { %v3138_v33 = vmul.f32 %v3108_v38, %v6288_v22  ;;  %v3139_v1 = vmul.f32 %v3109_v55, %v6288_v22  ;;  %3520 = vst [vmem:[%s4373_s11 + $0x310] sm:$0xff] %v3162_v59  ;;  %v3163_v4 = vmax.f32 %v3133_v46, 0.0  ;;  %v3110_v41 = vsub.f32 %v7774_v42, %v6152_v36  ;;  %v7788_v51 = vld [vmem:[#allocation100_spill] sm:$0xff]  ;;  %v7789_v59 = vld [vmem:[#allocation102_spill] sm:$0xff] }
 0x3b9   : > { %v3164_v30 = vmax.f32 %v3134_v31, 0.0  ;;  %v3165_v29 = vmax.f32 %v3135_v18, 0.0  ;;  %v3166_v25 = vmax.f32 %v3136_v3, 0.0  ;;  %v3167_v6 = vmax.f32 %v3137_v2, 0.0 }
 0x3ba   : > { %v3168_v35 = vmax.f32 %v3138_v33, 0.0  ;;  %v3169_v47 = vmax.f32 %v3139_v1, 0.0  ;;  %3521 = vst [vmem:[%s4373_s11 + $0x318] sm:$0xff] %v3163_v4  ;;  %v3140_v44 = vmul.f32 %v3110_v41, %v6288_v22  ;;  %v3111_v26 = vsub.f32 %v7775_v7, %v6152_v36 }
 0x3bb   : > { %3522 = vst [vmem:[%s4373_s11 + $0x320] sm:$0xff] %v3164_v30  ;;  %3523 = vst [vmem:[%s4373_s11 + $0x328] sm:$0xff] %v3165_v29  ;;  %v3112_v61 = vsub.f32 %v7776_v43, %v6152_v36  ;;  %v3113_v45 = vsub.f32 %v7777_v54, %v6152_v36  ;;  %v3114_v40 = vsub.f32 %v7778_v28, %v6152_v36  ;;  %v7791_v43 = vld [vmem:[#allocation106_spill] sm:$0xff]  ;;  %v7793_v28 = vld [vmem:[#allocation153_spill] sm:$0xff] }
 0x3bc   : > { %3524 = vst [vmem:[%s4373_s11 + $0x330] sm:$0xff] %v3166_v25  ;;  %3525 = vst [vmem:[%s4373_s11 + $0x338] sm:$0xff] %v3167_v6  ;;  %v3115_v0 = vsub.f32 %v7779_v58, %v6152_v36  ;;  %v3116_v5 = vsub.f32 %v7780_v19, %v6152_v36  ;;  %v3117_v56 = vsub.f32 %v7781_v13, %v6152_v36  ;;  %v3170_v15 = vmax.f32 %v3140_v44, 0.0  ;;  %v7790_v25 = vld [vmem:[#allocation104_spill] sm:$0xff]  ;;  %v7792_v54 = vld [vmem:[#allocation154_spill] sm:$0xff] }
 0x3bd   : > { %3526 = vst [vmem:[%s4373_s11 + $0x340] sm:$0xff] %v3168_v35  ;;  %3527 = vst [vmem:[%s4373_s11 + $0x348] sm:$0xff] %v3169_v47  ;;  %v3141_v62 = vmul.f32 %v3111_v26, %v6288_v22  ;;  %v3142_v39 = vmul.f32 %v3112_v61, %v6288_v22  ;;  %v3143_v52 = vmul.f32 %v3113_v45, %v6288_v22  ;;  %v7794_v58 = vld [vmem:[#allocation138_spill] sm:$0xff]  ;;  %v7795_v19 = vld [vmem:[#allocation140_spill] sm:$0xff] }
 0x3be   : > { %v3144_v34 = vmul.f32 %v3114_v40, %v6288_v22  ;;  %v3145_v12 = vmul.f32 %v3115_v0, %v6288_v22  ;;  %v3146_v16 = vmul.f32 %v3116_v5, %v6288_v22  ;;  %v3147_v11 = vmul.f32 %v3117_v56, %v6288_v22  ;;  %3528 = vst [vmem:[%s4373_s11 + $0x350] sm:$0xff] %v3170_v15  ;;  %v7796_v13 = vld [vmem:[#allocation152_spill] sm:$0xff]  ;;  %v7797_v15 = vld [vmem:[#allocation150_spill] sm:$0xff] }
 0x3bf   : > { %v3171_v49 = vmax.f32 %v3141_v62, 0.0  ;;  %v3172_v48 = vmax.f32 %v3142_v39, 0.0  ;;  %v3173_v8 = vmax.f32 %v3143_v52, 0.0  ;;  %v3118_v17 = vsub.f32 %v7782_v23, %v6152_v36 }
 0x3c0   : > { %v3174_v20 = vmax.f32 %v3144_v34, 0.0  ;;  %v3175_v27 = vmax.f32 %v3145_v12, 0.0  ;;  %v3176_v10 = vmax.f32 %v3146_v16, 0.0  ;;  %v3177_v60 = vmax.f32 %v3147_v11, 0.0 }
 0x3c1   : > { %3529 = vst [vmem:[%s4373_s11 + $0x358] sm:$0xff] %v3171_v49  ;;  %3530 = vst [vmem:[%s4373_s11 + $0x360] sm:$0xff] %v3172_v48  ;;  %v3148_v50 = vmul.f32 %v3118_v17, %v6288_v22  ;;  %v3119_v37 = vsub.f32 %v7783_v21, %v6152_v36  ;;  %v3120_v14 = vsub.f32 %v7784_v53, %v6152_v36 }
 0x3c2   : > { %3531 = vst [vmem:[%s4373_s11 + $0x368] sm:$0xff] %v3173_v8  ;;  %v3121_v63 = vsub.f32 %v7785_v32, %v6152_v36  ;;  %3532 = vst [vmem:[%s4373_s11 + $0x370] sm:$0xff] %v3174_v20  ;;  %v3122_v24 = vsub.f32 %v7786_v9, %v6152_v36  ;;  %v3123_v38 = vsub.f32 %v7787_v57, %v6152_v36 }
 0x3c3   : > { %3533 = vst [vmem:[%s4373_s11 + $0x378] sm:$0xff] %v3175_v27  ;;  %3534 = vst [vmem:[%s4373_s11 + $0x380] sm:$0xff] %v3176_v10  ;;  %v3124_v55 = vsub.f32 %v7788_v51, %v6152_v36  ;;  %v3125_v46 = vsub.f32 %v7789_v59, %v6152_v36  ;;  %v3178_v31 = vmax.f32 %v3148_v50, 0.0  ;;  %v3149_v18 = vmul.f32 %v3119_v37, %v6288_v22 }
 0x3c4   : > { %3535 = vst [vmem:[%s4373_s11 + $0x388] sm:$0xff] %v3177_v60  ;;  %v3150_v3 = vmul.f32 %v3120_v14, %v6288_v22  ;;  %v3151_v2 = vmul.f32 %v3121_v63, %v6288_v22  ;;  %v3152_v33 = vmul.f32 %v3122_v24, %v6288_v22  ;;  %v3153_v1 = vmul.f32 %v3123_v38, %v6288_v22 }
 0x3c5   : > { %v3154_v4 = vmul.f32 %v3124_v55, %v6288_v22  ;;  %v3155_v30 = vmul.f32 %v3125_v46, %v6288_v22  ;;  %3536 = vst [vmem:[%s4373_s11 + $0x390] sm:$0xff] %v3178_v31  ;;  %v3179_v29 = vmax.f32 %v3149_v18, 0.0  ;;  %v3126_v6 = vsub.f32 %v7790_v25, %v6152_v36 }
 0x3c6   : > { %v3180_v42 = vmax.f32 %v3150_v3, 0.0  ;;  %v3181_v41 = vmax.f32 %v3151_v2, 0.0  ;;  %v3182_v35 = vmax.f32 %v3152_v33, 0.0  ;;  %v3183_v47 = vmax.f32 %v3153_v1, 0.0 }
 0x3c7   : > { %v3184_v44 = vmax.f32 %v3154_v4, 0.0  ;;  %v3185_v7 = vmax.f32 %v3155_v30, 0.0  ;;  %3537 = vst [vmem:[%s4373_s11 + $0x398] sm:$0xff] %v3179_v29  ;;  %v3156_v26 = vmul.f32 %v3126_v6, %v6288_v22  ;;  %v3127_v61 = vsub.f32 %v7791_v43, %v6152_v36 }
 0x3c8   : > { %3538 = vst [vmem:[%s4373_s11 + $0x3a0] sm:$0xff] %v3180_v42  ;;  %3539 = vst [vmem:[%s4373_s11 + $0x3a8] sm:$0xff] %v3181_v41  ;;  %v3128_v45 = vsub.f32 %v7792_v54, %v6152_v36  ;;  %v3129_v40 = vsub.f32 %v7793_v28, %v6152_v36  ;;  %v3221_v0 = vsub.f32 %v7794_v58, %v6152_v36 }
 0x3c9   : > { %3540 = vst [vmem:[%s4373_s11 + $0x3b0] sm:$0xff] %v3182_v35  ;;  %3541 = vst [vmem:[%s4373_s11 + $0x3b8] sm:$0xff] %v3183_v47  ;;  %v3222_v5 = vsub.f32 %v7795_v19, %v6152_v36  ;;  %v3229_v56 = vsub.f32 %v7796_v13, %v6152_v36  ;;  %v3230_v62 = vsub.f32 %v7797_v15, %v6152_v36  ;;  %v3186_v39 = vmax.f32 %v3156_v26, 0.0 }
 0x3ca   : > { %3542 = vst [vmem:[%s4373_s11 + $0x3c0] sm:$0xff] %v3184_v44  ;;  %3543 = vst [vmem:[%s4373_s11 + $0x3c8] sm:$0xff] %v3185_v7  ;;  %v3157_v52 = vmul.f32 %v3127_v61, %v6288_v22  ;;  %v3158_v34 = vmul.f32 %v3128_v45, %v6288_v22  ;;  %v3159_v12 = vmul.f32 %v3129_v40, %v6288_v22 }
 0x3cb   : > { %v3223_v16 = vmul.f32 %v3221_v0, %v6288_v22  ;;  %v3224_v11 = vmul.f32 %v3222_v5, %v6288_v22  ;;  %v3231_v49 = vmul.f32 %v3229_v56, %v6288_v22  ;;  %v3232_v36 = vmul.f32 %v3230_v62, %v6288_v22  ;;  %3544 = vst [vmem:[%s4373_s11 + $0x3d0] sm:$0xff] %v3186_v39 }
 0x3cc   : > { %v3187_v48 = vmax.f32 %v3157_v52, 0.0  ;;  %v3188_v8 = vmax.f32 %v3158_v34, 0.0  ;;  %v3189_v23 = vmax.f32 %v3159_v12, 0.0 }
 0x3cd   : > { %v3225_v17 = vmax.f32 %v3223_v16, 0.0  ;;  %v3226_v20 = vmax.f32 %v3224_v11, 0.0  ;;  %v3233_v27 = vmax.f32 %v3231_v49, 0.0  ;;  %v3234_v10 = vmax.f32 %v3232_v36, 0.0 }
 0x3ce   : > { %3545 = vst [vmem:[%s4373_s11 + $0x3d8] sm:$0xff] %v3187_v48  ;;  %3546 = vst [vmem:[%s4373_s11 + $0x3e0] sm:$0xff] %v3188_v8 }
 0x3cf   : > { %3547 = vst [vmem:[%s4373_s11 + $0x3e8] sm:$0xff] %v3189_v23  ;;  %3548 = vst [vmem:[%s4373_s11 + $0x2f0] sm:$0xff] %v3225_v17 }
 0x3d0   : > { %3549 = vst [vmem:[%s4373_s11 + $0x2f8] sm:$0xff] %v3226_v20  ;;  %3550 = vst [vmem:[%s4373_s11 + $0x3f0] sm:$0xff] %v3233_v27 }
 0x3d1   : > { %3551 = vst [vmem:[%s4373_s11 + $0x3f8] sm:$0xff] %v3234_v10 }
 0x3d2 PF: > { %s3558_s21 = sshll.u32 %s4092_s22, 14  ;;  %s3254_s29 = sshll.u32 %s4373_s11, 4  ;;  %s6896_s29 = int_to_ptr.vmem [resolvable:$true] %s3254_s29 }
 0x3d3   : > { %s6893_s0 = scalar_lea.hbm %s6954_s5, %s3558_s21  ;;  %s3238_s23 = scalar_lea.sflag [#allocation6], %s4341_s1 }
 0x3d4   : > { %s3996_s15 = scalar_lea.vmem %s6896_s29, 16384  ;;  %p7798_p5 = scmp.ne.s32.totalorder %s7182_s6, 0 }
 0x3d5   : > { %p3997_p8 = scmp.ne.s32.totalorder %s6896_s29, %s3996_s15  ;;  %s4117_s16 = smov [#allocation13]  }
 0x3d6   : > { %s4000_s27 = sshll.u32 %s4117_s16, 4  ;;  %s4001_s27 = int_to_ptr.vmem [resolvable:$false] %s4000_s27 }
 0x3d7   : > { %p3998_p4 = pnand %p3997_p8, %p7798_p5  ;;  %s4002_s22 = scalar_lea.vmem %s4001_s27, 32768 }
 0x3d8   : > { %p4003_p10 = scmp.lt.s32.totalorder %s6896_s29, %s4001_s27  ;;  %p4004_p11 = scmp.lt.s32.totalorder %s4002_s22, %s3996_s15 }
 0x3d9   : > { %p3999_p6 = pneg %p3998_p4 }
 0x3da   : > { %p4005_p13 = por %p4004_p11, %p4003_p10 }
 0x3dc   : > { %p4006_p9 = pnand %p4005_p13, %p3999_p6 }
 0x3de   : > { %4009 = shalt.err (!%p4006_p9)
}
 0x3df   : > { %s4010_s28 = scalar_lea.hbm %s6893_s0, 16384  ;;  %s4014_s14 = scalar_lea.hbm %s6954_s5, 32768 }
 0x3e0   : > { %p4011_p0 = scmp.ne.s32.totalorder %s6893_s0, %s4010_s28  ;;  %p4015_p12 = scmp.lt.s32.totalorder %s6893_s0, %s6954_s5 }
 0x3e1   : > { %p4016_p3 = scmp.lt.s32.totalorder %s4014_s14, %s4010_s28 }
 0x3e2   : > { %p4012_p1 = pnand %p4011_p0, %p7798_p5 }
 0x3e3   : > { %p4017_p7 = por %p4016_p3, %p4015_p12 }
 0x3e4   : > { %p4013_p2 = pneg %p4012_p1 }
 0x3e6   : > { %p4018_p8 = pnand %p4017_p7, %p4013_p2 }
 0x3e8   : > { %4021 = shalt.err (!%p4018_p8)
}
 0x3e9   : > { %s4118_s8 = smov 128   ;;  %s4119_s4 = smov 8  }
 0x3ea   : > { %3754 = dma.vmem_to_hbm [thread:$0]  (%p7798_p5), %s6896_s29, 16384, %s6893_s0, %s3238_s23, %s4118_s8, %s4118_s8, %s4119_s4  }
 0x3eb PF: > { %s7799_s13 = sld [smem:[#allocation19_spill]]  ;;  %p3780_p4 = scmp.ge.s32.totalorder %s4104_s25, 2 }
 0x3ec   : > { %s7800_s24 = sld [smem:[#allocation23_spill]] }
 0x3f1   : > { %s3269_s12 = sand.u32 1, %s7799_s13  }
 0x3f2   : > { %p7801_p6 = scmp.ne.s32.totalorder %s7800_s24, 0  ;;  %s3270_s10 = scalar_lea.sflag [#allocation6], %s3269_s12 }
 0x3f4   : > { %p3774_p10 = pnand %p3780_p4, %p7801_p6 }
 0x3f6   : > { %p3775_p11 = pneg %p3774_p10 }
 0x3f8   : > { %4071 = dma.done.wait (%p3775_p11), %s3270_s10, 16384  }
 0x3f9   : > { %4073 = vsyncadd (%p3775_p11), %s3270_s10, 4294950912  ;;  %s27_s25 = sadd.s32 1, %s4104_s25   ;;  %s7802_s11 = sld [smem:[#allocation20_spill]] }
 0x3fa   : > { %p24_p13 = scmp.ge.s32.totalorder %s27_s25, 6   ;;  %s7803_s20 = sld [smem:[#allocation26_spill]] }
 0x3fb   : > { %s7804_s21 = sld [smem:[#allocation21_spill]]  ;;  %s7808_s18 = smov %s4080_s19 }
 0x3fc   : > { %s7805_s22 = sld [smem:[#allocation22_spill]]  ;;  %26 = sbr.rel (!%p24_p13) target bundleno = 15 (0xf), region = 141 }
 0x3fd   : > { %s7806_s23 = sld [smem:[#allocation24_spill]] }
 0x3fe   : > { %s7807_s24 = sld [smem:[#allocation25_spill]] }
 0x3ff   : > { %s7809_s19 = smov %s7802_s11 }
 0x401   :  { %3275 = vsyncpa [#allocation5], 1 }
 0x402   :  { %3277 = vsyncpa [#allocation5 + $0x1], 1 }
 0x403   :  { %3278 = vsyncpa [#allocation8], 1 }
 0x404   :  { %3280 = vsyncpa [#allocation8 + $0x1], 1 }
 0x405   :  { %3281 = vsyncpa [#allocation11], 1 }
 0x406   :  { %3283 = vsyncpa [#allocation11 + $0x1], 1 }
 0x407   :  { %3284 = vsyncpa [#allocation6], 1 }
 0x408   :  { %3286 = vsyncpa [#allocation6 + $0x1], 1 }

</bundles_post_ra>
